<compile_context>
chip_gen: v7x
topology: tpu7x:2x2x1
jax: 0.10.0
libtpu: 0.0.40
codegen_flags: <defaults>
</compile_context>

<pallas_src>
import jax
import jax.numpy as jnp
from jax import lax
from jax.experimental import pallas as pl
from jax.experimental.pallas import tpu as pltpu

EPS = 1e-5
LANE = 128


def _round_up(x, m):
    return (x + m - 1) // m * m


def _pick_tile(m, cap=1024):
    """Row tile for the (M, C) streaming passes: largest multiple-of-8 divisor of m
    that is <= cap; small m uses m itself (full-dim blocks are always legal)."""
    if m <= cap:
        return m
    for d in range(cap - cap % 8, 7, -8):
        if m % d == 0:
            return d
    return m


def _affine_from_stats(sum_vec, sq_vec, gamma_p, beta_p, m):
    """(sum, sum_sq) over m elements -> per-channel (scale, shift) rows, f32."""
    mean = sum_vec / m
    var = jnp.maximum(sq_vec / m - mean * mean, 0.0)
    scale = gamma_p * lax.rsqrt(var + EPS)
    shift = beta_p - mean * scale
    return jnp.stack([scale, shift], axis=0)  # (2, Cpad)


# ---------------- pass 1: 3x3 conv (9 shifted matmuls) + BN1 partial stats ----------
def _make_conv3x3_kernel(H, W, W2p):
    HW2 = H * W2p

    def kernel(xp_ref, w3_ref, y_ref, s_ref, q_ref):
        # xp_ref: ((H+3)*W2p, Cp_in) bf16  -- row-flattened padded image
        # w3_ref: (9, Cp_in, TCO)     bf16  -- per-tap weight matrices (tap = dy*3+dx)
        # y_ref : (H, W, TCO)         bf16  -- conv output (compact, dead cols removed)
        # s_ref / q_ref: (1, TCO)     f32   -- partial sum / sum-of-squares
        tco = y_ref.shape[-1]
        acc = jnp.zeros((HW2, tco), jnp.float32)
        for dy in range(3):
            for dx in range(3):
                off = dy * W2p + dx            # dy offsets are 8-aligned; dx shift <= 2
                xs = xp_ref[off:off + HW2, :]
                acc = acc + jnp.dot(xs, w3_ref[dy * 3 + dx],
                                    preferred_element_type=jnp.float32)
        # mask the dead columns (w in [W, W2p)) out of the statistics
        col = lax.broadcasted_iota(jnp.int32, (HW2, 1), 0) % W2p
        accm = jnp.where(col < W, acc, 0.0)
        s_ref[...] = jnp.sum(accm, axis=0, keepdims=True)
        q_ref[...] = jnp.sum(accm * accm, axis=0, keepdims=True)
        # compact (drop dead columns) + cast + store
        y_ref[...] = acc.reshape(H, W2p, tco)[:, :W, :].astype(y_ref.dtype)

    return kernel


# ---------- pass 2: BN1 affine + ReLU + 1x1 conv + BN2 partial stats (M-tiled) -------
def _make_bn_conv1x1_kernel():
    def kernel(y_ref, a1_ref, w1_ref, z_ref, s_ref, q_ref):
        # y_ref: (TM, Cp_out) bf16   a1_ref: (2, Cp_out) f32 [scale; shift]
        # w1_ref: (Cp_out, Cp_exp) bf16   z_ref: (TM, Cp_exp) bf16
        # s_ref / q_ref: (1, Cp_exp) f32 partial sums for this tile
        y = y_ref[...].astype(jnp.float32)
        y = jnp.maximum(y * a1_ref[0:1, :] + a1_ref[1:2, :], 0.0)
        z = jnp.dot(y.astype(jnp.bfloat16), w1_ref[...],
                    preferred_element_type=jnp.float32)
        z_ref[...] = z.astype(z_ref.dtype)
        s_ref[...] = jnp.sum(z, axis=0, keepdims=True)
        q_ref[...] = jnp.sum(z * z, axis=0, keepdims=True)

    return kernel


# --------------- pass 3: BN2 affine + residual add + final ReLU ----------------------
def _make_bn_residual_kernel(c_used):
    def kernel(z_ref, id_ref, a2_ref, o_ref):
        # z_ref: (TM, Cp_exp) bf16   id_ref: (TM, Cexp) bf16   o_ref: (TM, Cexp) f32
        z = z_ref[...].astype(jnp.float32) * a2_ref[0:1, :] + a2_ref[1:2, :]
        o_ref[...] = jnp.maximum(z[:, :c_used] + id_ref[...].astype(jnp.float32), 0.0)

    return kernel


def resnet_below50_block(x_nchw, conv1_w, gamma1, beta1, conv2_w, gamma2, beta2):
    """Forward of ResNetBelow50Block with default args (stride=1, expand=1,
    identity_downsample=None). x_nchw: (N, Cin, H, W) float32."""
    N, Cin, H, W = x_nchw.shape
    Cout = conv1_w.shape[0]
    Cexp = conv2_w.shape[0]
    assert conv2_w.shape[1] == Cout and Cin == Cexp, \
        "only the default block config (stride=1, no identity_downsample) is supported"
    M = N * H * W
    f32, bf16 = jnp.float32, jnp.bfloat16

    Cp_in = _round_up(Cin, LANE)
    Cp_out = _round_up(Cout, LANE)
    Cp_exp = _round_up(Cexp, LANE)
    TCO = LANE
    n_co = Cp_out // TCO

    W2p = _round_up(W + 2, 8)          # padded width, 8-aligned so dy offsets are aligned
    LP = (H + 3) * W2p                  # +3 rows: 1 top halo, 1 bottom halo, 1 slack row
    HW2 = H * W2p

    # NCHW -> NHWC (bf16), halo + slack + lane pad, flatten spatial rows for pass 1
    x_nhwc = jnp.transpose(x_nchw, (0, 2, 3, 1)).astype(bf16)            # (N, H, W, Cin)
    xpad = jnp.pad(x_nhwc, ((0, 0), (1, 2), (1, W2p - W - 1), (0, Cp_in - Cin)))
    xpad = xpad.reshape(N, LP, Cp_in)

    # weights: (O, I, kh, kw) -> per-tap (Cin, Cout) matmuls / (Cout, Cexp), bf16
    w3 = jnp.transpose(conv1_w, (2, 3, 1, 0)).reshape(9, Cin, Cout)
    w3 = jnp.pad(w3, ((0, 0), (0, Cp_in - Cin), (0, Cp_out - Cout))).astype(bf16)
    w1 = jnp.transpose(conv2_w[:, :, 0, 0], (1, 0))
    w1 = jnp.pad(w1, ((0, Cp_out - Cout), (0, Cp_exp - Cexp))).astype(bf16)

    g1 = jnp.pad(gamma1.astype(f32), (0, Cp_out - Cout))
    b1 = jnp.pad(beta1.astype(f32), (0, Cp_out - Cout))
    g2 = jnp.pad(gamma2.astype(f32), (0, Cp_exp - Cexp))
    b2 = jnp.pad(beta2.astype(f32), (0, Cp_exp - Cexp))

    # ------------------ pass 1: conv3x3 + BN1 partial stats ------------------
    y1, s1p, q1p = pl.pallas_call(
        _make_conv3x3_kernel(H, W, W2p),
        out_shape=(jax.ShapeDtypeStruct((N, H, W, Cp_out), bf16),
                   jax.ShapeDtypeStruct((N, 1, Cp_out), f32),
                   jax.ShapeDtypeStruct((N, 1, Cp_out), f32)),
        grid=(N, n_co),
        in_specs=[
            pl.BlockSpec((None, LP, Cp_in), lambda n, c: (n, 0, 0)),
            pl.BlockSpec((9, Cp_in, TCO), lambda n, c: (0, 0, c)),
        ],
        out_specs=(
            pl.BlockSpec((None, H, W, TCO), lambda n, c: (n, 0, 0, c)),
            pl.BlockSpec((None, 1, TCO), lambda n, c: (n, 0, c)),
            pl.BlockSpec((None, 1, TCO), lambda n, c: (n, 0, c)),
        ),
        compiler_params=pltpu.CompilerParams(
            dimension_semantics=("parallel", "parallel")),
    )(xpad, w3)

    a1 = _affine_from_stats(jnp.sum(s1p, axis=0)[0], jnp.sum(q1p, axis=0)[0],
                            g1, b1, M)                                   # (2, Cp_out)

    # --------- pass 2: BN1 apply + ReLU + conv1x1 + BN2 partial stats ---------
    TM = _pick_tile(M)
    G = M // TM
    y1_2d = y1.reshape(M, Cp_out)                                        # free collapse
    z, s2p, q2p = pl.pallas_call(
        _make_bn_conv1x1_kernel(),
        out_shape=(jax.ShapeDtypeStruct((M, Cp_exp), bf16),
                   jax.ShapeDtypeStruct((G, 1, Cp_exp), f32),
                   jax.ShapeDtypeStruct((G, 1, Cp_exp), f32)),
        grid=(G,),
        in_specs=[
            pl.BlockSpec((TM, Cp_out), lambda i: (i, 0)),
            pl.BlockSpec((2, Cp_out), lambda i: (0, 0)),
            pl.BlockSpec((Cp_out, Cp_exp), lambda i: (0, 0)),
        ],
        out_specs=(
            pl.BlockSpec((TM, Cp_exp), lambda i: (i, 0)),
            pl.BlockSpec((None, 1, Cp_exp), lambda i: (i, 0, 0)),
            pl.BlockSpec((None, 1, Cp_exp), lambda i: (i, 0, 0)),
        ),
        compiler_params=pltpu.CompilerParams(dimension_semantics=("parallel",)),
    )(y1_2d, a1, w1)

    a2 = _affine_from_stats(jnp.sum(s2p, axis=0)[0], jnp.sum(q2p, axis=0)[0],
                            g2, b2, M)                                   # (2, Cp_exp)

    # identity branch at native channel width (no pad materialization)
    xid = x_nhwc.reshape(M, Cin)

    # ------------ pass 3: BN2 apply + residual + final ReLU ------------
    out2d = pl.pallas_call(
        _make_bn_residual_kernel(Cexp),
        out_shape=jax.ShapeDtypeStruct((M, Cexp), f32),
        grid=(G,),
        in_specs=[
            pl.BlockSpec((TM, Cp_exp), lambda i: (i, 0)),
            pl.BlockSpec((TM, Cin), lambda i: (i, 0)),
            pl.BlockSpec((2, Cp_exp), lambda i: (0, 0)),
        ],
        out_specs=pl.BlockSpec((TM, Cexp), lambda i: (i, 0)),
        compiler_params=pltpu.CompilerParams(dimension_semantics=("parallel",)),
    )(z, xid, a2)

    out = out2d.reshape(N, H, W, Cexp)
    return jnp.transpose(out, (0, 3, 1, 2)).astype(x_nchw.dtype)


def ref_forward(x, conv1_w, gamma1, beta1, conv2_w, gamma2, beta2):
    """Pure-JAX f32 reference (NCHW), training-mode BatchNorm."""
    def bn(y, g, b):
        m = jnp.mean(y, axis=(0, 2, 3), keepdims=True)
        v = jnp.mean(jnp.square(y - m), axis=(0, 2, 3), keepdims=True)
        return (y - m) * lax.rsqrt(v + EPS) * g.reshape(1, -1, 1, 1) \
            + b.reshape(1, -1, 1, 1)

    y = lax.conv_general_dilated(
        x, conv1_w, window_strides=(1, 1), padding=((1, 1), (1, 1)),
        dimension_numbers=("NCHW", "OIHW", "NCHW"))
    y = jnp.maximum(bn(y, gamma1, beta1), 0.0)
    z = lax.conv_general_dilated(
        y, conv2_w, window_strides=(1, 1), padding=((0, 0), (0, 0)),
        dimension_numbers=("NCHW", "OIHW", "NCHW"))
    z = bn(z, gamma2, beta2) + x
    return jnp.maximum(z, 0.0)


if __name__ == "__main__":
    key = jax.random.PRNGKey(0)
    k_x, k_w3, k_w1, k_g1, k_b1, k_g2, k_b2 = jax.random.split(key, 7)

    N, C, H, W = 2, 4, 16, 16          # in_channels = out_channels = 4, expand_factor = 1
    x = jax.random.normal(k_x, (N, C, H, W), dtype=jnp.float32)

    # deterministic synthetic parameters (shapes follow nn.Conv2d / nn.BatchNorm2d)
    conv1_w = jax.random.normal(k_w3, (C, C, 3, 3), dtype=jnp.float32) / jnp.sqrt(9.0 * C)
    conv2_w = jax.random.normal(k_w1, (C, C, 1, 1), dtype=jnp.float32) / jnp.sqrt(1.0 * C)
    gamma1 = 1.0 + 0.1 * jax.random.normal(k_g1, (C,), dtype=jnp.float32)
    beta1 = 0.1 * jax.random.normal(k_b1, (C,), dtype=jnp.float32)
    gamma2 = 1.0 + 0.1 * jax.random.normal(k_g2, (C,), dtype=jnp.float32)
    beta2 = 0.1 * jax.random.normal(k_b2, (C,), dtype=jnp.float32)

    fwd = jax.jit(resnet_below50_block)
    out = jax.block_until_ready(
        fwd(x, conv1_w, gamma1, beta1, conv2_w, gamma2, beta2))

    ref = jax.block_until_ready(
        ref_forward(x, conv1_w, gamma1, beta1, conv2_w, gamma2, beta2))

    assert out.shape == (N, C, H, W) and out.dtype == jnp.float32
    # bf16 storage of the streamed intermediates widens the tolerance vs. the f32 reference
    err = jnp.max(jnp.abs(out - ref))
    assert jnp.allclose(out, ref, atol=1e-1, rtol=1e-1), f"max abs diff {err}"

    print("KERNEL_OK")
</pallas_src>

<mosaic_0001>
module attributes {stable_mosaic.version = 11 : i64} {
  func.func @kernel(%arg0: i32, %arg1: memref<512x128xbf16, #tpu.memory_space<vmem>>, %arg2: memref<512x4xbf16, #tpu.memory_space<vmem>>, %arg3: memref<2x128xf32, #tpu.memory_space<vmem>>, %arg4: memref<512x4xf32, #tpu.memory_space<vmem>>) attributes {dimension_semantics = [#tpu.dimension_semantics<parallel>], iteration_bounds = array<i64: 1>, scalar_prefetch = 0 : i64, scratch_operands = 0 : i64, tpu.core_type = #tpu.core_type<tc>, window_params = [{transform_indices = @transform_0, window_bounds = array<i64: 512, 128>}, {transform_indices = @transform_1, window_bounds = array<i64: 512, 4>}, {pipeline_mode = #tpu.pipeline_mode<synchronous>, transform_indices = @transform_2, window_bounds = array<i64: 2, 128>}, {transform_indices = @transform_3, window_bounds = array<i64: 512, 4>}]} {
    %c0 = arith.constant 0 : index
    %c0_0 = arith.constant 0 : index
    %0 = vector.load %arg1[%c0, %c0_0] : memref<512x128xbf16, #tpu.memory_space<vmem>>, vector<512x128xbf16>
    %1 = arith.extf %0 : vector<512x128xbf16> to vector<512x128xf32>
    %c0_1 = arith.constant 0 : index
    %c0_2 = arith.constant 0 : index
    %2 = vector.load %arg3[%c0_1, %c0_2] : memref<2x128xf32, #tpu.memory_space<vmem>>, vector<1x128xf32>
    %3 = vector.broadcast %2 : vector<1x128xf32> to vector<512x128xf32>
    %4 = arith.mulf %1, %3 : vector<512x128xf32>
    %c1 = arith.constant 1 : index
    %c0_3 = arith.constant 0 : index
    %5 = vector.load %arg3[%c1, %c0_3] : memref<2x128xf32, #tpu.memory_space<vmem>>, vector<1x128xf32>
    %6 = vector.broadcast %5 : vector<1x128xf32> to vector<512x128xf32>
    %7 = arith.addf %4, %6 : vector<512x128xf32>
    %8 = vector.extract_strided_slice %7 {offsets = [0, 0], sizes = [512, 4], strides = [1, 1]} : vector<512x128xf32> to vector<512x4xf32>
    %c0_4 = arith.constant 0 : index
    %c0_5 = arith.constant 0 : index
    %9 = vector.load %arg2[%c0_4, %c0_5] : memref<512x4xbf16, #tpu.memory_space<vmem>>, vector<512x4xbf16>
    %10 = arith.extf %9 : vector<512x4xbf16> to vector<512x4xf32>
    %11 = arith.addf %8, %10 : vector<512x4xf32>
    %cst = arith.constant 0.000000e+00 : f32
    %12 = vector.broadcast %cst : f32 to vector<512x4xf32>
    %13 = arith.maximumf %11, %12 : vector<512x4xf32>
    %c0_6 = arith.constant 0 : index
    %c0_7 = arith.constant 0 : index
    %14 = vector.load %arg4[%c0_6, %c0_7] : memref<512x4xf32, #tpu.memory_space<vmem>>, vector<512x4xf32>
    tpu.vector_store %arg4[%c0_6, %c0_7], %13 {strides = array<i32>} : memref<512x4xf32, #tpu.memory_space<vmem>>, vector<512x4xf32>,
    return
  }
  func.func @transform_0(%arg0: i32) -> (i32, i32) {
    %c0_i32 = arith.constant 0 : i32
    %c0_i32_0 = arith.constant 0 : i32
    return %arg0, %c0_i32 : i32, i32
  }
  func.func @transform_1(%arg0: i32) -> (i32, i32) {
    %c0_i32 = arith.constant 0 : i32
    %c0_i32_0 = arith.constant 0 : i32
    return %arg0, %c0_i32 : i32, i32
  }
  func.func @transform_2(%arg0: i32) -> (i32, i32) {
    %c0_i32 = arith.constant 0 : i32
    %c0_i32_0 = arith.constant 0 : i32
    %c0_i32_1 = arith.constant 0 : i32
    return %c0_i32, %c0_i32_0 : i32, i32
  }
  func.func @transform_3(%arg0: i32) -> (i32, i32) {
    %c0_i32 = arith.constant 0 : i32
    %c0_i32_0 = arith.constant 0 : i32
    return %arg0, %c0_i32 : i32, i32
  }
}

module attributes {stable_mosaic.version = 11 : i64} {
  func.func @kernel(%arg0: i32, %arg1: i32, %arg2: memref<1x456x128xbf16, #tpu.memory_space<vmem>>, %arg3: memref<9x128x128xbf16, #tpu.memory_space<vmem>>, %arg4: memref<1x16x16x128xbf16, #tpu.memory_space<vmem>>, %arg5: memref<1x1x128xf32, #tpu.memory_space<vmem>>, %arg6: memref<1x1x128xf32, #tpu.memory_space<vmem>>) attributes {dimension_semantics = [#tpu.dimension_semantics<parallel>, #tpu.dimension_semantics<parallel>], iteration_bounds = array<i64: 2, 1>, scalar_prefetch = 0 : i64, scratch_operands = 0 : i64, tpu.core_type = #tpu.core_type<tc>, window_params = [{transform_indices = @transform_0, window_bounds = array<i64: 1, 456, 128>}, {transform_indices = @transform_1, window_bounds = array<i64: 9, 128, 128>}, {transform_indices = @transform_2, window_bounds = array<i64: 1, 16, 16, 128>}, {transform_indices = @transform_3, window_bounds = array<i64: 1, 1, 128>}, {transform_indices = @transform_4, window_bounds = array<i64: 1, 1, 128>}]} {
    %cst = arith.constant 0.000000e+00 : f32
    %0 = vector.broadcast %cst : f32 to vector<384x128xf32>
    %c0 = arith.constant 0 : index
    %c0_0 = arith.constant 0 : index
    %c0_1 = arith.constant 0 : index
    %1 = vector.load %arg2[%c0, %c0_0, %c0_1] : memref<1x456x128xbf16, #tpu.memory_space<vmem>>, vector<1x384x128xbf16>
    %2 = vector.shape_cast %1 : vector<1x384x128xbf16> to vector<384x128xbf16>
    %c0_2 = arith.constant 0 : index
    %c0_3 = arith.constant 0 : index
    %c0_4 = arith.constant 0 : index
    %3 = vector.load %arg3[%c0_2, %c0_3, %c0_4] : memref<9x128x128xbf16, #tpu.memory_space<vmem>>, vector<1x128x128xbf16>
    %4 = vector.shape_cast %3 : vector<1x128x128xbf16> to vector<128x128xbf16>
    %cst_5 = arith.constant dense<0.000000e+00> : vector<384x128xf32>
    %5 = tpu.matmul %2, %4, %cst_5 {dimension_numbers = #tpu.dot_dimension_numbers<[1], [0], [0], [1], [0, 0, 1, 1], [], []>} : vector<384x128xbf16>, vector<128x128xbf16>, vector<384x128xf32> -> vector<384x128xf32>
    %6 = arith.addf %0, %5 : vector<384x128xf32>
    %c0_6 = arith.constant 0 : index
    %c1 = arith.constant 1 : index
    %c0_7 = arith.constant 0 : index
    %7 = vector.load %arg2[%c0_6, %c1, %c0_7] : memref<1x456x128xbf16, #tpu.memory_space<vmem>>, vector<1x384x128xbf16>
    %8 = vector.shape_cast %7 : vector<1x384x128xbf16> to vector<384x128xbf16>
    %c1_8 = arith.constant 1 : index
    %c0_9 = arith.constant 0 : index
    %c0_10 = arith.constant 0 : index
    %9 = vector.load %arg3[%c1_8, %c0_9, %c0_10] : memref<9x128x128xbf16, #tpu.memory_space<vmem>>, vector<1x128x128xbf16>
    %10 = vector.shape_cast %9 : vector<1x128x128xbf16> to vector<128x128xbf16>
    %cst_11 = arith.constant dense<0.000000e+00> : vector<384x128xf32>
    %11 = tpu.matmul %8, %10, %cst_11 {dimension_numbers = #tpu.dot_dimension_numbers<[1], [0], [0], [1], [0, 0, 1, 1], [], []>} : vector<384x128xbf16>, vector<128x128xbf16>, vector<384x128xf32> -> vector<384x128xf32>
    %12 = arith.addf %6, %11 : vector<384x128xf32>
    %c0_12 = arith.constant 0 : index
    %c2 = arith.constant 2 : index
    %c0_13 = arith.constant 0 : index
    %13 = vector.load %arg2[%c0_12, %c2, %c0_13] : memref<1x456x128xbf16, #tpu.memory_space<vmem>>, vector<1x384x128xbf16>
    %14 = vector.shape_cast %13 : vector<1x384x128xbf16> to vector<384x128xbf16>
    %c2_14 = arith.constant 2 : index
    %c0_15 = arith.constant 0 : index
    %c0_16 = arith.constant 0 : index
    %15 = vector.load %arg3[%c2_14, %c0_15, %c0_16] : memref<9x128x128xbf16, #tpu.memory_space<vmem>>, vector<1x128x128xbf16>
    %16 = vector.shape_cast %15 : vector<1x128x128xbf16> to vector<128x128xbf16>
    %cst_17 = arith.constant dense<0.000000e+00> : vector<384x128xf32>
    %17 = tpu.matmul %14, %16, %cst_17 {dimension_numbers = #tpu.dot_dimension_numbers<[1], [0], [0], [1], [0, 0, 1, 1], [], []>} : vector<384x128xbf16>, vector<128x128xbf16>, vector<384x128xf32> -> vector<384x128xf32>
    %18 = arith.addf %12, %17 : vector<384x128xf32>
    %c0_18 = arith.constant 0 : index
    %c24 = arith.constant 24 : index
    %c0_19 = arith.constant 0 : index
    %19 = vector.load %arg2[%c0_18, %c24, %c0_19] : memref<1x456x128xbf16, #tpu.memory_space<vmem>>, vector<1x384x128xbf16>
    %20 = vector.shape_cast %19 : vector<1x384x128xbf16> to vector<384x128xbf16>
    %c3 = arith.constant 3 : index
    %c0_20 = arith.constant 0 : index
    %c0_21 = arith.constant 0 : index
    %21 = vector.load %arg3[%c3, %c0_20, %c0_21] : memref<9x128x128xbf16, #tpu.memory_space<vmem>>, vector<1x128x128xbf16>
    %22 = vector.shape_cast %21 : vector<1x128x128xbf16> to vector<128x128xbf16>
    %cst_22 = arith.constant dense<0.000000e+00> : vector<384x128xf32>
    %23 = tpu.matmul %20, %22, %cst_22 {dimension_numbers = #tpu.dot_dimension_numbers<[1], [0], [0], [1], [0, 0, 1, 1], [], []>} : vector<384x128xbf16>, vector<128x128xbf16>, vector<384x128xf32> -> vector<384x128xf32>
    %24 = arith.addf %18, %23 : vector<384x128xf32>
    %c0_23 = arith.constant 0 : index
    %c25 = arith.constant 25 : index
    %c0_24 = arith.constant 0 : index
    %25 = vector.load %arg2[%c0_23, %c25, %c0_24] : memref<1x456x128xbf16, #tpu.memory_space<vmem>>, vector<1x384x128xbf16>
    %26 = vector.shape_cast %25 : vector<1x384x128xbf16> to vector<384x128xbf16>
    %c4 = arith.constant 4 : index
    %c0_25 = arith.constant 0 : index
    %c0_26 = arith.constant 0 : index
    %27 = vector.load %arg3[%c4, %c0_25, %c0_26] : memref<9x128x128xbf16, #tpu.memory_space<vmem>>, vector<1x128x128xbf16>
    %28 = vector.shape_cast %27 : vector<1x128x128xbf16> to vector<128x128xbf16>
    %cst_27 = arith.constant dense<0.000000e+00> : vector<384x128xf32>
    %29 = tpu.matmul %26, %28, %cst_27 {dimension_numbers = #tpu.dot_dimension_numbers<[1], [0], [0], [1], [0, 0, 1, 1], [], []>} : vector<384x128xbf16>, vector<128x128xbf16>, vector<384x128xf32> -> vector<384x128xf32>
    %30 = arith.addf %24, %29 : vector<384x128xf32>
    %c0_28 = arith.constant 0 : index
    %c26 = arith.constant 26 : index
    %c0_29 = arith.constant 0 : index
    %31 = vector.load %arg2[%c0_28, %c26, %c0_29] : memref<1x456x128xbf16, #tpu.memory_space<vmem>>, vector<1x384x128xbf16>
    %32 = vector.shape_cast %31 : vector<1x384x128xbf16> to vector<384x128xbf16>
    %c5 = arith.constant 5 : index
    %c0_30 = arith.constant 0 : index
    %c0_31 = arith.constant 0 : index
    %33 = vector.load %arg3[%c5, %c0_30, %c0_31] : memref<9x128x128xbf16, #tpu.memory_space<vmem>>, vector<1x128x128xbf16>
    %34 = vector.shape_cast %33 : vector<1x128x128xbf16> to vector<128x128xbf16>
    %cst_32 = arith.constant dense<0.000000e+00> : vector<384x128xf32>
    %35 = tpu.matmul %32, %34, %cst_32 {dimension_numbers = #tpu.dot_dimension_numbers<[1], [0], [0], [1], [0, 0, 1, 1], [], []>} : vector<384x128xbf16>, vector<128x128xbf16>, vector<384x128xf32> -> vector<384x128xf32>
    %36 = arith.addf %30, %35 : vector<384x128xf32>
    %c0_33 = arith.constant 0 : index
    %c48 = arith.constant 48 : index
    %c0_34 = arith.constant 0 : index
    %37 = vector.load %arg2[%c0_33, %c48, %c0_34] : memref<1x456x128xbf16, #tpu.memory_space<vmem>>, vector<1x384x128xbf16>
    %38 = vector.shape_cast %37 : vector<1x384x128xbf16> to vector<384x128xbf16>
    %c6 = arith.constant 6 : index
    %c0_35 = arith.constant 0 : index
    %c0_36 = arith.constant 0 : index
    %39 = vector.load %arg3[%c6, %c0_35, %c0_36] : memref<9x128x128xbf16, #tpu.memory_space<vmem>>, vector<1x128x128xbf16>
    %40 = vector.shape_cast %39 : vector<1x128x128xbf16> to vector<128x128xbf16>
    %cst_37 = arith.constant dense<0.000000e+00> : vector<384x128xf32>
    %41 = tpu.matmul %38, %40, %cst_37 {dimension_numbers = #tpu.dot_dimension_numbers<[1], [0], [0], [1], [0, 0, 1, 1], [], []>} : vector<384x128xbf16>, vector<128x128xbf16>, vector<384x128xf32> -> vector<384x128xf32>
    %42 = arith.addf %36, %41 : vector<384x128xf32>
    %c0_38 = arith.constant 0 : index
    %c49 = arith.constant 49 : index
    %c0_39 = arith.constant 0 : index
    %43 = vector.load %arg2[%c0_38, %c49, %c0_39] : memref<1x456x128xbf16, #tpu.memory_space<vmem>>, vector<1x384x128xbf16>
    %44 = vector.shape_cast %43 : vector<1x384x128xbf16> to vector<384x128xbf16>
    %c7 = arith.constant 7 : index
    %c0_40 = arith.constant 0 : index
    %c0_41 = arith.constant 0 : index
    %45 = vector.load %arg3[%c7, %c0_40, %c0_41] : memref<9x128x128xbf16, #tpu.memory_space<vmem>>, vector<1x128x128xbf16>
    %46 = vector.shape_cast %45 : vector<1x128x128xbf16> to vector<128x128xbf16>
    %cst_42 = arith.constant dense<0.000000e+00> : vector<384x128xf32>
    %47 = tpu.matmul %44, %46, %cst_42 {dimension_numbers = #tpu.dot_dimension_numbers<[1], [0], [0], [1], [0, 0, 1, 1], [], []>} : vector<384x128xbf16>, vector<128x128xbf16>, vector<384x128xf32> -> vector<384x128xf32>
    %48 = arith.addf %42, %47 : vector<384x128xf32>
    %c0_43 = arith.constant 0 : index
    %c50 = arith.constant 50 : index
    %c0_44 = arith.constant 0 : index
    %49 = vector.load %arg2[%c0_43, %c50, %c0_44] : memref<1x456x128xbf16, #tpu.memory_space<vmem>>, vector<1x384x128xbf16>
    %50 = vector.shape_cast %49 : vector<1x384x128xbf16> to vector<384x128xbf16>
    %c8 = arith.constant 8 : index
    %c0_45 = arith.constant 0 : index
    %c0_46 = arith.constant 0 : index
    %51 = vector.load %arg3[%c8, %c0_45, %c0_46] : memref<9x128x128xbf16, #tpu.memory_space<vmem>>, vector<1x128x128xbf16>
    %52 = vector.shape_cast %51 : vector<1x128x128xbf16> to vector<128x128xbf16>
    %cst_47 = arith.constant dense<0.000000e+00> : vector<384x128xf32>
    %53 = tpu.matmul %50, %52, %cst_47 {dimension_numbers = #tpu.dot_dimension_numbers<[1], [0], [0], [1], [0, 0, 1, 1], [], []>} : vector<384x128xbf16>, vector<128x128xbf16>, vector<384x128xf32> -> vector<384x128xf32>
    %54 = arith.addf %48, %53 : vector<384x128xf32>
    %55 = tpu.iota {dimensions = array<i32: 0>} : vector<384x1xi32>
    %c24_i32 = arith.constant 24 : i32
    %c0_i32 = arith.constant 0 : i32
    %56 = arith.cmpi eq, %c24_i32, %c0_i32 : i32
    %c1_i32 = arith.constant 1 : i32
    %57 = arith.select %56, %c1_i32, %c24_i32 : i32
    %58 = vector.broadcast %57 : i32 to vector<384x1xi32>
    %59 = arith.remsi %55, %58 : vector<384x1xi32>
    %c0_i32_48 = arith.constant 0 : i32
    %60 = vector.broadcast %c0_i32_48 : i32 to vector<384x1xi32>
    %61 = arith.cmpi ne, %59, %60 : vector<384x1xi32>
    %c0_i32_49 = arith.constant 0 : i32
    %62 = vector.broadcast %c0_i32_49 : i32 to vector<384x1xi32>
    %63 = arith.cmpi slt, %59, %62 : vector<384x1xi32>
    %c0_i32_50 = arith.constant 0 : i32
    %64 = arith.cmpi slt, %57, %c0_i32_50 : i32
    %65 = vector.broadcast %64 : i1 to vector<384x1xi1>
    %66 = vector.broadcast %65 : vector<384x1xi1> to vector<384x1xi1>
    %67 = arith.xori %63, %66 : vector<384x1xi1>
    %68 = arith.andi %67, %61 : vector<384x1xi1>
    %69 = vector.broadcast %57 : i32 to vector<384x1xi32>
    %70 = arith.addi %59, %69 : vector<384x1xi32>
    %71 = arith.select %68, %70, %59 : vector<384x1xi1>, vector<384x1xi32>
    %c16_i32 = arith.constant 16 : i32
    %72 = vector.broadcast %c16_i32 : i32 to vector<384x1xi32>
    %73 = arith.cmpi slt, %71, %72 : vector<384x1xi32>
    %cst_51 = arith.constant 0.000000e+00 : f32
    %74 = vector.shape_cast %73 : vector<384x1xi1> to vector<384x1xi1>
    %75 = vector.broadcast %74 : vector<384x1xi1> to vector<384x128xi1>
    %76 = vector.broadcast %cst_51 : f32 to vector<384x128xf32>
    %77 = arith.select %75, %54, %76 : vector<384x128xi1>, vector<384x128xf32>
    %cst_52 = arith.constant dense<0.000000e+00> : vector<128xf32>
    %78 = vector.multi_reduction <add>, %77, %cst_52 [0] : vector<384x128xf32> to vector<128xf32>
    %79 = vector.shape_cast %78 : vector<128xf32> to vector<1x128xf32>
    %c0_53 = arith.constant 0 : index
    %c0_54 = arith.constant 0 : index
    %c0_55 = arith.constant 0 : index
    %80 = vector.load %arg5[%c0_53, %c0_54, %c0_55] : memref<1x1x128xf32, #tpu.memory_space<vmem>>, vector<1x1x128xf32>
    %81 = vector.shape_cast %80 : vector<1x1x128xf32> to vector<1x128xf32>
    %82 = vector.shape_cast %79 : vector<1x128xf32> to vector<1x1x128xf32>
    tpu.vector_store %arg5[%c0_53, %c0_54, %c0_55], %82 {strides = array<i32>} : memref<1x1x128xf32, #tpu.memory_space<vmem>>, vector<1x1x128xf32>,
    %83 = arith.mulf %77, %77 : vector<384x128xf32>
    %cst_56 = arith.constant dense<0.000000e+00> : vector<128xf32>
    %84 = vector.multi_reduction <add>, %83, %cst_56 [0] : vector<384x128xf32> to vector<128xf32>
    %85 = vector.shape_cast %84 : vector<128xf32> to vector<1x128xf32>
    %c0_57 = arith.constant 0 : index
    %c0_58 = arith.constant 0 : index
    %c0_59 = arith.constant 0 : index
    %86 = vector.load %arg6[%c0_57, %c0_58, %c0_59] : memref<1x1x128xf32, #tpu.memory_space<vmem>>, vector<1x1x128xf32>
    %87 = vector.shape_cast %86 : vector<1x1x128xf32> to vector<1x128xf32>
    %88 = vector.shape_cast %85 : vector<1x128xf32> to vector<1x1x128xf32>
    tpu.vector_store %arg6[%c0_57, %c0_58, %c0_59], %88 {strides = array<i32>} : memref<1x1x128xf32, #tpu.memory_space<vmem>>, vector<1x1x128xf32>,
    %89 = vector.shape_cast %54 : vector<384x128xf32> to vector<16x24x128xf32>
    %90 = vector.extract_strided_slice %89 {offsets = [0, 0, 0], sizes = [16, 16, 128], strides = [1, 1, 1]} : vector<16x24x128xf32> to vector<16x16x128xf32>
    %91 = arith.truncf %90 : vector<16x16x128xf32> to vector<16x16x128xbf16>
    %c0_60 = arith.constant 0 : index
    %c0_61 = arith.constant 0 : index
    %c0_62 = arith.constant 0 : index
    %c0_63 = arith.constant 0 : index
    %92 = vector.load %arg4[%c0_60, %c0_61, %c0_62, %c0_63] : memref<1x16x16x128xbf16, #tpu.memory_space<vmem>>, vector<1x16x16x128xbf16>
    %93 = vector.shape_cast %92 : vector<1x16x16x128xbf16> to vector<16x16x128xbf16>
    %94 = vector.shape_cast %91 : vector<16x16x128xbf16> to vector<1x16x16x128xbf16>
    tpu.vector_store %arg4[%c0_60, %c0_61, %c0_62, %c0_63], %94 {strides = array<i32>} : memref<1x16x16x128xbf16, #tpu.memory_space<vmem>>, vector<1x16x16x128xbf16>,
    return
  }
  func.func @transform_0(%arg0: i32, %arg1: i32) -> (i32, i32, i32) {
    %c0_i32 = arith.constant 0 : i32
    %c0_i32_0 = arith.constant 0 : i32
    %c0_i32_1 = arith.constant 0 : i32
    return %arg0, %c0_i32, %c0_i32_0 : i32, i32, i32
  }
  func.func @transform_1(%arg0: i32, %arg1: i32) -> (i32, i32, i32) {
    %c0_i32 = arith.constant 0 : i32
    %c0_i32_0 = arith.constant 0 : i32
    %c0_i32_1 = arith.constant 0 : i32
    return %c0_i32, %c0_i32_0, %arg1 : i32, i32, i32
  }
  func.func @transform_2(%arg0: i32, %arg1: i32) -> (i32, i32, i32, i32) {
    %c0_i32 = arith.constant 0 : i32
    %c0_i32_0 = arith.constant 0 : i32
    %c0_i32_1 = arith.constant 0 : i32
    return %arg0, %c0_i32, %c0_i32_0, %arg1 : i32, i32, i32, i32
  }
  func.func @transform_3(%arg0: i32, %arg1: i32) -> (i32, i32, i32) {
    %c0_i32 = arith.constant 0 : i32
    %c0_i32_0 = arith.constant 0 : i32
    return %arg0, %c0_i32, %arg1 : i32, i32, i32
  }
  func.func @transform_4(%arg0: i32, %arg1: i32) -> (i32, i32, i32) {
    %c0_i32 = arith.constant 0 : i32
    %c0_i32_0 = arith.constant 0 : i32
    return %arg0, %c0_i32, %arg1 : i32, i32, i32
  }
}

module attributes {stable_mosaic.version = 11 : i64} {
  func.func @kernel(%arg0: i32, %arg1: memref<512x128xbf16, #tpu.memory_space<vmem>>, %arg2: memref<2x128xf32, #tpu.memory_space<vmem>>, %arg3: memref<128x128xbf16, #tpu.memory_space<vmem>>, %arg4: memref<512x128xbf16, #tpu.memory_space<vmem>>, %arg5: memref<1x1x128xf32, #tpu.memory_space<vmem>>, %arg6: memref<1x1x128xf32, #tpu.memory_space<vmem>>) attributes {dimension_semantics = [#tpu.dimension_semantics<parallel>], iteration_bounds = array<i64: 1>, scalar_prefetch = 0 : i64, scratch_operands = 0 : i64, tpu.core_type = #tpu.core_type<tc>, window_params = [{transform_indices = @transform_0, window_bounds = array<i64: 512, 128>}, {pipeline_mode = #tpu.pipeline_mode<synchronous>, transform_indices = @transform_1, window_bounds = array<i64: 2, 128>}, {pipeline_mode = #tpu.pipeline_mode<synchronous>, transform_indices = @transform_2, window_bounds = array<i64: 128, 128>}, {transform_indices = @transform_3, window_bounds = array<i64: 512, 128>}, {transform_indices = @transform_4, window_bounds = array<i64: 1, 1, 128>}, {transform_indices = @transform_5, window_bounds = array<i64: 1, 1, 128>}]} {
    %c0 = arith.constant 0 : index
    %c0_0 = arith.constant 0 : index
    %0 = vector.load %arg1[%c0, %c0_0] : memref<512x128xbf16, #tpu.memory_space<vmem>>, vector<512x128xbf16>
    %1 = arith.extf %0 : vector<512x128xbf16> to vector<512x128xf32>
    %c0_1 = arith.constant 0 : index
    %c0_2 = arith.constant 0 : index
    %2 = vector.load %arg2[%c0_1, %c0_2] : memref<2x128xf32, #tpu.memory_space<vmem>>, vector<1x128xf32>
    %3 = vector.broadcast %2 : vector<1x128xf32> to vector<512x128xf32>
    %4 = arith.mulf %1, %3 : vector<512x128xf32>
    %c1 = arith.constant 1 : index
    %c0_3 = arith.constant 0 : index
    %5 = vector.load %arg2[%c1, %c0_3] : memref<2x128xf32, #tpu.memory_space<vmem>>, vector<1x128xf32>
    %6 = vector.broadcast %5 : vector<1x128xf32> to vector<512x128xf32>
    %7 = arith.addf %4, %6 : vector<512x128xf32>
    %cst = arith.constant 0.000000e+00 : f32
    %8 = vector.broadcast %cst : f32 to vector<512x128xf32>
    %9 = arith.maximumf %7, %8 : vector<512x128xf32>
    %10 = arith.truncf %9 : vector<512x128xf32> to vector<512x128xbf16>
    %c0_4 = arith.constant 0 : index
    %c0_5 = arith.constant 0 : index
    %11 = vector.load %arg3[%c0_4, %c0_5] : memref<128x128xbf16, #tpu.memory_space<vmem>>, vector<128x128xbf16>
    %cst_6 = arith.constant dense<0.000000e+00> : vector<512x128xf32>
    %12 = tpu.matmul %10, %11, %cst_6 {dimension_numbers = #tpu.dot_dimension_numbers<[1], [0], [0], [1], [0, 0, 1, 1], [], []>} : vector<512x128xbf16>, vector<128x128xbf16>, vector<512x128xf32> -> vector<512x128xf32>
    %13 = arith.truncf %12 : vector<512x128xf32> to vector<512x128xbf16>
    %c0_7 = arith.constant 0 : index
    %c0_8 = arith.constant 0 : index
    %14 = vector.load %arg4[%c0_7, %c0_8] : memref<512x128xbf16, #tpu.memory_space<vmem>>, vector<512x128xbf16>
    tpu.vector_store %arg4[%c0_7, %c0_8], %13 {strides = array<i32>} : memref<512x128xbf16, #tpu.memory_space<vmem>>, vector<512x128xbf16>,
    %cst_9 = arith.constant dense<0.000000e+00> : vector<128xf32>
    %15 = vector.multi_reduction <add>, %12, %cst_9 [0] : vector<512x128xf32> to vector<128xf32>
    %16 = vector.shape_cast %15 : vector<128xf32> to vector<1x128xf32>
    %c0_10 = arith.constant 0 : index
    %c0_11 = arith.constant 0 : index
    %c0_12 = arith.constant 0 : index
    %17 = vector.load %arg5[%c0_10, %c0_11, %c0_12] : memref<1x1x128xf32, #tpu.memory_space<vmem>>, vector<1x1x128xf32>
    %18 = vector.shape_cast %17 : vector<1x1x128xf32> to vector<1x128xf32>
    %19 = vector.shape_cast %16 : vector<1x128xf32> to vector<1x1x128xf32>
    tpu.vector_store %arg5[%c0_10, %c0_11, %c0_12], %19 {strides = array<i32>} : memref<1x1x128xf32, #tpu.memory_space<vmem>>, vector<1x1x128xf32>,
    %20 = arith.mulf %12, %12 : vector<512x128xf32>
    %cst_13 = arith.constant dense<0.000000e+00> : vector<128xf32>
    %21 = vector.multi_reduction <add>, %20, %cst_13 [0] : vector<512x128xf32> to vector<128xf32>
    %22 = vector.shape_cast %21 : vector<128xf32> to vector<1x128xf32>
    %c0_14 = arith.constant 0 : index
    %c0_15 = arith.constant 0 : index
    %c0_16 = arith.constant 0 : index
    %23 = vector.load %arg6[%c0_14, %c0_15, %c0_16] : memref<1x1x128xf32, #tpu.memory_space<vmem>>, vector<1x1x128xf32>
    %24 = vector.shape_cast %23 : vector<1x1x128xf32> to vector<1x128xf32>
    %25 = vector.shape_cast %22 : vector<1x128xf32> to vector<1x1x128xf32>
    tpu.vector_store %arg6[%c0_14, %c0_15, %c0_16], %25 {strides = array<i32>} : memref<1x1x128xf32, #tpu.memory_space<vmem>>, vector<1x1x128xf32>,
    return
  }
  func.func @transform_0(%arg0: i32) -> (i32, i32) {
    %c0_i32 = arith.constant 0 : i32
    %c0_i32_0 = arith.constant 0 : i32
    return %arg0, %c0_i32 : i32, i32
  }
  func.func @transform_1(%arg0: i32) -> (i32, i32) {
    %c0_i32 = arith.constant 0 : i32
    %c0_i32_0 = arith.constant 0 : i32
    %c0_i32_1 = arith.constant 0 : i32
    return %c0_i32, %c0_i32_0 : i32, i32
  }
  func.func @transform_2(%arg0: i32) -> (i32, i32) {
    %c0_i32 = arith.constant 0 : i32
    %c0_i32_0 = arith.constant 0 : i32
    %c0_i32_1 = arith.constant 0 : i32
    return %c0_i32, %c0_i32_0 : i32, i32
  }
  func.func @transform_3(%arg0: i32) -> (i32, i32) {
    %c0_i32 = arith.constant 0 : i32
    %c0_i32_0 = arith.constant 0 : i32
    return %arg0, %c0_i32 : i32, i32
  }
  func.func @transform_4(%arg0: i32) -> (i32, i32, i32) {
    %c0_i32 = arith.constant 0 : i32
    %c0_i32_0 = arith.constant 0 : i32
    %c0_i32_1 = arith.constant 0 : i32
    return %arg0, %c0_i32, %c0_i32_0 : i32, i32, i32
  }
  func.func @transform_5(%arg0: i32) -> (i32, i32, i32) {
    %c0_i32 = arith.constant 0 : i32
    %c0_i32_0 = arith.constant 0 : i32
    %c0_i32_1 = arith.constant 0 : i32
    return %arg0, %c0_i32, %c0_i32_0 : i32, i32, i32
  }
}

</mosaic_0001>

<bundles_post_ra>
// kernel: resnet_below50_block.5
= control target key start
LH: loop header
LB: loop body
LE: loop exit
PB: predicated region body
PF: predicated region fallthrough
CT: control target
= control target key end

     0   :  { %vm536_vm0 = vcmask 31744   ;;  %s1531_s0 = inlined_call_operand.vmem [shape: bf16[512,128], index: 0, kind: input, shape index: {}]   ;;  %s1532_s1 = inlined_call_operand.vmem [shape: bf16[512,4], index: 1, kind: input, shape index: {}]   ;;  %s1533_s2 = inlined_call_operand.vmem [shape: f32[2,128], index: 2, kind: input, shape index: {}]   ;;  %s1534_s3 = inlined_call_operand.vmem [shape: f32[512,4], index: 3, kind: output, shape index: {}]  }
   0x1   :  { %v608_v0 = vld [vmem:[%s1531_s0] sm:$0xff]   ;;  %v863_v5 = vld [vmem:[%s1531_s0 + $0x8] sm:$0xff]   ;;  %v864_v12 = vld [vmem:[%s1531_s0 + $0x10] sm:$0xff]  }
   0x2   :  { %v951_v1 = vld [vmem:[%s1533_s2] ss:$0 sm:$0xff]  ;;  %v609_v2 = vunpack.c.l.bf16 %v608_v0  ;;  %v610_v4 = vunpack.c.h.bf16 %v608_v0  ;;  %v894_v6 = vld [vmem:[%s1532_s1 + $0x8] sm:$0xff]   ;;  %v965_v7 = vld [vmem:[%s1533_s2 + $0x1] ss:$0 sm:$0xff]  ;;  %v613_v10 = vunpack.c.l.bf16 %v863_v5  ;;  %v614_v16 = vunpack.c.h.bf16 %v863_v5 }
   0x3   :  { %v736_v3 = vld [vmem:[%s1532_s1] sm:$0xff]   ;;  %v741_v11 = vunpack.c.l.bf16 %v894_v6  ;;  %v895_v13 = vld [vmem:[%s1532_s1 + $0x10] sm:$0xff]   ;;  %v742_v17 = vunpack.c.h.bf16 %v894_v6  ;;  %v865_v18 = vld [vmem:[%s1531_s0 + $0x18] sm:$0xff]   ;;  %v617_v20 = vunpack.c.l.bf16 %v864_v12  ;;  %v618_v22 = vunpack.c.h.bf16 %v864_v12 }
   0x4   :  { %v737_v8 = vunpack.c.l.bf16 %v736_v3  ;;  %v738_v9 = vunpack.c.h.bf16 %v736_v3  ;;  %v147_v14 = vmul.f32 %v609_v2, %v951_v1  ;;  %v148_v15 = vmul.f32 %v610_v4, %v951_v1  ;;  %v896_v23 = vld [vmem:[%s1532_s1 + $0x18] sm:$0xff]   ;;  %v866_v40 = vld [vmem:[%s1531_s0 + $0x20] sm:$0xff]   ;;  %v867_v54 = vld [vmem:[%s1531_s0 + $0x28] sm:$0xff]  }
   0x5   :  { %v149_v19 = vmul.f32 %v613_v10, %v951_v1  ;;  %v745_v21 = vunpack.c.l.bf16 %v895_v13  ;;  %v150_v26 = vmul.f32 %v614_v16, %v951_v1  ;;  %v746_v27 = vunpack.c.h.bf16 %v895_v13  ;;  %v897_v45 = vld [vmem:[%s1532_s1 + $0x20] sm:$0xff]   ;;  %v898_v55 = vld [vmem:[%s1532_s1 + $0x28] sm:$0xff]   ;;  %v868_v0 = vld [vmem:[%s1531_s0 + $0x30] sm:$0xff]  }
   0x6   :  { %v216_v24 = vadd.f32 %v965_v7, %v147_v14  ;;  %v217_v25 = vadd.f32 %v965_v7, %v148_v15  ;;  %v151_v29 = vmul.f32 %v617_v20, %v951_v1  ;;  %v152_v30 = vmul.f32 %v618_v22, %v951_v1  ;;  %v899_v2 = vld [vmem:[%s1532_s1 + $0x30] sm:$0xff]   ;;  %v869_v16 = vld [vmem:[%s1531_s0 + $0x38] sm:$0xff]  }
   0x7   :  { %v218_v28 = vadd.f32 %v965_v7, %v149_v19  ;;  %v621_v31 = vunpack.c.l.bf16 %v865_v18  ;;  %v219_v34 = vadd.f32 %v965_v7, %v150_v26  ;;  %v749_v35 = vunpack.c.l.bf16 %v896_v23 }
   0x8   :  { %v408_v32 = vadd.f32 %v737_v8, %v216_v24  ;;  %v409_v33 = vadd.f32 %v738_v9, %v217_v25  ;;  %v220_v37 = vadd.f32 %v965_v7, %v151_v29  ;;  %v221_v38 = vadd.f32 %v965_v7, %v152_v30 }
   0x9   :  { %v410_v36 = vadd.f32 %v741_v11, %v218_v28  ;;  %v153_v39 = vmul.f32 %v621_v31, %v951_v1  ;;  %v411_v43 = vadd.f32 %v742_v17, %v219_v34  ;;  %v622_v44 = vunpack.c.h.bf16 %v865_v18  ;;  %v870_v34 = vld [vmem:[%s1531_s0 + $0x40] sm:$0xff]  }
   0xa   :  { %v472_v41 = vmax.f32 %v408_v32, 0.0  ;;  %v473_v42 = vmax.f32 %v409_v33, 0.0  ;;  %v412_v47 = vadd.f32 %v745_v21, %v220_v37  ;;  %v413_v48 = vadd.f32 %v746_v27, %v221_v38  ;;  %v900_v21 = vld [vmem:[%s1532_s1 + $0x38] sm:$0xff]  }
   0xb   :  { %v474_v46 = vmax.f32 %v410_v36, 0.0  ;;  %v222_v49 = vadd.f32 %v965_v7, %v153_v39  ;;  %v475_v50 = vmax.f32 %v411_v43, 0.0  ;;  %v154_v51 = vmul.f32 %v622_v44, %v951_v1  ;;  %v901_v39 = vld [vmem:[%s1532_s1 + $0x40] sm:$0xff]  }
   0xc   :  { %537 = vst.msk [vmem:[%s1534_s3] sm:$0xff] %vm536_vm0, %v472_v41  ;;  %538 = vst.msk [vmem:[%s1534_s3 + $0x8] sm:$0xff] %vm536_vm0, %v473_v42  ;;  %v750_v52 = vunpack.c.h.bf16 %v896_v23  ;;  %v625_v53 = vunpack.c.l.bf16 %v866_v40  ;;  %v476_v56 = vmax.f32 %v412_v47, 0.0  ;;  %v477_v57 = vmax.f32 %v413_v48, 0.0  ;;  %v871_v48 = vld [vmem:[%s1531_s0 + $0x48] sm:$0xff]  }
   0xd   :  { %539 = vst.msk [vmem:[%s1534_s3 + $0x10] sm:$0xff] %vm536_vm0, %v474_v46  ;;  %v414_v58 = vadd.f32 %v749_v35, %v222_v49  ;;  %v753_v59 = vunpack.c.l.bf16 %v897_v45  ;;  %540 = vst.msk [vmem:[%s1534_s3 + $0x18] sm:$0xff] %vm536_vm0, %v475_v50  ;;  %v223_v60 = vadd.f32 %v965_v7, %v154_v51  ;;  %v626_v62 = vunpack.c.h.bf16 %v866_v40  ;;  %v902_v49 = vld [vmem:[%s1532_s1 + $0x48] sm:$0xff]  }
   0xe   :  { %v155_v61 = vmul.f32 %v625_v53, %v951_v1  ;;  %v754_v63 = vunpack.c.h.bf16 %v897_v45  ;;  %541 = vst.msk [vmem:[%s1534_s3 + $0x20] sm:$0xff] %vm536_vm0, %v476_v56  ;;  %542 = vst.msk [vmem:[%s1534_s3 + $0x28] sm:$0xff] %vm536_vm0, %v477_v57  ;;  %v629_v4 = vunpack.c.l.bf16 %v867_v54  ;;  %v757_v5 = vunpack.c.l.bf16 %v898_v55 }
   0xf   :  { %v478_v3 = vmax.f32 %v414_v58, 0.0  ;;  %v630_v6 = vunpack.c.h.bf16 %v867_v54  ;;  %v415_v8 = vadd.f32 %v750_v52, %v223_v60  ;;  %v156_v10 = vmul.f32 %v626_v62, %v951_v1  ;;  %v872_v58 = vld [vmem:[%s1531_s0 + $0x50] sm:$0xff]  }
  0x10   :  { %v224_v9 = vadd.f32 %v965_v7, %v155_v61  ;;  %v758_v11 = vunpack.c.h.bf16 %v898_v55  ;;  %v157_v12 = vmul.f32 %v629_v4, %v951_v1  ;;  %v633_v14 = vunpack.c.l.bf16 %v868_v0 }
  0x11   :  { %543 = vst.msk [vmem:[%s1534_s3 + $0x30] sm:$0xff] %vm536_vm0, %v478_v3  ;;  %v158_v13 = vmul.f32 %v630_v6, %v951_v1  ;;  %v761_v15 = vunpack.c.l.bf16 %v899_v2  ;;  %v479_v17 = vmax.f32 %v415_v8, 0.0  ;;  %v225_v19 = vadd.f32 %v965_v7, %v156_v10  ;;  %v873_v10 = vld [vmem:[%s1531_s0 + $0x58] sm:$0xff]  }
  0x12   :  { %v416_v18 = vadd.f32 %v753_v59, %v224_v9  ;;  %v634_v20 = vunpack.c.h.bf16 %v868_v0  ;;  %v226_v22 = vadd.f32 %v965_v7, %v157_v12  ;;  %v159_v24 = vmul.f32 %v633_v14, %v951_v1 }
  0x13   :  { %v227_v23 = vadd.f32 %v965_v7, %v158_v13  ;;  %v762_v25 = vunpack.c.h.bf16 %v899_v2  ;;  %544 = vst.msk [vmem:[%s1534_s3 + $0x38] sm:$0xff] %vm536_vm0, %v479_v17  ;;  %v417_v27 = vadd.f32 %v754_v63, %v225_v19  ;;  %v637_v29 = vunpack.c.l.bf16 %v869_v16  ;;  %v903_v63 = vld [vmem:[%s1532_s1 + $0x50] sm:$0xff]   ;;  %v904_v19 = vld [vmem:[%s1532_s1 + $0x58] sm:$0xff]  }
  0x14   :  { %v480_v26 = vmax.f32 %v416_v18, 0.0  ;;  %v160_v28 = vmul.f32 %v634_v20, %v951_v1  ;;  %v418_v30 = vadd.f32 %v757_v5, %v226_v22  ;;  %v228_v32 = vadd.f32 %v965_v7, %v159_v24 }
  0x15   :  { %v419_v31 = vadd.f32 %v758_v11, %v227_v23  ;;  %v765_v33 = vunpack.c.l.bf16 %v900_v21  ;;  %v481_v35 = vmax.f32 %v417_v27, 0.0  ;;  %v161_v37 = vmul.f32 %v637_v29, %v951_v1 }
  0x16   :  { %545 = vst.msk [vmem:[%s1534_s3 + $0x40] sm:$0xff] %vm536_vm0, %v480_v26  ;;  %v229_v36 = vadd.f32 %v965_v7, %v160_v28  ;;  %v638_v38 = vunpack.c.h.bf16 %v869_v16  ;;  %v482_v40 = vmax.f32 %v418_v30, 0.0  ;;  %v420_v42 = vadd.f32 %v761_v15, %v228_v32  ;;  %v874_v28 = vld [vmem:[%s1531_s0 + $0x60] sm:$0xff]  }
  0x17   :  { %v483_v41 = vmax.f32 %v419_v31, 0.0  ;;  %v766_v43 = vunpack.c.h.bf16 %v900_v21  ;;  %546 = vst.msk [vmem:[%s1534_s3 + $0x48] sm:$0xff] %vm536_vm0, %v481_v35  ;;  %v230_v45 = vadd.f32 %v965_v7, %v161_v37  ;;  %v641_v47 = vunpack.c.l.bf16 %v870_v34 }
  0x18   :  { %v421_v44 = vadd.f32 %v762_v25, %v229_v36  ;;  %v162_v46 = vmul.f32 %v638_v38, %v951_v1  ;;  %547 = vst.msk [vmem:[%s1534_s3 + $0x50] sm:$0xff] %vm536_vm0, %v482_v40  ;;  %v484_v50 = vmax.f32 %v420_v42, 0.0  ;;  %v769_v51 = vunpack.c.l.bf16 %v901_v39  ;;  %v875_v42 = vld [vmem:[%s1531_s0 + $0x68] sm:$0xff]  }
  0x19   :  { %548 = vst.msk [vmem:[%s1534_s3 + $0x58] sm:$0xff] %vm536_vm0, %v483_v41  ;;  %v642_v52 = vunpack.c.h.bf16 %v870_v34  ;;  %v770_v53 = vunpack.c.h.bf16 %v901_v39  ;;  %v422_v55 = vadd.f32 %v765_v33, %v230_v45  ;;  %v163_v57 = vmul.f32 %v641_v47, %v951_v1  ;;  %v905_v33 = vld [vmem:[%s1532_s1 + $0x60] sm:$0xff]  }
  0x1a   :  { %v485_v54 = vmax.f32 %v421_v44, 0.0  ;;  %v231_v56 = vadd.f32 %v965_v7, %v162_v46  ;;  %549 = vst.msk [vmem:[%s1534_s3 + $0x60] sm:$0xff] %vm536_vm0, %v484_v50  ;;  %v645_v60 = vunpack.c.l.bf16 %v871_v48  ;;  %v773_v61 = vunpack.c.l.bf16 %v902_v49 }
  0x1b   :  { %v164_v59 = vmul.f32 %v642_v52, %v951_v1  ;;  %v646_v62 = vunpack.c.h.bf16 %v871_v48  ;;  %v486_v0 = vmax.f32 %v422_v55, 0.0  ;;  %v232_v3 = vadd.f32 %v965_v7, %v163_v57  ;;  %v876_v52 = vld [vmem:[%s1531_s0 + $0x70] sm:$0xff]  }
  0x1c   :  { %550 = vst.msk [vmem:[%s1534_s3 + $0x68] sm:$0xff] %vm536_vm0, %v485_v54  ;;  %v423_v2 = vadd.f32 %v766_v43, %v231_v56  ;;  %v774_v4 = vunpack.c.h.bf16 %v902_v49  ;;  %v165_v6 = vmul.f32 %v645_v60, %v951_v1  ;;  %v649_v9 = vunpack.c.l.bf16 %v872_v58  ;;  %v906_v43 = vld [vmem:[%s1532_s1 + $0x68] sm:$0xff]   ;;  %v907_v57 = vld [vmem:[%s1532_s1 + $0x70] sm:$0xff]  }
  0x1d   :  { %v233_v5 = vadd.f32 %v965_v7, %v164_v59  ;;  %v166_v8 = vmul.f32 %v646_v62, %v951_v1  ;;  %551 = vst.msk [vmem:[%s1534_s3 + $0x70] sm:$0xff] %vm536_vm0, %v486_v0  ;;  %v424_v12 = vadd.f32 %v769_v51, %v232_v3  ;;  %v777_v13 = vunpack.c.l.bf16 %v903_v63  ;;  %v877_v3 = vld [vmem:[%s1531_s0 + $0x78] sm:$0xff]  }
  0x1e   :  { %v487_v11 = vmax.f32 %v423_v2, 0.0  ;;  %v650_v14 = vunpack.c.h.bf16 %v872_v58  ;;  %v234_v16 = vadd.f32 %v965_v7, %v165_v6  ;;  %v167_v18 = vmul.f32 %v649_v9, %v951_v1 }
  0x1f   :  { %v425_v15 = vadd.f32 %v770_v53, %v233_v5  ;;  %v235_v17 = vadd.f32 %v965_v7, %v166_v8  ;;  %v488_v20 = vmax.f32 %v424_v12, 0.0  ;;  %v778_v22 = vunpack.c.h.bf16 %v903_v63 }
  0x20   :  { %552 = vst.msk [vmem:[%s1534_s3 + $0x78] sm:$0xff] %vm536_vm0, %v487_v11  ;;  %v168_v21 = vmul.f32 %v650_v14, %v951_v1  ;;  %v653_v23 = vunpack.c.l.bf16 %v873_v10  ;;  %v426_v25 = vadd.f32 %v773_v61, %v234_v16  ;;  %v236_v27 = vadd.f32 %v965_v7, %v167_v18 }
  0x21   :  { %v489_v24 = vmax.f32 %v425_v15, 0.0  ;;  %v427_v26 = vadd.f32 %v774_v4, %v235_v17  ;;  %553 = vst.msk [vmem:[%s1534_s3 + $0x80] sm:$0xff] %vm536_vm0, %v488_v20  ;;  %v781_v31 = vunpack.c.l.bf16 %v904_v19  ;;  %v654_v32 = vunpack.c.h.bf16 %v873_v10 }
  0x22   :  { %v237_v29 = vadd.f32 %v965_v7, %v168_v21  ;;  %v169_v30 = vmul.f32 %v653_v23, %v951_v1  ;;  %v490_v34 = vmax.f32 %v426_v25, 0.0  ;;  %v428_v36 = vadd.f32 %v777_v13, %v236_v27  ;;  %v908_v13 = vld [vmem:[%s1532_s1 + $0x78] sm:$0xff]   ;;  %v909_v27 = vld [vmem:[%s1532_s1 + $0x80] sm:$0xff]  }
  0x23   :  { %554 = vst.msk [vmem:[%s1534_s3 + $0x88] sm:$0xff] %vm536_vm0, %v489_v24  ;;  %v491_v35 = vmax.f32 %v427_v26, 0.0  ;;  %v782_v37 = vunpack.c.h.bf16 %v904_v19  ;;  %v170_v40 = vmul.f32 %v654_v32, %v951_v1  ;;  %v657_v41 = vunpack.c.l.bf16 %v874_v28 }
  0x24   :  { %v429_v38 = vadd.f32 %v778_v22, %v237_v29  ;;  %v238_v39 = vadd.f32 %v965_v7, %v169_v30  ;;  %555 = vst.msk [vmem:[%s1534_s3 + $0x90] sm:$0xff] %vm536_vm0, %v490_v34  ;;  %v492_v44 = vmax.f32 %v428_v36, 0.0  ;;  %v785_v45 = vunpack.c.l.bf16 %v905_v33  ;;  %v878_v22 = vld [vmem:[%s1531_s0 + $0x80] sm:$0xff]   ;;  %v879_v36 = vld [vmem:[%s1531_s0 + $0x88] sm:$0xff]  }
  0x25   :  { %556 = vst.msk [vmem:[%s1534_s3 + $0x98] sm:$0xff] %vm536_vm0, %v491_v35  ;;  %v658_v46 = vunpack.c.h.bf16 %v874_v28  ;;  %v786_v47 = vunpack.c.h.bf16 %v905_v33  ;;  %v239_v50 = vadd.f32 %v965_v7, %v170_v40  ;;  %v171_v51 = vmul.f32 %v657_v41, %v951_v1 }
  0x26   :  { %v493_v48 = vmax.f32 %v429_v38, 0.0  ;;  %v430_v49 = vadd.f32 %v781_v31, %v238_v39  ;;  %557 = vst.msk [vmem:[%s1534_s3 + $0xa0] sm:$0xff] %vm536_vm0, %v492_v44  ;;  %v661_v54 = vunpack.c.l.bf16 %v875_v42  ;;  %v789_v55 = vunpack.c.l.bf16 %v906_v43 }
  0x27   :  { %v172_v53 = vmul.f32 %v658_v46, %v951_v1  ;;  %v662_v56 = vunpack.c.h.bf16 %v875_v42  ;;  %v431_v59 = vadd.f32 %v782_v37, %v239_v50  ;;  %v240_v60 = vadd.f32 %v965_v7, %v171_v51  ;;  %v910_v37 = vld [vmem:[%s1532_s1 + $0x88] sm:$0xff]   ;;  %v880_v46 = vld [vmem:[%s1531_s0 + $0x90] sm:$0xff]  }
  0x28   :  { %558 = vst.msk [vmem:[%s1534_s3 + $0xa8] sm:$0xff] %vm536_vm0, %v493_v48  ;;  %v494_v58 = vmax.f32 %v430_v49, 0.0  ;;  %v790_v61 = vunpack.c.h.bf16 %v906_v43  ;;  %v173_v63 = vmul.f32 %v661_v54, %v951_v1  ;;  %v665_v2 = vunpack.c.l.bf16 %v876_v52  ;;  %v911_v51 = vld [vmem:[%s1532_s1 + $0x90] sm:$0xff]  }
  0x29   :  { %v241_v62 = vadd.f32 %v965_v7, %v172_v53  ;;  %v174_v0 = vmul.f32 %v662_v56, %v951_v1  ;;  %v495_v4 = vmax.f32 %v431_v59, 0.0  ;;  %v432_v5 = vadd.f32 %v785_v45, %v240_v60  ;;  %v881_v60 = vld [vmem:[%s1531_s0 + $0x98] sm:$0xff]  }
  0x2a   :  { %559 = vst.msk [vmem:[%s1534_s3 + $0xb0] sm:$0xff] %vm536_vm0, %v494_v58  ;;  %v793_v6 = vunpack.c.l.bf16 %v907_v57  ;;  %v666_v8 = vunpack.c.h.bf16 %v876_v52  ;;  %v242_v10 = vadd.f32 %v965_v7, %v173_v63  ;;  %v175_v12 = vmul.f32 %v665_v2, %v951_v1 }
  0x2b   :  { %v433_v9 = vadd.f32 %v786_v47, %v241_v62  ;;  %v243_v11 = vadd.f32 %v965_v7, %v174_v0  ;;  %560 = vst.msk [vmem:[%s1534_s3 + $0xb8] sm:$0xff] %vm536_vm0, %v495_v4  ;;  %v496_v14 = vmax.f32 %v432_v5, 0.0  ;;  %v794_v16 = vunpack.c.h.bf16 %v907_v57 }
  0x2c   :  { %v176_v15 = vmul.f32 %v666_v8, %v951_v1  ;;  %v669_v17 = vunpack.c.l.bf16 %v877_v3  ;;  %v434_v19 = vadd.f32 %v789_v55, %v242_v10  ;;  %v244_v21 = vadd.f32 %v965_v7, %v175_v12 }
  0x2d   :  { %v497_v18 = vmax.f32 %v433_v9, 0.0  ;;  %v435_v20 = vadd.f32 %v790_v61, %v243_v11  ;;  %561 = vst.msk [vmem:[%s1534_s3 + $0xc0] sm:$0xff] %vm536_vm0, %v496_v14  ;;  %v797_v25 = vunpack.c.l.bf16 %v908_v13  ;;  %v670_v26 = vunpack.c.h.bf16 %v877_v3 }
  0x2e   :  { %v245_v23 = vadd.f32 %v965_v7, %v176_v15  ;;  %v177_v24 = vmul.f32 %v669_v17, %v951_v1  ;;  %v498_v28 = vmax.f32 %v434_v19, 0.0  ;;  %v436_v30 = vadd.f32 %v793_v6, %v244_v21  ;;  %v912_v6 = vld [vmem:[%s1532_s1 + $0x98] sm:$0xff]   ;;  %v913_v21 = vld [vmem:[%s1532_s1 + $0xa0] sm:$0xff]  }
  0x2f   :  { %562 = vst.msk [vmem:[%s1534_s3 + $0xc8] sm:$0xff] %vm536_vm0, %v497_v18  ;;  %v499_v29 = vmax.f32 %v435_v20, 0.0  ;;  %v798_v31 = vunpack.c.h.bf16 %v908_v13  ;;  %v178_v34 = vmul.f32 %v670_v26, %v951_v1  ;;  %v673_v35 = vunpack.c.l.bf16 %v878_v22 }
  0x30   :  { %v437_v32 = vadd.f32 %v794_v16, %v245_v23  ;;  %v246_v33 = vadd.f32 %v965_v7, %v177_v24  ;;  %563 = vst.msk [vmem:[%s1534_s3 + $0xd0] sm:$0xff] %vm536_vm0, %v498_v28  ;;  %v500_v38 = vmax.f32 %v436_v30, 0.0  ;;  %v801_v39 = vunpack.c.l.bf16 %v909_v27  ;;  %v882_v16 = vld [vmem:[%s1531_s0 + $0xa0] sm:$0xff]   ;;  %v883_v30 = vld [vmem:[%s1531_s0 + $0xa8] sm:$0xff]  }
  0x31   :  { %564 = vst.msk [vmem:[%s1534_s3 + $0xd8] sm:$0xff] %vm536_vm0, %v499_v29  ;;  %v674_v40 = vunpack.c.h.bf16 %v878_v22  ;;  %v802_v41 = vunpack.c.h.bf16 %v909_v27  ;;  %v247_v44 = vadd.f32 %v965_v7, %v178_v34  ;;  %v179_v45 = vmul.f32 %v673_v35, %v951_v1 }
  0x32   :  { %v501_v42 = vmax.f32 %v437_v32, 0.0  ;;  %v438_v43 = vadd.f32 %v797_v25, %v246_v33  ;;  %565 = vst.msk [vmem:[%s1534_s3 + $0xe0] sm:$0xff] %vm536_vm0, %v500_v38  ;;  %v677_v48 = vunpack.c.l.bf16 %v879_v36  ;;  %v805_v49 = vunpack.c.l.bf16 %v910_v37 }
  0x33   :  { %v180_v47 = vmul.f32 %v674_v40, %v951_v1  ;;  %v678_v50 = vunpack.c.h.bf16 %v879_v36  ;;  %v439_v53 = vadd.f32 %v798_v31, %v247_v44  ;;  %v248_v54 = vadd.f32 %v965_v7, %v179_v45  ;;  %v914_v31 = vld [vmem:[%s1532_s1 + $0xa8] sm:$0xff]   ;;  %v884_v40 = vld [vmem:[%s1531_s0 + $0xb0] sm:$0xff]  }
  0x34   :  { %566 = vst.msk [vmem:[%s1534_s3 + $0xe8] sm:$0xff] %vm536_vm0, %v501_v42  ;;  %v502_v52 = vmax.f32 %v438_v43, 0.0  ;;  %v806_v55 = vunpack.c.h.bf16 %v910_v37  ;;  %v181_v57 = vmul.f32 %v677_v48, %v951_v1  ;;  %v681_v59 = vunpack.c.l.bf16 %v880_v46  ;;  %v915_v45 = vld [vmem:[%s1532_s1 + $0xb0] sm:$0xff]  }
  0x35   :  { %v249_v56 = vadd.f32 %v965_v7, %v180_v47  ;;  %v182_v58 = vmul.f32 %v678_v50, %v951_v1  ;;  %v503_v61 = vmax.f32 %v439_v53, 0.0  ;;  %v440_v62 = vadd.f32 %v801_v39, %v248_v54  ;;  %v885_v54 = vld [vmem:[%s1531_s0 + $0xb8] sm:$0xff]  }
  0x36   :  { %567 = vst.msk [vmem:[%s1534_s3 + $0xf0] sm:$0xff] %vm536_vm0, %v502_v52  ;;  %v809_v63 = vunpack.c.l.bf16 %v911_v51  ;;  %v682_v0 = vunpack.c.h.bf16 %v880_v46  ;;  %v250_v3 = vadd.f32 %v965_v7, %v181_v57  ;;  %v183_v5 = vmul.f32 %v681_v59, %v951_v1 }
  0x37   :  { %v441_v2 = vadd.f32 %v802_v41, %v249_v56  ;;  %v251_v4 = vadd.f32 %v965_v7, %v182_v58  ;;  %568 = vst.msk [vmem:[%s1534_s3 + $0xf8] sm:$0xff] %vm536_vm0, %v503_v61  ;;  %v504_v8 = vmax.f32 %v440_v62, 0.0  ;;  %v810_v10 = vunpack.c.h.bf16 %v911_v51 }
  0x38   :  { %v184_v9 = vmul.f32 %v682_v0, %v951_v1  ;;  %v685_v11 = vunpack.c.l.bf16 %v881_v60  ;;  %v442_v13 = vadd.f32 %v805_v49, %v250_v3  ;;  %v252_v15 = vadd.f32 %v965_v7, %v183_v5 }
  0x39   :  { %v505_v12 = vmax.f32 %v441_v2, 0.0  ;;  %v443_v14 = vadd.f32 %v806_v55, %v251_v4  ;;  %569 = vst.msk [vmem:[%s1534_s3 + $0x100] sm:$0xff] %vm536_vm0, %v504_v8  ;;  %v813_v19 = vunpack.c.l.bf16 %v912_v6  ;;  %v686_v20 = vunpack.c.h.bf16 %v881_v60 }
  0x3a   :  { %v253_v17 = vadd.f32 %v965_v7, %v184_v9  ;;  %v185_v18 = vmul.f32 %v685_v11, %v951_v1  ;;  %v506_v22 = vmax.f32 %v442_v13, 0.0  ;;  %v444_v24 = vadd.f32 %v809_v63, %v252_v15  ;;  %v916_v63 = vld [vmem:[%s1532_s1 + $0xb8] sm:$0xff]   ;;  %v917_v15 = vld [vmem:[%s1532_s1 + $0xc0] sm:$0xff]  }
  0x3b   :  { %570 = vst.msk [vmem:[%s1534_s3 + $0x108] sm:$0xff] %vm536_vm0, %v505_v12  ;;  %v507_v23 = vmax.f32 %v443_v14, 0.0  ;;  %v814_v25 = vunpack.c.h.bf16 %v912_v6  ;;  %v186_v28 = vmul.f32 %v686_v20, %v951_v1  ;;  %v689_v29 = vunpack.c.l.bf16 %v882_v16 }
  0x3c   :  { %v445_v26 = vadd.f32 %v810_v10, %v253_v17  ;;  %v254_v27 = vadd.f32 %v965_v7, %v185_v18  ;;  %571 = vst.msk [vmem:[%s1534_s3 + $0x110] sm:$0xff] %vm536_vm0, %v506_v22  ;;  %v508_v32 = vmax.f32 %v444_v24, 0.0  ;;  %v817_v33 = vunpack.c.l.bf16 %v913_v21  ;;  %v886_v10 = vld [vmem:[%s1531_s0 + $0xc0] sm:$0xff]   ;;  %v887_v24 = vld [vmem:[%s1531_s0 + $0xc8] sm:$0xff]  }
  0x3d   :  { %572 = vst.msk [vmem:[%s1534_s3 + $0x118] sm:$0xff] %vm536_vm0, %v507_v23  ;;  %v690_v34 = vunpack.c.h.bf16 %v882_v16  ;;  %v818_v35 = vunpack.c.h.bf16 %v913_v21  ;;  %v255_v38 = vadd.f32 %v965_v7, %v186_v28  ;;  %v187_v39 = vmul.f32 %v689_v29, %v951_v1 }
  0x3e   :  { %v509_v36 = vmax.f32 %v445_v26, 0.0  ;;  %v446_v37 = vadd.f32 %v813_v19, %v254_v27  ;;  %573 = vst.msk [vmem:[%s1534_s3 + $0x120] sm:$0xff] %vm536_vm0, %v508_v32  ;;  %v693_v42 = vunpack.c.l.bf16 %v883_v30  ;;  %v821_v43 = vunpack.c.l.bf16 %v914_v31 }
  0x3f   :  { %v188_v41 = vmul.f32 %v690_v34, %v951_v1  ;;  %v694_v44 = vunpack.c.h.bf16 %v883_v30  ;;  %v447_v47 = vadd.f32 %v814_v25, %v255_v38  ;;  %v256_v48 = vadd.f32 %v965_v7, %v187_v39  ;;  %v918_v25 = vld [vmem:[%s1532_s1 + $0xc8] sm:$0xff]   ;;  %v888_v34 = vld [vmem:[%s1531_s0 + $0xd0] sm:$0xff]  }
  0x40   :  { %574 = vst.msk [vmem:[%s1534_s3 + $0x128] sm:$0xff] %vm536_vm0, %v509_v36  ;;  %v510_v46 = vmax.f32 %v446_v37, 0.0  ;;  %v822_v49 = vunpack.c.h.bf16 %v914_v31  ;;  %v189_v51 = vmul.f32 %v693_v42, %v951_v1  ;;  %v697_v53 = vunpack.c.l.bf16 %v884_v40  ;;  %v919_v39 = vld [vmem:[%s1532_s1 + $0xd0] sm:$0xff]  }
  0x41   :  { %v257_v50 = vadd.f32 %v965_v7, %v188_v41  ;;  %v190_v52 = vmul.f32 %v694_v44, %v951_v1  ;;  %v511_v55 = vmax.f32 %v447_v47, 0.0  ;;  %v448_v56 = vadd.f32 %v817_v33, %v256_v48  ;;  %v889_v48 = vld [vmem:[%s1531_s0 + $0xd8] sm:$0xff]  }
  0x42   :  { %575 = vst.msk [vmem:[%s1534_s3 + $0x130] sm:$0xff] %vm536_vm0, %v510_v46  ;;  %v825_v57 = vunpack.c.l.bf16 %v915_v45  ;;  %v698_v58 = vunpack.c.h.bf16 %v884_v40  ;;  %v258_v60 = vadd.f32 %v965_v7, %v189_v51  ;;  %v191_v62 = vmul.f32 %v697_v53, %v951_v1 }
  0x43   :  { %v449_v59 = vadd.f32 %v818_v35, %v257_v50  ;;  %v259_v61 = vadd.f32 %v965_v7, %v190_v52  ;;  %576 = vst.msk [vmem:[%s1534_s3 + $0x138] sm:$0xff] %vm536_vm0, %v511_v55  ;;  %v512_v0 = vmax.f32 %v448_v56, 0.0  ;;  %v826_v3 = vunpack.c.h.bf16 %v915_v45 }
  0x44   :  { %v192_v2 = vmul.f32 %v698_v58, %v951_v1  ;;  %v701_v4 = vunpack.c.l.bf16 %v885_v54  ;;  %v450_v6 = vadd.f32 %v821_v43, %v258_v60  ;;  %v260_v9 = vadd.f32 %v965_v7, %v191_v62 }
  0x45   :  { %v513_v5 = vmax.f32 %v449_v59, 0.0  ;;  %v451_v8 = vadd.f32 %v822_v49, %v259_v61  ;;  %577 = vst.msk [vmem:[%s1534_s3 + $0x140] sm:$0xff] %vm536_vm0, %v512_v0  ;;  %v829_v13 = vunpack.c.l.bf16 %v916_v63  ;;  %v702_v14 = vunpack.c.h.bf16 %v885_v54 }
  0x46   :  { %v261_v11 = vadd.f32 %v965_v7, %v192_v2  ;;  %v193_v12 = vmul.f32 %v701_v4, %v951_v1  ;;  %v514_v16 = vmax.f32 %v450_v6, 0.0  ;;  %v452_v18 = vadd.f32 %v825_v57, %v260_v9  ;;  %v920_v57 = vld [vmem:[%s1532_s1 + $0xd8] sm:$0xff]   ;;  %v921_v9 = vld [vmem:[%s1532_s1 + $0xe0] sm:$0xff]  }
  0x47   :  { %578 = vst.msk [vmem:[%s1534_s3 + $0x148] sm:$0xff] %vm536_vm0, %v513_v5  ;;  %v515_v17 = vmax.f32 %v451_v8, 0.0  ;;  %v830_v19 = vunpack.c.h.bf16 %v916_v63  ;;  %v194_v22 = vmul.f32 %v702_v14, %v951_v1  ;;  %v705_v23 = vunpack.c.l.bf16 %v886_v10 }
  0x48   :  { %v453_v20 = vadd.f32 %v826_v3, %v261_v11  ;;  %v262_v21 = vadd.f32 %v965_v7, %v193_v12  ;;  %579 = vst.msk [vmem:[%s1534_s3 + $0x150] sm:$0xff] %vm536_vm0, %v514_v16  ;;  %v516_v26 = vmax.f32 %v452_v18, 0.0  ;;  %v833_v27 = vunpack.c.l.bf16 %v917_v15  ;;  %v890_v3 = vld [vmem:[%s1531_s0 + $0xe0] sm:$0xff]   ;;  %v891_v18 = vld [vmem:[%s1531_s0 + $0xe8] sm:$0xff]  }
  0x49   :  { %580 = vst.msk [vmem:[%s1534_s3 + $0x158] sm:$0xff] %vm536_vm0, %v515_v17  ;;  %v706_v28 = vunpack.c.h.bf16 %v886_v10  ;;  %v834_v29 = vunpack.c.h.bf16 %v917_v15  ;;  %v263_v32 = vadd.f32 %v965_v7, %v194_v22  ;;  %v195_v33 = vmul.f32 %v705_v23, %v951_v1 }
  0x4a   :  { %v517_v30 = vmax.f32 %v453_v20, 0.0  ;;  %v454_v31 = vadd.f32 %v829_v13, %v262_v21  ;;  %581 = vst.msk [vmem:[%s1534_s3 + $0x160] sm:$0xff] %vm536_vm0, %v516_v26  ;;  %v709_v36 = vunpack.c.l.bf16 %v887_v24  ;;  %v837_v37 = vunpack.c.l.bf16 %v918_v25 }
  0x4b   :  { %v196_v35 = vmul.f32 %v706_v28, %v951_v1  ;;  %v710_v38 = vunpack.c.h.bf16 %v887_v24  ;;  %v455_v41 = vadd.f32 %v830_v19, %v263_v32  ;;  %v264_v42 = vadd.f32 %v965_v7, %v195_v33  ;;  %v922_v19 = vld [vmem:[%s1532_s1 + $0xe8] sm:$0xff]   ;;  %v892_v28 = vld [vmem:[%s1531_s0 + $0xf0] sm:$0xff]  }
  0x4c   :  { %582 = vst.msk [vmem:[%s1534_s3 + $0x168] sm:$0xff] %vm536_vm0, %v517_v30  ;;  %v518_v40 = vmax.f32 %v454_v31, 0.0  ;;  %v838_v43 = vunpack.c.h.bf16 %v918_v25  ;;  %v197_v45 = vmul.f32 %v709_v36, %v951_v1  ;;  %v713_v47 = vunpack.c.l.bf16 %v888_v34  ;;  %v923_v33 = vld [vmem:[%s1532_s1 + $0xf0] sm:$0xff]  }
  0x4d   :  { %v265_v44 = vadd.f32 %v965_v7, %v196_v35  ;;  %v198_v46 = vmul.f32 %v710_v38, %v951_v1  ;;  %v519_v49 = vmax.f32 %v455_v41, 0.0  ;;  %v456_v50 = vadd.f32 %v833_v27, %v264_v42  ;;  %v893_v42 = vld [vmem:[%s1531_s0 + $0xf8] sm:$0xff]  }
  0x4e   :  { %583 = vst.msk [vmem:[%s1534_s3 + $0x170] sm:$0xff] %vm536_vm0, %v518_v40  ;;  %v841_v51 = vunpack.c.l.bf16 %v919_v39  ;;  %v714_v52 = vunpack.c.h.bf16 %v888_v34  ;;  %v266_v54 = vadd.f32 %v965_v7, %v197_v45  ;;  %v199_v56 = vmul.f32 %v713_v47, %v951_v1 }
  0x4f   :  { %v457_v53 = vadd.f32 %v834_v29, %v265_v44  ;;  %v267_v55 = vadd.f32 %v965_v7, %v198_v46  ;;  %584 = vst.msk [vmem:[%s1534_s3 + $0x178] sm:$0xff] %vm536_vm0, %v519_v49  ;;  %v520_v58 = vmax.f32 %v456_v50, 0.0  ;;  %v842_v60 = vunpack.c.h.bf16 %v919_v39 }
  0x50   :  { %v200_v59 = vmul.f32 %v714_v52, %v951_v1  ;;  %v717_v61 = vunpack.c.l.bf16 %v889_v48  ;;  %v458_v63 = vadd.f32 %v837_v37, %v266_v54  ;;  %v268_v2 = vadd.f32 %v965_v7, %v199_v56 }
  0x51   :  { %v521_v62 = vmax.f32 %v457_v53, 0.0  ;;  %v459_v0 = vadd.f32 %v838_v43, %v267_v55  ;;  %585 = vst.msk [vmem:[%s1534_s3 + $0x180] sm:$0xff] %vm536_vm0, %v520_v58  ;;  %v845_v6 = vunpack.c.l.bf16 %v920_v57  ;;  %v718_v8 = vunpack.c.h.bf16 %v889_v48 }
  0x52   :  { %v269_v4 = vadd.f32 %v965_v7, %v200_v59  ;;  %v201_v5 = vmul.f32 %v717_v61, %v951_v1  ;;  %v522_v10 = vmax.f32 %v458_v63, 0.0  ;;  %v460_v12 = vadd.f32 %v841_v51, %v268_v2  ;;  %v924_v51 = vld [vmem:[%s1532_s1 + $0xf8] sm:$0xff]  }
  0x53   :  { %586 = vst.msk [vmem:[%s1534_s3 + $0x188] sm:$0xff] %vm536_vm0, %v521_v62  ;;  %v523_v11 = vmax.f32 %v459_v0, 0.0  ;;  %v846_v13 = vunpack.c.h.bf16 %v920_v57  ;;  %v202_v16 = vmul.f32 %v718_v8, %v951_v1  ;;  %v721_v17 = vunpack.c.l.bf16 %v890_v3 }
  0x54   :  { %v461_v14 = vadd.f32 %v842_v60, %v269_v4  ;;  %v270_v15 = vadd.f32 %v965_v7, %v201_v5  ;;  %587 = vst.msk [vmem:[%s1534_s3 + $0x190] sm:$0xff] %vm536_vm0, %v522_v10  ;;  %v524_v20 = vmax.f32 %v460_v12, 0.0  ;;  %v849_v21 = vunpack.c.l.bf16 %v921_v9 }
  0x55   :  { %588 = vst.msk [vmem:[%s1534_s3 + $0x198] sm:$0xff] %vm536_vm0, %v523_v11  ;;  %v722_v22 = vunpack.c.h.bf16 %v890_v3  ;;  %v850_v23 = vunpack.c.h.bf16 %v921_v9  ;;  %v271_v26 = vadd.f32 %v965_v7, %v202_v16  ;;  %v203_v27 = vmul.f32 %v721_v17, %v951_v1 }
  0x56   :  { %v525_v24 = vmax.f32 %v461_v14, 0.0  ;;  %v462_v25 = vadd.f32 %v845_v6, %v270_v15  ;;  %589 = vst.msk [vmem:[%s1534_s3 + $0x1a0] sm:$0xff] %vm536_vm0, %v524_v20  ;;  %v725_v30 = vunpack.c.l.bf16 %v891_v18  ;;  %v853_v31 = vunpack.c.l.bf16 %v922_v19 }
  0x57   :  { %v204_v29 = vmul.f32 %v722_v22, %v951_v1  ;;  %v726_v32 = vunpack.c.h.bf16 %v891_v18  ;;  %v463_v35 = vadd.f32 %v846_v13, %v271_v26  ;;  %v272_v36 = vadd.f32 %v965_v7, %v203_v27 }
  0x58   :  { %590 = vst.msk [vmem:[%s1534_s3 + $0x1a8] sm:$0xff] %vm536_vm0, %v525_v24  ;;  %v526_v34 = vmax.f32 %v462_v25, 0.0  ;;  %v854_v37 = vunpack.c.h.bf16 %v922_v19  ;;  %v205_v39 = vmul.f32 %v725_v30, %v951_v1  ;;  %v729_v41 = vunpack.c.l.bf16 %v892_v28 }
  0x59   :  { %v273_v38 = vadd.f32 %v965_v7, %v204_v29  ;;  %v206_v40 = vmul.f32 %v726_v32, %v951_v1  ;;  %v527_v43 = vmax.f32 %v463_v35, 0.0  ;;  %v464_v44 = vadd.f32 %v849_v21, %v272_v36 }
  0x5a   :  { %591 = vst.msk [vmem:[%s1534_s3 + $0x1b0] sm:$0xff] %vm536_vm0, %v526_v34  ;;  %v857_v45 = vunpack.c.l.bf16 %v923_v33  ;;  %v730_v46 = vunpack.c.h.bf16 %v892_v28  ;;  %v274_v48 = vadd.f32 %v965_v7, %v205_v39  ;;  %v207_v50 = vmul.f32 %v729_v41, %v951_v1 }
  0x5b   :  { %v465_v47 = vadd.f32 %v850_v23, %v273_v38  ;;  %v275_v49 = vadd.f32 %v965_v7, %v206_v40  ;;  %592 = vst.msk [vmem:[%s1534_s3 + $0x1b8] sm:$0xff] %vm536_vm0, %v527_v43  ;;  %v528_v52 = vmax.f32 %v464_v44, 0.0  ;;  %v858_v54 = vunpack.c.h.bf16 %v923_v33 }
  0x5c   :  { %v208_v53 = vmul.f32 %v730_v46, %v951_v1  ;;  %v733_v55 = vunpack.c.l.bf16 %v893_v42  ;;  %v466_v57 = vadd.f32 %v853_v31, %v274_v48  ;;  %v276_v59 = vadd.f32 %v965_v7, %v207_v50 }
  0x5d   :  { %v529_v56 = vmax.f32 %v465_v47, 0.0  ;;  %v467_v58 = vadd.f32 %v854_v37, %v275_v49  ;;  %593 = vst.msk [vmem:[%s1534_s3 + $0x1c0] sm:$0xff] %vm536_vm0, %v528_v52  ;;  %v861_v62 = vunpack.c.l.bf16 %v924_v51  ;;  %v734_v63 = vunpack.c.h.bf16 %v893_v42 }
  0x5e   :  { %v277_v60 = vadd.f32 %v965_v7, %v208_v53  ;;  %v209_v61 = vmul.f32 %v733_v55, %v951_v1  ;;  %v530_v0 = vmax.f32 %v466_v57, 0.0  ;;  %v468_v3 = vadd.f32 %v857_v45, %v276_v59 }
  0x5f   :  { %594 = vst.msk [vmem:[%s1534_s3 + $0x1c8] sm:$0xff] %vm536_vm0, %v529_v56  ;;  %v531_v2 = vmax.f32 %v467_v58, 0.0  ;;  %v210_v6 = vmul.f32 %v734_v63, %v951_v1  ;;  %v862_v8 = vunpack.c.h.bf16 %v924_v51 }
  0x60   :  { %v469_v4 = vadd.f32 %v858_v54, %v277_v60  ;;  %v278_v5 = vadd.f32 %v965_v7, %v209_v61  ;;  %595 = vst.msk [vmem:[%s1534_s3 + $0x1d0] sm:$0xff] %vm536_vm0, %v530_v0  ;;  %v532_v9 = vmax.f32 %v468_v3, 0.0 }
  0x61   :  { %596 = vst.msk [vmem:[%s1534_s3 + $0x1d8] sm:$0xff] %vm536_vm0, %v531_v2  ;;  %v279_v12 = vadd.f32 %v965_v7, %v210_v6 }
  0x62   :  { %v533_v10 = vmax.f32 %v469_v4, 0.0  ;;  %v470_v11 = vadd.f32 %v861_v62, %v278_v5  ;;  %597 = vst.msk [vmem:[%s1534_s3 + $0x1e0] sm:$0xff] %vm536_vm0, %v532_v9 }
  0x63   :  { %v471_v13 = vadd.f32 %v862_v8, %v279_v12 }
  0x64   :  { %598 = vst.msk [vmem:[%s1534_s3 + $0x1e8] sm:$0xff] %vm536_vm0, %v533_v10  ;;  %v534_v1 = vmax.f32 %v470_v11, 0.0 }
  0x65   :  { %v535_v14 = vmax.f32 %v471_v13, 0.0 }
  0x66   :  { %599 = vst.msk [vmem:[%s1534_s3 + $0x1f0] sm:$0xff] %vm536_vm0, %v534_v1 }
  0x67   :  { %600 = vst.msk [vmem:[%s1534_s3 + $0x1f8] sm:$0xff] %vm536_vm0, %v535_v14 }

// kernel: resnet_below50_block.4
= control target key start
LH: loop header
LB: loop body
LE: loop exit
PB: predicated region body
PF: predicated region fallthrough
CT: control target
= control target key end

     0   :  { %s2517_s2 = inlined_call_operand.vmem [shape: bf16[128,128], index: 2, kind: input, shape index: {}]   ;;  %s2518_s0 = inlined_call_operand.vmem [shape: bf16[512,128], index: 0, kind: input, shape index: {}]   ;;  %s2519_s1 = inlined_call_operand.vmem [shape: f32[2,128], index: 1, kind: input, shape index: {}]   ;;  %s2520_s3 = inlined_call_operand.vmem [shape: bf16[512,128], index: 3, kind: output, shape index: {0}]   ;;  %s2521_s4 = inlined_call_operand.vmem [shape: f32[1,1,128], index: 4, kind: output, shape index: {1}]   ;;  %s2522_s5 = inlined_call_operand.vmem [shape: f32[1,1,128], index: 5, kind: output, shape index: {2}]  }
   0x1   :  { %v1893_v0 = vld [vmem:[%s2517_s2] sm:$0xff]   ;;  %v1894_v1 = vld [vmem:[%s2517_s2 + $0x8] sm:$0xff]   ;;  %v1895_v2 = vld [vmem:[%s2517_s2 + $0x10] sm:$0xff]  }
   0x2   :  { %1797 = vmatprep.subr.bf16.mxu0 %v1893_v0  ;;  %1877 = vmatprep.subr.bf16.mxu1 %v1893_v0  ;;  %v1896_v3 = vld [vmem:[%s2517_s2 + $0x18] sm:$0xff]   ;;  %v1408_v4 = vld [vmem:[%s2518_s0] sm:$0xff]   ;;  %v1695_v8 = vld [vmem:[%s2518_s0 + $0x8] sm:$0xff]  }
   0x3   :  { %1798 = vmatpush3.bf16.msra.mxu0 %v1893_v0  ;;  %1885 = vmatpush3.bf16.msra.mxu1 %v1893_v0  ;;  %v1949_v5 = vld [vmem:[%s2519_s1] ss:$0 sm:$0xff]  ;;  %v1409_v6 = vunpack.c.l.bf16 %v1408_v4  ;;  %v1410_v7 = vunpack.c.h.bf16 %v1408_v4  ;;  %v1696_v9 = vld [vmem:[%s2518_s0 + $0x10] sm:$0xff]   ;;  %v1960_v10 = vld [vmem:[%s2519_s1 + $0x1] ss:$0 sm:$0xff]  ;;  %v1413_v14 = vunpack.c.l.bf16 %v1695_v8  ;;  %v1414_v15 = vunpack.c.h.bf16 %v1695_v8 }
   0x4   :  { %1799 = vmatprep.subr.bf16.mxu0 %v1894_v1  ;;  %1878 = vmatprep.subr.bf16.mxu1 %v1894_v1  ;;  %v1897_v13 = vld [vmem:[%s2517_s2 + $0x20] sm:$0xff]   ;;  %v1417_v16 = vunpack.c.l.bf16 %v1696_v9  ;;  %v1418_v19 = vunpack.c.h.bf16 %v1696_v9  ;;  %v1898_v22 = vld [vmem:[%s2517_s2 + $0x28] sm:$0xff]   ;;  %v1697_v26 = vld [vmem:[%s2518_s0 + $0x18] sm:$0xff]  }
   0x5   :  { %v151_v11 = vmul.f32 %v1409_v6, %v1949_v5  ;;  %v152_v12 = vmul.f32 %v1410_v7, %v1949_v5  ;;  %v153_v23 = vmul.f32 %v1413_v14, %v1949_v5  ;;  %v154_v24 = vmul.f32 %v1414_v15, %v1949_v5  ;;  %v1698_v29 = vld [vmem:[%s2518_s0 + $0x20] sm:$0xff]   ;;  %v1899_v31 = vld [vmem:[%s2517_s2 + $0x30] sm:$0xff]   ;;  %v1699_v38 = vld [vmem:[%s2518_s0 + $0x28] sm:$0xff]  }
   0x6   :  { %v155_v25 = vmul.f32 %v1417_v16, %v1949_v5  ;;  %v156_v28 = vmul.f32 %v1418_v19, %v1949_v5  ;;  %v1421_v30 = vunpack.c.l.bf16 %v1697_v26  ;;  %v1422_v35 = vunpack.c.h.bf16 %v1697_v26  ;;  %v1700_v41 = vld [vmem:[%s2518_s0 + $0x30] sm:$0xff]   ;;  %v1701_v42 = vld [vmem:[%s2518_s0 + $0x38] sm:$0xff]   ;;  %v1702_v48 = vld [vmem:[%s2518_s0 + $0x40] sm:$0xff]  }
   0x7   :  { %1800 = vmatpush3.bf16.msra.mxu0 %v1894_v1  ;;  %1886 = vmatpush3.bf16.msra.mxu1 %v1894_v1  ;;  %v220_v17 = vadd.f32 %v1960_v10, %v151_v11  ;;  %v221_v18 = vadd.f32 %v1960_v10, %v152_v12  ;;  %v222_v32 = vadd.f32 %v1960_v10, %v153_v23  ;;  %v1425_v37 = vunpack.c.l.bf16 %v1698_v29  ;;  %v1900_v43 = vld [vmem:[%s2517_s2 + $0x38] sm:$0xff]   ;;  %v1703_v63 = vld [vmem:[%s2518_s0 + $0x48] sm:$0xff]   ;;  %v1704_v4 = vld [vmem:[%s2518_s0 + $0x50] sm:$0xff]  }
   0x8   :  { %1801 = vmatprep.subr.bf16.mxu0 %v1895_v2  ;;  %1879 = vmatprep.subr.bf16.mxu1 %v1895_v2  ;;  %v223_v33 = vadd.f32 %v1960_v10, %v154_v24  ;;  %v224_v34 = vadd.f32 %v1960_v10, %v155_v25  ;;  %v225_v36 = vadd.f32 %v1960_v10, %v156_v28  ;;  %v1426_v40 = vunpack.c.h.bf16 %v1698_v29  ;;  %v1705_v23 = vld [vmem:[%s2518_s0 + $0x58] sm:$0xff]  }
   0x9   :  { %v284_v20 = vmax.f32 %v220_v17, 0.0  ;;  %v285_v21 = vmax.f32 %v221_v18, 0.0  ;;  %v157_v39 = vmul.f32 %v1421_v30, %v1949_v5  ;;  %v286_v44 = vmax.f32 %v222_v32, 0.0 }
   0xa   :  { %v287_v45 = vmax.f32 %v223_v33, 0.0  ;;  %v288_v46 = vmax.f32 %v224_v34, 0.0  ;;  %v158_v47 = vmul.f32 %v1422_v35, %v1949_v5  ;;  %v289_v49 = vmax.f32 %v225_v36, 0.0 }
   0xb   :  { %1802 = vmatpush3.bf16.msra.mxu0 %v1895_v2  ;;  %1887 = vmatpush3.bf16.msra.mxu1 %v1895_v2  ;;  %v348_v27 = vpack.c.bf16 %v285_v21, %v284_v20  ;;  %v159_v50 = vmul.f32 %v1425_v37, %v1949_v5  ;;  %v1429_v51 = vunpack.c.l.bf16 %v1699_v38  ;;  %v1430_v52 = vunpack.c.h.bf16 %v1699_v38 }
   0xc   :  { %1803 = vmatprep.subr.bf16.mxu0 %v1896_v3  ;;  %1880 = vmatprep.subr.bf16.mxu1 %v1896_v3  ;;  %v1433_v53 = vunpack.c.l.bf16 %v1700_v41  ;;  %v1434_v54 = vunpack.c.h.bf16 %v1700_v41  ;;  %v1437_v55 = vunpack.c.l.bf16 %v1701_v42  ;;  %v1438_v56 = vunpack.c.h.bf16 %v1701_v42 }
   0xd   :  { %1813 = vmatprep.mubr.bf16.mxu0 %v348_v27  ;;  %v160_v57 = vmul.f32 %v1426_v40, %v1949_v5  ;;  %v1441_v58 = vunpack.c.l.bf16 %v1702_v48  ;;  %v1442_v59 = vunpack.c.h.bf16 %v1702_v48  ;;  %v349_v60 = vpack.c.bf16 %v287_v45, %v286_v44  ;;  %v1710_v44 = vld [vmem:[%s2518_s0 + $0x80] sm:$0xff]  }
   0xe   :  { %v226_v61 = vadd.f32 %v1960_v10, %v157_v39  ;;  %v227_v62 = vadd.f32 %v1960_v10, %v158_v47  ;;  %v350_v0 = vpack.c.bf16 %v289_v49, %v288_v46  ;;  %v228_v1 = vadd.f32 %v1960_v10, %v159_v50 }
   0xf   :  { %1804 = vmatpush3.bf16.msra.mxu0 %v1896_v3  ;;  %1888 = vmatpush3.bf16.msra.mxu1 %v1896_v3  ;;  %v161_v2 = vmul.f32 %v1429_v51, %v1949_v5  ;;  %v162_v3 = vmul.f32 %v1430_v52, %v1949_v5  ;;  %v163_v6 = vmul.f32 %v1433_v53, %v1949_v5  ;;  %v1445_v14 = vunpack.c.l.bf16 %v1703_v63  ;;  %v2053_v52 = vld [vmem:[%s2518_s0 + $0x60] sm:$0xff]  }
  0x10   :  { %1805 = vmatprep.subr.bf16.mxu0 %v1897_v13  ;;  %1881 = vmatprep.subr.bf16.mxu1 %v1897_v13  ;;  %v164_v7 = vmul.f32 %v1434_v54, %v1949_v5  ;;  %v165_v8 = vmul.f32 %v1437_v55, %v1949_v5  ;;  %v166_v9 = vmul.f32 %v1438_v56, %v1949_v5  ;;  %v290_v15 = vmax.f32 %v226_v61, 0.0 }
  0x11   :  { %v229_v11 = vadd.f32 %v1960_v10, %v160_v57  ;;  %v167_v12 = vmul.f32 %v1441_v58, %v1949_v5  ;;  %v291_v16 = vmax.f32 %v227_v62, 0.0  ;;  %v1446_v17 = vunpack.c.h.bf16 %v1703_v63 }
  0x12   :  { %v1449_v18 = vunpack.c.l.bf16 %v1704_v4  ;;  %v292_v19 = vmax.f32 %v228_v1, 0.0  ;;  %v230_v20 = vadd.f32 %v1960_v10, %v161_v2  ;;  %v231_v21 = vadd.f32 %v1960_v10, %v162_v3 }
  0x13   :  { %1806 = vmatpush3.bf16.msra.mxu0 %v1897_v13  ;;  %1889 = vmatpush3.bf16.msra.mxu1 %v1897_v13  ;;  %v168_v13 = vmul.f32 %v1442_v59, %v1949_v5  ;;  %v232_v24 = vadd.f32 %v1960_v10, %v163_v6  ;;  %v233_v25 = vadd.f32 %v1960_v10, %v164_v7  ;;  %v293_v28 = vmax.f32 %v229_v11, 0.0  ;;  %v1711_v59 = vld [vmem:[%s2518_s0 + $0x88] sm:$0xff]   ;;  %v1713_v11 = vld [vmem:[%s2518_s0 + $0x98] sm:$0xff]  }
  0x14   :  { %1807 = vmatprep.subr.bf16.mxu0 %v1898_v22  ;;  %1882 = vmatprep.subr.bf16.mxu1 %v1898_v22  ;;  %v234_v26 = vadd.f32 %v1960_v10, %v165_v8  ;;  %v235_v27 = vadd.f32 %v1960_v10, %v166_v9  ;;  %v236_v29 = vadd.f32 %v1960_v10, %v167_v12  ;;  %v1453_v35 = vunpack.c.l.bf16 %v1705_v23 }
  0x15   :  { %v237_v30 = vadd.f32 %v1960_v10, %v168_v13  ;;  %v351_v32 = vpack.c.bf16 %v291_v16, %v290_v15  ;;  %v170_v33 = vmul.f32 %v1446_v17, %v1949_v5  ;;  %v171_v34 = vmul.f32 %v1449_v18, %v1949_v5 }
  0x16   :  { %v294_v36 = vmax.f32 %v230_v20, 0.0  ;;  %v295_v37 = vmax.f32 %v231_v21, 0.0  ;;  %v1454_v39 = vunpack.c.h.bf16 %v1705_v23  ;;  %v296_v40 = vmax.f32 %v232_v24, 0.0  ;;  %v1714_v24 = vld [vmem:[%s2518_s0 + $0xa0] sm:$0xff]  }
  0x17   :  { %1808 = vmatpush3.bf16.msra.mxu0 %v1898_v22  ;;  %1890 = vmatpush3.bf16.msra.mxu1 %v1898_v22  ;;  %v1450_v22 = vunpack.c.h.bf16 %v1704_v4  ;;  %v297_v41 = vmax.f32 %v233_v25, 0.0  ;;  %v298_v42 = vmax.f32 %v234_v26, 0.0  ;;  %v352_v45 = vpack.c.bf16 %v293_v28, %v292_v19 }
  0x18   :  { %1809 = vmatprep.subr.bf16.mxu0 %v1899_v31  ;;  %1883 = vmatprep.subr.bf16.mxu1 %v1899_v31  ;;  %v300_v46 = vmax.f32 %v236_v29, 0.0  ;;  %v301_v47 = vmax.f32 %v237_v30, 0.0  ;;  %v239_v49 = vadd.f32 %v1960_v10, %v170_v33  ;;  %v2047_v50 = vadd.f32 %v1960_v10, %v171_v34  ;;  %v1715_v33 = vld [vmem:[%s2518_s0 + $0xa8] sm:$0xff]  }
  0x19   :  { %v172_v38 = vmul.f32 %v1450_v22, %v1949_v5  ;;  %v173_v51 = vmul.f32 %v1453_v35, %v1949_v5  ;;  %v174_v54 = vmul.f32 %v1454_v39, %v1949_v5  ;;  %v1473_v55 = vunpack.c.l.bf16 %v1710_v44 }
  0x1a   :  { %v353_v56 = vpack.c.bf16 %v295_v37, %v294_v36  ;;  %v354_v57 = vpack.c.bf16 %v297_v41, %v296_v40  ;;  %v1457_v62 = vunpack.c.l.bf16 %v2053_v52  ;;  %v1474_v63 = vunpack.c.h.bf16 %v1710_v44 }
  0x1b   :  { %1810 = vmatpush3.bf16.msra.mxu0 %v1899_v31  ;;  %1891 = vmatpush3.bf16.msra.mxu1 %v1899_v31  ;;  %v169_v31 = vmul.f32 %v1445_v14, %v1949_v5  ;;  %v2056_v53 = vadd.f32 %v1960_v10, %v172_v38  ;;  %v303_v1 = vmax.f32 %v239_v49, 0.0  ;;  %v304_v2 = vmax.f32 %v2047_v50, 0.0 }
  0x1c   :  { %1811 = vmatprep.subr.bf16.mxu0 %v1900_v43  ;;  %1884 = vmatprep.subr.bf16.mxu1 %v1900_v43  ;;  %v2072_v3 = vadd.f32 %v1960_v10, %v173_v51  ;;  %v183_v4 = vmul.f32 %v1473_v55, %v1949_v5  ;;  %v2077_v7 = vadd.f32 %v1960_v10, %v174_v54  ;;  %v1477_v9 = vunpack.c.l.bf16 %v1711_v59 }
  0x1d   :  { %v238_v48 = vadd.f32 %v1960_v10, %v169_v31  ;;  %v305_v6 = vmax.f32 %v2056_v53, 0.0  ;;  %v184_v8 = vmul.f32 %v1474_v63, %v1949_v5  ;;  %v1458_v12 = vunpack.c.h.bf16 %v2053_v52 }
  0x1e   :  { %v252_v13 = vadd.f32 %v1960_v10, %v183_v4  ;;  %v1478_v14 = vunpack.c.h.bf16 %v1711_v59  ;;  %v2086_v16 = vmul.f32 %v1457_v62, %v1949_v5  ;;  %v185_v18 = vmul.f32 %v1477_v9, %v1949_v5 }
  0x1f   :  { %1812 = vmatpush3.bf16.msra.mxu0 %v1900_v43  ;;  %1892 = vmatpush3.bf16.msra.mxu1 %v1900_v43  ;;  %v299_v43 = vmax.f32 %v235_v27, 0.0  ;;  %v302_v61 = vmax.f32 %v238_v48, 0.0  ;;  %v253_v17 = vadd.f32 %v1960_v10, %v184_v8  ;;  %v1485_v23 = vunpack.c.l.bf16 %v1713_v11 }
  0x20   :  { %v316_v20 = vmax.f32 %v252_v13, 0.0  ;;  %v186_v21 = vmul.f32 %v1478_v14, %v1949_v5  ;;  %v254_v27 = vadd.f32 %v1960_v10, %v185_v18  ;;  %v1486_v31 = vunpack.c.h.bf16 %v1713_v11  ;;  %v1718_v18 = vld [vmem:[%s2518_s0 + $0xc0] sm:$0xff]  }
  0x21   :  { %v2059_v58 = vpack.c.bf16 %v299_v43, %v298_v42  ;;  %v2095_v25 = vpack.c.bf16 %v303_v1, %v302_v61  ;;  %v317_v26 = vmax.f32 %v253_v17, 0.0  ;;  %v1489_v37 = vunpack.c.l.bf16 %v1714_v24  ;;  %v1717_v1 = vld [vmem:[%s2518_s0 + $0xb8] sm:$0xff]  }
  0x22   :  { %1814 = vmatmul.mubr.bf16.vlgmr.msra.gmra.mrb[0].mxu0 %v349_v60  ;;  %v2064_v60 = vpack.c.bf16 %v301_v47, %v300_v46  ;;  %v255_v29 = vadd.f32 %v1960_v10, %v186_v21  ;;  %v318_v35 = vmax.f32 %v254_v27, 0.0  ;;  %v190_v40 = vmul.f32 %v1486_v31, %v1949_v5  ;;  %v1716_v46 = vld [vmem:[%s2518_s0 + $0xb0] sm:$0xff]   ;;  %v1707_v47 = vld [vmem:[%s2518_s0 + $0x68] sm:$0xff]  }
  0x23   :  { %1817 = vmatprep.mubr.bf16.mxu0 %v350_v0  ;;  %v1712_v0 = vld [vmem:[%s2518_s0 + $0x90] sm:$0xff]   ;;  %v364_v34 = vpack.c.bf16 %v317_v26, %v316_v20  ;;  %v1490_v43 = vunpack.c.h.bf16 %v1714_v24  ;;  %v191_v44 = vmul.f32 %v1489_v37, %v1949_v5  ;;  %v1494_v54 = vunpack.c.h.bf16 %v1715_v33 }
  0x24   :  { %v1481_v15 = vunpack.c.l.bf16 %v1712_v0  ;;  %v1482_v19 = vunpack.c.h.bf16 %v1712_v0  ;;  %v319_v38 = vmax.f32 %v255_v29, 0.0  ;;  %v259_v49 = vadd.f32 %v1960_v10, %v190_v40  ;;  %v1720_v40 = vld [vmem:[%s2518_s0 + $0xd0] sm:$0xff]  }
  0x25   :  { %1845 = vmatprep.mubr.bf16.mxu1 %v364_v34  ;;  %v194_v62 = vmul.f32 %v1494_v54, %v1949_v5  ;;  %v1497_v63 = vunpack.c.l.bf16 %v1716_v46  ;;  %v1498_v0 = vunpack.c.h.bf16 %v1716_v46  ;;  %v306_v4 = vmax.f32 %v2072_v3, 0.0 }
  0x26   :  { %v187_v22 = vmul.f32 %v1481_v15, %v1949_v5  ;;  %v188_v28 = vmul.f32 %v1482_v19, %v1949_v5  ;;  %v365_v48 = vpack.c.bf16 %v319_v38, %v318_v35  ;;  %v323_v61 = vmax.f32 %v259_v49, 0.0 }
  0x27   :  { %v1461_v8 = vunpack.c.l.bf16 %v1707_v47  ;;  %v307_v13 = vmax.f32 %v2077_v7, 0.0  ;;  %v1462_v14 = vunpack.c.h.bf16 %v1707_v47  ;;  %v195_v15 = vmul.f32 %v1497_v63, %v1949_v5 }
  0x28   :  { %v256_v30 = vadd.f32 %v1960_v10, %v187_v22  ;;  %v257_v36 = vadd.f32 %v1960_v10, %v188_v28  ;;  %1846 = vmatmul.mubr.bf16.vlgmr.msra.gmra.mrb[0].mxu1 %v365_v48  ;;  %v196_v17 = vmul.f32 %v1498_v0, %v1949_v5  ;;  %v176_v3 = vmul.f32 %v1458_v12, %v1949_v5 }
  0x29   :  { %v1501_v19 = vunpack.c.l.bf16 %v1717_v1  ;;  %v1502_v20 = vunpack.c.h.bf16 %v1717_v1  ;;  %v264_v24 = vadd.f32 %v1960_v10, %v195_v15  ;;  %v1505_v27 = vunpack.c.l.bf16 %v1718_v18  ;;  %v1721_v15 = vld [vmem:[%s2518_s0 + $0xd8] sm:$0xff]  }
  0x2a   :  { %1818 = vmatmul.mubr.bf16.gmra.mrb[4].mxu0 %v351_v32  ;;  %v189_v32 = vmul.f32 %v1485_v23, %v1949_v5  ;;  %v320_v39 = vmax.f32 %v256_v30, 0.0  ;;  %v321_v42 = vmax.f32 %v257_v36, 0.0  ;;  %v263_v23 = vadd.f32 %v1960_v10, %v194_v62 }
  0x2b   :  { %1821 = vmatprep.mubr.bf16.mxu0 %v352_v45  ;;  %v1493_v45 = vunpack.c.l.bf16 %v1715_v33  ;;  %v1506_v52 = vunpack.c.h.bf16 %v1718_v18  ;;  %v358_v12 = vpack.c.bf16 %v305_v6, %v304_v2  ;;  %v244_v28 = vadd.f32 %v1960_v10, %v2086_v16  ;;  %v1709_v33 = vld [vmem:[%s2518_s0 + $0x78] sm:$0xff]   ;;  %v1719_v16 = vld [vmem:[%s2518_s0 + $0xc8] sm:$0xff]  }
  0x2c   :  { %v258_v41 = vadd.f32 %v1960_v10, %v189_v32  ;;  %v366_v55 = vpack.c.bf16 %v321_v42, %v320_v39  ;;  %v245_v31 = vadd.f32 %v1960_v10, %v176_v3  ;;  %v177_v32 = vmul.f32 %v1461_v8, %v1949_v5 }
  0x2d   :  { %v193_v59 = vmul.f32 %v1493_v45, %v1949_v5  ;;  %v197_v34 = vmul.f32 %v1501_v19, %v1949_v5  ;;  %v198_v50 = vmul.f32 %v1502_v20, %v1949_v5  ;;  %v359_v35 = vpack.c.bf16 %v307_v13, %v306_v4 }
  0x2e   :  { %v322_v51 = vmax.f32 %v258_v41, 0.0  ;;  %1849 = vmatprep.mubr.bf16.mxu1 %v366_v55  ;;  %v178_v53 = vmul.f32 %v1462_v14, %v1949_v5  ;;  %v327_v6 = vmax.f32 %v263_v23, 0.0  ;;  %v328_v36 = vmax.f32 %v264_v24, 0.0 }
  0x2f   :  { %v262_v22 = vadd.f32 %v1960_v10, %v193_v59  ;;  %v199_v38 = vmul.f32 %v1505_v27, %v1949_v5  ;;  %v200_v39 = vmul.f32 %v1506_v52, %v1949_v5  ;;  %v308_v41 = vmax.f32 %v244_v28, 0.0 }
  0x30   :  { %v367_v21 = vpack.c.bf16 %v323_v61, %v322_v51  ;;  %v309_v45 = vmax.f32 %v245_v31, 0.0  ;;  %v266_v46 = vadd.f32 %v1960_v10, %v197_v34  ;;  %v267_v47 = vadd.f32 %v1960_v10, %v198_v50 }
  0x31   :  { %v326_v2 = vmax.f32 %v262_v22, 0.0  ;;  %v1509_v48 = vunpack.c.l.bf16 %v1719_v16  ;;  %v1510_v51 = vunpack.c.h.bf16 %v1719_v16  ;;  %v1513_v54 = vunpack.c.l.bf16 %v1720_v40 }
  0x32   :  { %1822 = vmatmul.mubr.bf16.gmra.mrb[8].mxu0 %v353_v56  ;;  %v192_v56 = vmul.f32 %v1490_v43, %v1949_v5  ;;  %1850 = vmatmul.mubr.bf16.gmra.mrb[4].mxu1 %v367_v21  ;;  %v1514_v55 = vunpack.c.h.bf16 %v1720_v40  ;;  %v269_v59 = vadd.f32 %v1960_v10, %v200_v39  ;;  %v247_v61 = vadd.f32 %v1960_v10, %v178_v53  ;;  %v1722_v21 = vld [vmem:[%s2518_s0 + $0xe0] sm:$0xff]  }
  0x33   :  { %1825 = vmatprep.mubr.bf16.mxu0 %v354_v57  ;;  %v260_v57 = vadd.f32 %v1960_v10, %v191_v44  ;;  %v1469_v44 = vunpack.c.l.bf16 %v1709_v33  ;;  %v369_v49 = vpack.c.bf16 %v327_v6, %v326_v2  ;;  %v1470_v0 = vunpack.c.h.bf16 %v1709_v33 }
  0x34   :  { %v261_v9 = vadd.f32 %v1960_v10, %v192_v56  ;;  %v246_v56 = vadd.f32 %v1960_v10, %v177_v32  ;;  %v360_v1 = vpack.c.bf16 %v309_v45, %v308_v41  ;;  %v330_v4 = vmax.f32 %v266_v46, 0.0  ;;  %v1724_v41 = vld [vmem:[%s2518_s0 + $0xf0] sm:$0xff]  }
  0x35   :  { %v324_v11 = vmax.f32 %v260_v57, 0.0  ;;  %v268_v57 = vadd.f32 %v1960_v10, %v199_v38  ;;  %v331_v8 = vmax.f32 %v267_v47, 0.0  ;;  %v203_v13 = vmul.f32 %v1513_v54, %v1949_v5 }
  0x36   :  { %v325_v7 = vmax.f32 %v261_v9, 0.0  ;;  %v201_v9 = vmul.f32 %v1509_v48, %v1949_v5  ;;  %v204_v14 = vmul.f32 %v1514_v55, %v1949_v5  ;;  %v333_v3 = vmax.f32 %v269_v59, 0.0 }
  0x37   :  { %v332_v18 = vmax.f32 %v268_v57, 0.0  ;;  %v182_v20 = vmul.f32 %v1470_v0, %v1949_v5  ;;  %v371_v23 = vpack.c.bf16 %v331_v8, %v330_v4  ;;  %v272_v27 = vadd.f32 %v1960_v10, %v203_v13 }
  0x38   :  { %v368_v26 = vpack.c.bf16 %v325_v7, %v324_v11  ;;  %v202_v11 = vmul.f32 %v1510_v51, %v1949_v5  ;;  %v311_v7 = vmax.f32 %v247_v61, 0.0  ;;  %v270_v24 = vadd.f32 %v1960_v10, %v201_v9 }
  0x39   :  { %v273_v52 = vadd.f32 %v1960_v10, %v204_v14  ;;  %v372_v28 = vpack.c.bf16 %v333_v3, %v332_v18  ;;  %v251_v33 = vadd.f32 %v1960_v10, %v182_v20  ;;  %v336_v2 = vmax.f32 %v272_v27, 0.0 }
  0x3a   :  { %1826 = vmatmul.mubr.bf16.gmra.mrb[12].mxu0 %v2059_v58  ;;  %v1708_v58 = vld [vmem:[%s2518_s0 + $0x70] sm:$0xff]   ;;  %1853 = vmatprep.mubr.bf16.mxu1 %v368_v26  ;;  %v1517_v26 = vunpack.c.l.bf16 %v1721_v15  ;;  %v334_v50 = vmax.f32 %v270_v24, 0.0  ;;  %v1529_v51 = vunpack.c.l.bf16 %v1724_v41  ;;  %v1530_v54 = vunpack.c.h.bf16 %v1724_v41 }
  0x3b   :  { %1829 = vmatprep.mubr.bf16.mxu0 %v2064_v60  ;;  %v265_v60 = vadd.f32 %v1960_v10, %v196_v17  ;;  %v1465_v29 = vunpack.c.l.bf16 %v1708_v58  ;;  %v1466_v30 = vunpack.c.h.bf16 %v1708_v58  ;;  %1854 = vmatmul.mubr.bf16.gmra.mrb[8].mxu1 %v369_v49  ;;  %v181_v17 = vmul.f32 %v1469_v44, %v1949_v5 }
  0x3c   :  { %v310_v58 = vmax.f32 %v246_v56, 0.0  ;;  %v337_v6 = vmax.f32 %v273_v52, 0.0  ;;  %v315_v40 = vmax.f32 %v251_v33, 0.0  ;;  %v212_v0 = vmul.f32 %v1530_v54, %v1949_v5 }
  0x3d   :  { %v329_v37 = vmax.f32 %v265_v60, 0.0  ;;  %v179_v42 = vmul.f32 %v1465_v29, %v1949_v5  ;;  %v180_v43 = vmul.f32 %v1466_v30, %v1949_v5  ;;  %v271_v60 = vadd.f32 %v1960_v10, %v202_v11 }
  0x3e   :  { %v1521_v29 = vunpack.c.l.bf16 %v1722_v21  ;;  %v1522_v30 = vunpack.c.h.bf16 %v1722_v21  ;;  %v361_v31 = vpack.c.bf16 %v311_v7, %v310_v58  ;;  %v250_v32 = vadd.f32 %v1960_v10, %v181_v17 }
  0x3f   :  { %v248_v62 = vadd.f32 %v1960_v10, %v179_v42  ;;  %v249_v63 = vadd.f32 %v1960_v10, %v180_v43  ;;  %v335_v53 = vmax.f32 %v271_v60, 0.0  ;;  %v374_v45 = vpack.c.bf16 %v337_v6, %v336_v2 }
  0x40   :  { %v208_v38 = vmul.f32 %v1522_v30, %v1949_v5  ;;  %v314_v39 = vmax.f32 %v250_v32, 0.0  ;;  %v281_v17 = vadd.f32 %v1960_v10, %v212_v0 }
  0x41   :  { %v312_v19 = vmax.f32 %v248_v62, 0.0  ;;  %v313_v22 = vmax.f32 %v249_v63, 0.0  ;;  %v373_v44 = vpack.c.bf16 %v335_v53, %v334_v50  ;;  %v211_v63 = vmul.f32 %v1529_v51, %v1949_v5 }
  0x42   :  { %1830 = vmatmul.mubr.bf16.gmra.mrb[16].mxu0 %v2095_v25  ;;  %v370_v25 = vpack.c.bf16 %v329_v37, %v328_v36  ;;  %v1723_v36 = vld [vmem:[%s2518_s0 + $0xe8] sm:$0xff]   ;;  %v207_v37 = vmul.f32 %v1521_v29, %v1949_v5  ;;  %v277_v49 = vadd.f32 %v1960_v10, %v208_v38  ;;  %v363_v55 = vpack.c.bf16 %v315_v40, %v314_v39 }
  0x43   :  { %1833 = vmatprep.mubr.bf16.mxu0 %v358_v12  ;;  %v1518_v12 = vunpack.c.h.bf16 %v1721_v15  ;;  %v362_v34 = vpack.c.bf16 %v313_v22, %v312_v19  ;;  %v1525_v43 = vunpack.c.l.bf16 %v1723_v36  ;;  %v1526_v47 = vunpack.c.h.bf16 %v1723_v36 }
  0x44   :  { %1857 = vmatprep.mubr.bf16.mxu1 %v370_v25  ;;  %v276_v48 = vadd.f32 %v1960_v10, %v207_v37  ;;  %v341_v62 = vmax.f32 %v277_v49, 0.0  ;;  %v280_v15 = vadd.f32 %v1960_v10, %v211_v63  ;;  %v345_v20 = vmax.f32 %v281_v17, 0.0 }
  0x45   :  { %1858 = vmatmul.mubr.bf16.gmra.mrb[12].mxu1 %v371_v23  ;;  %v206_v16 = vmul.f32 %v1518_v12, %v1949_v5  ;;  %v209_v56 = vmul.f32 %v1525_v43, %v1949_v5  ;;  %v210_v59 = vmul.f32 %v1526_v47, %v1949_v5 }
  0x46   :  { %1861 = vmatprep.mubr.bf16.mxu1 %v372_v28  ;;  %v340_v61 = vmax.f32 %v276_v48, 0.0  ;;  %v344_v19 = vmax.f32 %v280_v15, 0.0 }
  0x47   :  { %v275_v46 = vadd.f32 %v1960_v10, %v206_v16  ;;  %v278_v4 = vadd.f32 %v1960_v10, %v209_v56  ;;  %v279_v9 = vadd.f32 %v1960_v10, %v210_v59 }
  0x48   :  { %v376_v14 = vpack.c.bf16 %v341_v62, %v340_v61  ;;  %v378_v24 = vpack.c.bf16 %v345_v20, %v344_v19 }
  0x49   :  { %v339_v57 = vmax.f32 %v275_v46, 0.0  ;;  %v342_v18 = vmax.f32 %v278_v4, 0.0  ;;  %v343_v3 = vmax.f32 %v279_v9, 0.0 }
  0x4a   :  { %1834 = vmatmul.mubr.bf16.gmra.mrb[20].mxu0 %v359_v35  ;;  %v205_v35 = vmul.f32 %v1517_v26, %v1949_v5 }
  0x4b   :  { %1837 = vmatprep.mubr.bf16.mxu0 %v360_v1  ;;  %v1725_v1 = vld [vmem:[%s2518_s0 + $0xf8] sm:$0xff]   ;;  %v377_v21 = vpack.c.bf16 %v343_v3, %v342_v18 }
  0x4c   :  { %v274_v42 = vadd.f32 %v1960_v10, %v205_v35  ;;  %v1533_v11 = vunpack.c.l.bf16 %v1725_v1  ;;  %v1534_v13 = vunpack.c.h.bf16 %v1725_v1 }
  0x4d   :  { %1862 = vmatmul.mubr.bf16.gmra.mrb[16].mxu1 %v373_v44 }
  0x4e   :  { %v338_v25 = vmax.f32 %v274_v42, 0.0  ;;  %1865 = vmatprep.mubr.bf16.mxu1 %v374_v45  ;;  %v213_v58 = vmul.f32 %v1533_v11, %v1949_v5  ;;  %v214_v7 = vmul.f32 %v1534_v13, %v1949_v5 }
  0x50   :  { %v375_v8 = vpack.c.bf16 %v339_v57, %v338_v25  ;;  %v282_v22 = vadd.f32 %v1960_v10, %v213_v58  ;;  %v283_v23 = vadd.f32 %v1960_v10, %v214_v7 }
  0x52   :  { %1838 = vmatmul.mubr.bf16.gmra.mrb[24].mxu0 %v361_v31  ;;  %v346_v26 = vmax.f32 %v282_v22, 0.0  ;;  %v347_v60 = vmax.f32 %v283_v23, 0.0 }
  0x53   :  { %1841 = vmatprep.mubr.bf16.mxu0 %v362_v34 }
  0x54   :  { %v379_v27 = vpack.c.bf16 %v347_v60, %v346_v26 }
  0x55   :  { %1866 = vmatmul.mubr.bf16.gmra.mrb[20].mxu1 %v375_v8 }
  0x56   :  { %1869 = vmatprep.mubr.bf16.mxu1 %v376_v14 }
  0x5a   :  { %1842 = vmatmul.mubr.bf16.gmra.mrb[28].mxu0 %v363_v55 }
  0x5d   :  { %1870 = vmatmul.mubr.bf16.gmra.mrb[24].mxu1 %v377_v21 }
  0x5e   :  { %1873 = vmatprep.mubr.bf16.mxu1 %v378_v24 }
  0x65   :  { %1874 = vmatmul.mubr.bf16.gmra.mrb[28].mxu1 %v379_v27 }
  0xf5   :  { %v1815_v52 = vpop.f32.mrb[0].mxu0 }
  0xf6   :  { %v478_v12 = vpop.f32.mrb[1].mxu0  ;;  %v1125_v10 = vmul.f32 %v1815_v52, %v1815_v52 }
  0xf7   :  { %v1816_v28 = vpop.f32.mrb[2].mxu0  ;;  %v1123_v30 = vmul.f32 %v478_v12, %v478_v12 }
  0xf8   :  { %v1543_v29 = vpack.c.bf16 %v1816_v28, %v1815_v52  ;;  %v481_v5 = vpop.f32.mrb[3].mxu0  ;;  %v1126_v35 = vmul.f32 %v1816_v28, %v1816_v28 }
  0xf9   :  { %v1538_v31 = vpack.c.bf16 %v481_v5, %v478_v12  ;;  %v1053_v32 = vadd.f32 %v481_v5, %v478_v12  ;;  %v1124_v33 = vmul.f32 %v481_v5, %v481_v5 }
  0xfa   :  { %1726 = vst [vmem:[%s2520_s3 + $0x8] sm:$0xff] %v1543_v29  }
  0xfb   :  { %1539 = vst [vmem:[%s2520_s3] sm:$0xff] %v1538_v31   ;;  %v1054_v34 = vadd.f32 %v1815_v52, %v1053_v32  ;;  %v1187_v50 = vadd.f32 %v1124_v33, %v1123_v30  ;;  %v2241_v14 = vpop.f32.mrb[0].mxu1 }
  0xfc   :  { %v2243_v15 = vpop.f32.mrb[1].mxu1 }
  0xfd   :  { %v1188_v53 = vadd.f32 %v1187_v50, %v1125_v10  ;;  %v1819_v2 = vpop.f32.mrb[4].mxu0  ;;  %v1055_v6 = vadd.f32 %v1816_v28, %v1054_v34  ;;  %v2245_v7 = vpop.f32.mrb[2].mxu1 }
  0xfe   :  { %v494_v16 = vpop.f32.mrb[5].mxu0  ;;  %v1129_v46 = vmul.f32 %v1819_v2, %v1819_v2  ;;  %v1623_v20 = vpack.c.bf16 %v2245_v7, %v2241_v14  ;;  %v2249_v21 = vpop.f32.mrb[3].mxu1 }
  0xff   :  { %v1056_v36 = vadd.f32 %v1055_v6, %v494_v16  ;;  %v1127_v37 = vmul.f32 %v494_v16, %v494_v16  ;;  %v1189_v38 = vadd.f32 %v1188_v53, %v1126_v35  ;;  %v1820_v39 = vpop.f32.mrb[6].mxu0  ;;  %v1618_v60 = vpack.c.bf16 %v2249_v21, %v2243_v15 }
 0x100   :  { %v1553_v40 = vpack.c.bf16 %v1820_v39, %v1819_v2  ;;  %v497_v41 = vpop.f32.mrb[7].mxu0  ;;  %v1130_v49 = vmul.f32 %v1820_v39, %v1820_v39  ;;  %1742 = vst [vmem:[%s2520_s3 + $0x88] sm:$0xff] %v1623_v20  }
 0x101   :  { %v1190_v42 = vadd.f32 %v1189_v38, %v1127_v37  ;;  %v1548_v43 = vpack.c.bf16 %v497_v41, %v494_v16  ;;  %v1057_v44 = vadd.f32 %v1056_v36, %v497_v41  ;;  %v1128_v45 = vmul.f32 %v497_v41, %v497_v41  ;;  %1741 = vst [vmem:[%s2520_s3 + $0x80] sm:$0xff] %v1618_v60  }
 0x102   :  { %1728 = vst [vmem:[%s2520_s3 + $0x18] sm:$0xff] %v1553_v40  }
 0x103   :  { %1727 = vst [vmem:[%s2520_s3 + $0x10] sm:$0xff] %v1548_v43   ;;  %v1058_v47 = vadd.f32 %v1819_v2, %v1057_v44  ;;  %v1191_v48 = vadd.f32 %v1190_v42, %v1128_v45 }
 0x105   :  { %v1192_v51 = vadd.f32 %v1191_v48, %v1129_v46  ;;  %v1823_v54 = vpop.f32.mrb[8].mxu0  ;;  %v1059_v55 = vadd.f32 %v1820_v39, %v1058_v47  ;;  %v2265_v33 = vpop.f32.mrb[4].mxu1 }
 0x106   :  { %v510_v56 = vpop.f32.mrb[9].mxu0  ;;  %v1133_v9 = vmul.f32 %v1823_v54, %v1823_v54  ;;  %v2267_v10 = vpop.f32.mrb[5].mxu1 }
 0x107   :  { %v1060_v25 = vadd.f32 %v1059_v55, %v510_v56  ;;  %v1131_v57 = vmul.f32 %v510_v56, %v510_v56  ;;  %v1193_v59 = vadd.f32 %v1192_v51, %v1130_v49  ;;  %v1824_v61 = vpop.f32.mrb[10].mxu0  ;;  %v2269_v2 = vpop.f32.mrb[6].mxu1 }
 0x108   :  { %v1563_v62 = vpack.c.bf16 %v1824_v61, %v1823_v54  ;;  %v513_v63 = vpop.f32.mrb[11].mxu0  ;;  %v1134_v17 = vmul.f32 %v1824_v61, %v1824_v61  ;;  %v1633_v16 = vpack.c.bf16 %v2269_v2, %v2265_v33  ;;  %v2273_v36 = vpop.f32.mrb[7].mxu1 }
 0x109   :  { %v1194_v0 = vadd.f32 %v1193_v59, %v1131_v57  ;;  %v1558_v1 = vpack.c.bf16 %v513_v63, %v510_v56  ;;  %v1061_v4 = vadd.f32 %v1060_v25, %v513_v63  ;;  %v1132_v8 = vmul.f32 %v513_v63, %v513_v63 }
 0x10a   :  { %1730 = vst [vmem:[%s2520_s3 + $0x28] sm:$0xff] %v1563_v62   ;;  %v1628_v41 = vpack.c.bf16 %v2273_v36, %v2267_v10  ;;  %1744 = vst [vmem:[%s2520_s3 + $0x98] sm:$0xff] %v1633_v16  }
 0x10b   :  { %1729 = vst [vmem:[%s2520_s3 + $0x20] sm:$0xff] %v1558_v1   ;;  %v1062_v11 = vadd.f32 %v1823_v54, %v1061_v4  ;;  %v1195_v13 = vadd.f32 %v1194_v0, %v1132_v8 }
 0x10c   :  { %1743 = vst [vmem:[%s2520_s3 + $0x90] sm:$0xff] %v1628_v41  }
 0x10d   :  { %v1196_v18 = vadd.f32 %v1195_v13, %v1133_v9  ;;  %v1827_v3 = vpop.f32.mrb[12].mxu0  ;;  %v1063_v58 = vadd.f32 %v1824_v61, %v1062_v11 }
 0x10e   :  { %v526_v19 = vpop.f32.mrb[13].mxu0  ;;  %v1137_v30 = vmul.f32 %v1827_v3, %v1827_v3  ;;  %v2289_v54 = vpop.f32.mrb[8].mxu1 }
 0x10f   :  { %v1064_v22 = vadd.f32 %v1063_v58, %v526_v19  ;;  %v1135_v23 = vmul.f32 %v526_v19, %v526_v19  ;;  %v1197_v24 = vadd.f32 %v1196_v18, %v1134_v17  ;;  %v1828_v26 = vpop.f32.mrb[14].mxu0  ;;  %v2291_v55 = vpop.f32.mrb[9].mxu1 }
 0x110   :  { %v1573_v27 = vpack.c.bf16 %v1828_v26, %v1827_v3  ;;  %v529_v52 = vpop.f32.mrb[15].mxu0  ;;  %v1138_v34 = vmul.f32 %v1828_v26, %v1828_v26  ;;  %v2293_v61 = vpop.f32.mrb[10].mxu1 }
 0x111   :  { %v1198_v12 = vadd.f32 %v1197_v24, %v1135_v23  ;;  %v1568_v28 = vpack.c.bf16 %v529_v52, %v526_v19  ;;  %v1065_v29 = vadd.f32 %v1064_v22, %v529_v52  ;;  %v1136_v5 = vmul.f32 %v529_v52, %v529_v52  ;;  %v2297_v0 = vpop.f32.mrb[11].mxu1 }
 0x112   :  { %1732 = vst [vmem:[%s2520_s3 + $0x38] sm:$0xff] %v1573_v27   ;;  %v1643_v63 = vpack.c.bf16 %v2293_v61, %v2289_v54  ;;  %v1638_v11 = vpack.c.bf16 %v2297_v0, %v2291_v55 }
 0x113   :  { %1731 = vst [vmem:[%s2520_s3 + $0x30] sm:$0xff] %v1568_v28   ;;  %v1066_v31 = vadd.f32 %v1827_v3, %v1065_v29  ;;  %v1199_v32 = vadd.f32 %v1198_v12, %v1136_v5 }
 0x114   :  { %1746 = vst [vmem:[%s2520_s3 + $0xa8] sm:$0xff] %v1643_v63   ;;  %1745 = vst [vmem:[%s2520_s3 + $0xa0] sm:$0xff] %v1638_v11  }
 0x115   :  { %v1200_v50 = vadd.f32 %v1199_v32, %v1137_v30  ;;  %v1831_v35 = vpop.f32.mrb[16].mxu0  ;;  %v1067_v53 = vadd.f32 %v1828_v26, %v1066_v31 }
 0x116   :  { %v542_v6 = vpop.f32.mrb[17].mxu0  ;;  %v1141_v48 = vmul.f32 %v1831_v35, %v1831_v35 }
 0x117   :  { %v1068_v37 = vadd.f32 %v1067_v53, %v542_v6  ;;  %v1139_v38 = vmul.f32 %v542_v6, %v542_v6  ;;  %v1201_v39 = vadd.f32 %v1200_v50, %v1138_v34  ;;  %v1832_v40 = vpop.f32.mrb[18].mxu0 }
 0x118   :  { %v1583_v42 = vpack.c.bf16 %v1832_v40, %v1831_v35  ;;  %v545_v43 = vpop.f32.mrb[19].mxu0  ;;  %v1142_v56 = vmul.f32 %v1832_v40, %v1832_v40  ;;  %v2313_v24 = vpop.f32.mrb[12].mxu1 }
 0x119   :  { %v1202_v44 = vadd.f32 %v1201_v39, %v1139_v38  ;;  %v1578_v45 = vpack.c.bf16 %v545_v43, %v542_v6  ;;  %v1069_v46 = vadd.f32 %v1068_v37, %v545_v43  ;;  %v1140_v47 = vmul.f32 %v545_v43, %v545_v43  ;;  %v2315_v26 = vpop.f32.mrb[13].mxu1 }
 0x11a   :  { %1734 = vst [vmem:[%s2520_s3 + $0x48] sm:$0xff] %v1583_v42   ;;  %v2317_v28 = vpop.f32.mrb[14].mxu1 }
 0x11b   :  { %1733 = vst [vmem:[%s2520_s3 + $0x40] sm:$0xff] %v1578_v45   ;;  %v1070_v49 = vadd.f32 %v1831_v35, %v1069_v46  ;;  %v1203_v51 = vadd.f32 %v1202_v44, %v1140_v47  ;;  %v1653_v5 = vpack.c.bf16 %v2317_v28, %v2313_v24  ;;  %v2321_v30 = vpop.f32.mrb[15].mxu1 }
 0x11c   :  { %v1648_v35 = vpack.c.bf16 %v2321_v30, %v2315_v26 }
 0x11d   :  { %v1204_v25 = vadd.f32 %v1203_v51, %v1141_v48  ;;  %v1835_v57 = vpop.f32.mrb[20].mxu0  ;;  %v1071_v59 = vadd.f32 %v1832_v40, %v1070_v49  ;;  %1748 = vst [vmem:[%s2520_s3 + $0xb8] sm:$0xff] %v1653_v5  }
 0x11e   :  { %v558_v62 = vpop.f32.mrb[21].mxu0  ;;  %v1145_v20 = vmul.f32 %v1835_v57, %v1835_v57  ;;  %1747 = vst [vmem:[%s2520_s3 + $0xb0] sm:$0xff] %v1648_v35   ;;  %v1156_v35 = vmul.f32 %v2249_v21, %v2249_v21 }
 0x11f   :  { %v1072_v1 = vadd.f32 %v1071_v59, %v558_v62  ;;  %v1143_v4 = vmul.f32 %v558_v62, %v558_v62  ;;  %v1205_v8 = vadd.f32 %v1204_v25, %v1142_v56  ;;  %v1836_v9 = vpop.f32.mrb[22].mxu0 }
 0x120   :  { %v1593_v13 = vpack.c.bf16 %v1836_v9, %v1835_v57  ;;  %v561_v17 = vpop.f32.mrb[23].mxu0  ;;  %v1146_v60 = vmul.f32 %v1836_v9, %v1836_v9  ;;  %v2337_v43 = vpop.f32.mrb[16].mxu1 }
 0x121   :  { %v1206_v18 = vadd.f32 %v1205_v8, %v1143_v4  ;;  %v1588_v3 = vpack.c.bf16 %v561_v17, %v558_v62  ;;  %v1073_v58 = vadd.f32 %v1072_v1, %v561_v17  ;;  %v1144_v19 = vmul.f32 %v561_v17, %v561_v17  ;;  %v2339_v44 = vpop.f32.mrb[17].mxu1 }
 0x122   :  { %1736 = vst [vmem:[%s2520_s3 + $0x58] sm:$0xff] %v1593_v13   ;;  %v2341_v49 = vpop.f32.mrb[18].mxu1 }
 0x123   :  { %1735 = vst [vmem:[%s2520_s3 + $0x50] sm:$0xff] %v1588_v3   ;;  %v1074_v22 = vadd.f32 %v1835_v57, %v1073_v58  ;;  %v1207_v23 = vadd.f32 %v1206_v18, %v1144_v19  ;;  %v1663_v56 = vpack.c.bf16 %v2341_v49, %v2337_v43  ;;  %v2345_v25 = vpop.f32.mrb[19].mxu1 }
 0x124   :  { %v1658_v1 = vpack.c.bf16 %v2345_v25, %v2339_v44 }
 0x125   :  { %v1208_v27 = vadd.f32 %v1207_v23, %v1145_v20  ;;  %v1839_v52 = vpop.f32.mrb[24].mxu0  ;;  %v1075_v12 = vadd.f32 %v1836_v9, %v1074_v22  ;;  %1750 = vst [vmem:[%s2520_s3 + $0xc8] sm:$0xff] %v1663_v56  }
 0x126   :  { %v574_v29 = vpop.f32.mrb[25].mxu0  ;;  %v1149_v40 = vmul.f32 %v1839_v52, %v1839_v52  ;;  %1749 = vst [vmem:[%s2520_s3 + $0xc0] sm:$0xff] %v1658_v1  }
 0x127   :  { %v1076_v31 = vadd.f32 %v1075_v12, %v574_v29  ;;  %v1147_v32 = vmul.f32 %v574_v29, %v574_v29  ;;  %v1209_v34 = vadd.f32 %v1208_v27, %v1146_v60  ;;  %v1840_v50 = vpop.f32.mrb[26].mxu0  ;;  %v1155_v27 = vmul.f32 %v2243_v15, %v2243_v15 }
 0x128   :  { %v1603_v53 = vpack.c.bf16 %v1840_v50, %v1839_v52  ;;  %v577_v6 = vpop.f32.mrb[27].mxu0  ;;  %v1150_v45 = vmul.f32 %v1840_v50, %v1840_v50  ;;  %v2361_v19 = vpop.f32.mrb[20].mxu1 }
 0x129   :  { %v1210_v16 = vadd.f32 %v1209_v34, %v1147_v32  ;;  %v1598_v37 = vpack.c.bf16 %v577_v6, %v574_v29  ;;  %v1077_v38 = vadd.f32 %v1076_v31, %v577_v6  ;;  %v1148_v39 = vmul.f32 %v577_v6, %v577_v6  ;;  %v2363_v20 = vpop.f32.mrb[21].mxu1 }
 0x12a   :  { %1738 = vst [vmem:[%s2520_s3 + $0x68] sm:$0xff] %v1603_v53  }
 0x12b   :  { %1737 = vst [vmem:[%s2520_s3 + $0x60] sm:$0xff] %v1598_v37   ;;  %v1078_v41 = vadd.f32 %v1839_v52, %v1077_v38  ;;  %v1211_v42 = vadd.f32 %v1210_v16, %v1148_v39  ;;  %v2367_v52 = vpop.f32.mrb[22].mxu1  ;;  %v1158_v38 = vmul.f32 %v2245_v7, %v2245_v7 }
 0x12c   :  { %v1673_v12 = vpack.c.bf16 %v2367_v52, %v2361_v19  ;;  %v2371_v29 = vpop.f32.mrb[23].mxu1 }
 0x12d   :  { %v1212_v46 = vadd.f32 %v1211_v42, %v1149_v40  ;;  %v1843_v47 = vpop.f32.mrb[28].mxu0  ;;  %v1079_v48 = vadd.f32 %v1840_v50, %v1078_v41  ;;  %v1668_v32 = vpack.c.bf16 %v2371_v29, %v2363_v20  ;;  %v1159_v40 = vmul.f32 %v2267_v10, %v2267_v10 }
 0x12e   :  { %v590_v51 = vpop.f32.mrb[29].mxu0  ;;  %v1153_v18 = vmul.f32 %v1843_v47, %v1843_v47  ;;  %1752 = vst [vmem:[%s2520_s3 + $0xd8] sm:$0xff] %v1673_v12   ;;  %v1167_v12 = vmul.f32 %v2315_v26, %v2315_v26 }
 0x12f   :  { %v1080_v57 = vadd.f32 %v1079_v48, %v590_v51  ;;  %v1151_v59 = vmul.f32 %v590_v51, %v590_v51  ;;  %v1213_v62 = vadd.f32 %v1212_v46, %v1150_v45  ;;  %v1844_v63 = vpop.f32.mrb[30].mxu0  ;;  %1751 = vst [vmem:[%s2520_s3 + $0xd0] sm:$0xff] %v1668_v32  }
 0x130   :  { %v1613_v4 = vpack.c.bf16 %v1844_v63, %v1843_v47  ;;  %v593_v8 = vpop.f32.mrb[31].mxu0  ;;  %v1154_v22 = vmul.f32 %v1844_v63, %v1844_v63  ;;  %v2388_v16 = vpop.f32.mrb[24].mxu1 }
 0x131   :  { %v1214_v9 = vadd.f32 %v1213_v62, %v1151_v59  ;;  %v1608_v11 = vpack.c.bf16 %v593_v8, %v590_v51  ;;  %v1081_v13 = vadd.f32 %v1080_v57, %v593_v8  ;;  %v1152_v17 = vmul.f32 %v593_v8, %v593_v8  ;;  %v2390_v37 = vpop.f32.mrb[25].mxu1 }
 0x132   :  { %1740 = vst [vmem:[%s2520_s3 + $0x78] sm:$0xff] %v1613_v4   ;;  %v2397_v41 = vpop.f32.mrb[26].mxu1  ;;  %v1160_v51 = vmul.f32 %v2273_v36, %v2273_v36  ;;  %v1163_v4 = vmul.f32 %v2291_v55, %v2291_v55 }
 0x133   :  { %1739 = vst [vmem:[%s2520_s3 + $0x70] sm:$0xff] %v1608_v11   ;;  %v1082_v3 = vadd.f32 %v1843_v47, %v1081_v13  ;;  %v1215_v58 = vadd.f32 %v1214_v9, %v1152_v17  ;;  %v1683_v42 = vpack.c.bf16 %v2397_v41, %v2388_v16 }
 0x135   :  { %v1216_v23 = vadd.f32 %v1215_v58, %v1153_v18  ;;  %v1083_v60 = vadd.f32 %v1844_v63, %v1082_v3  ;;  %1754 = vst [vmem:[%s2520_s3 + $0xe8] sm:$0xff] %v1683_v42   ;;  %v1162_v63 = vmul.f32 %v2269_v2, %v2269_v2  ;;  %v1164_v3 = vmul.f32 %v2297_v0, %v2297_v0 }
 0x137   :  { %v1084_v5 = vadd.f32 %v1083_v60, %v2243_v15  ;;  %v1217_v31 = vadd.f32 %v1216_v23, %v1154_v22  ;;  %v1157_v15 = vmul.f32 %v2241_v14, %v2241_v14  ;;  %v1166_v23 = vmul.f32 %v2293_v61, %v2293_v61 }
 0x139   :  { %v1218_v34 = vadd.f32 %v1217_v31, %v1155_v27  ;;  %v1085_v50 = vadd.f32 %v1084_v5, %v2249_v21 }
 0x13b   :  { %v1086_v53 = vadd.f32 %v2241_v14, %v1085_v50  ;;  %v1219_v6 = vadd.f32 %v1218_v34, %v1156_v35  ;;  %v2401_v14 = vpop.f32.mrb[27].mxu1  ;;  %v1168_v34 = vmul.f32 %v2321_v30, %v2321_v30 }
 0x13c   :  { %v1678_v47 = vpack.c.bf16 %v2401_v14, %v2390_v37  ;;  %v2418_v59 = vpop.f32.mrb[28].mxu1 }
 0x13d   :  { %v1220_v39 = vadd.f32 %v1219_v6, %v1157_v15  ;;  %v1087_v21 = vadd.f32 %v2245_v7, %v1086_v53  ;;  %v2420_v62 = vpop.f32.mrb[29].mxu1 }
 0x13e   :  { %1753 = vst [vmem:[%s2520_s3 + $0xe0] sm:$0xff] %v1678_v47   ;;  %v2427_v8 = vpop.f32.mrb[30].mxu1 }
 0x13f   :  { %v1088_v45 = vadd.f32 %v1087_v21, %v2267_v10  ;;  %v1221_v46 = vadd.f32 %v1220_v39, %v1158_v38  ;;  %v1161_v10 = vmul.f32 %v2265_v33, %v2265_v33  ;;  %v1693_v9 = vpack.c.bf16 %v2427_v8, %v2418_v59 }
 0x140   :  { %v1172_v21 = vmul.f32 %v2345_v25, %v2345_v25 }
 0x141   :  { %v1222_v7 = vadd.f32 %v1221_v46, %v1159_v40  ;;  %v1089_v48 = vadd.f32 %v1088_v45, %v2273_v36  ;;  %1756 = vst [vmem:[%s2520_s3 + $0xf8] sm:$0xff] %v1693_v9   ;;  %v1180_v9 = vmul.f32 %v2401_v14, %v2401_v14 }
 0x143   :  { %v1090_v56 = vadd.f32 %v2265_v33, %v1089_v48  ;;  %v1223_v57 = vadd.f32 %v1222_v7, %v1160_v51  ;;  %v2431_v33 = vpop.f32.mrb[31].mxu1  ;;  %v1176_v51 = vmul.f32 %v2371_v29, %v2371_v29 }
 0x144   :  { %v1688_v17 = vpack.c.bf16 %v2431_v33, %v2420_v62 }
 0x145   :  { %v1224_v1 = vadd.f32 %v1223_v57, %v1161_v10  ;;  %v1091_v36 = vadd.f32 %v2269_v2, %v1090_v56 }
 0x146   :  { %1755 = vst [vmem:[%s2520_s3 + $0xf0] sm:$0xff] %v1688_v17  }
 0x147   :  { %v1092_v11 = vadd.f32 %v1091_v36, %v2291_v55  ;;  %v1225_v13 = vadd.f32 %v1224_v1, %v1162_v63  ;;  %v1165_v55 = vmul.f32 %v2289_v54, %v2289_v54 }
 0x149   :  { %v1226_v2 = vadd.f32 %v1225_v13, %v1163_v4  ;;  %v1093_v18 = vadd.f32 %v1092_v11, %v2297_v0 }
 0x14b   :  { %v1094_v58 = vadd.f32 %v2289_v54, %v1093_v18  ;;  %v1227_v22 = vadd.f32 %v1226_v2, %v1164_v3  ;;  %v1169_v54 = vmul.f32 %v2313_v24, %v2313_v24 }
 0x14d   :  { %v1228_v60 = vadd.f32 %v1227_v22, %v1165_v55  ;;  %v1095_v27 = vadd.f32 %v2293_v61, %v1094_v58  ;;  %v1170_v61 = vmul.f32 %v2317_v28, %v2317_v28  ;;  %v1184_v58 = vmul.f32 %v2431_v33, %v2431_v33 }
 0x14f   :  { %v1096_v0 = vadd.f32 %v1095_v27, %v2315_v26  ;;  %v1229_v5 = vadd.f32 %v1228_v60, %v1166_v23  ;;  %v1171_v26 = vmul.f32 %v2339_v44, %v2339_v44 }
 0x151   :  { %v1230_v31 = vadd.f32 %v1229_v5, %v1167_v12  ;;  %v1097_v32 = vadd.f32 %v1096_v0, %v2321_v30 }
 0x153   :  { %v1098_v50 = vadd.f32 %v2313_v24, %v1097_v32  ;;  %v1231_v35 = vadd.f32 %v1230_v31, %v1168_v34  ;;  %v1173_v24 = vmul.f32 %v2337_v43, %v2337_v43 }
 0x155   :  { %v1232_v15 = vadd.f32 %v1231_v35, %v1169_v54  ;;  %v1099_v53 = vadd.f32 %v2317_v28, %v1098_v50  ;;  %v1174_v28 = vmul.f32 %v2341_v49, %v2341_v49 }
 0x157   :  { %v1100_v6 = vadd.f32 %v1099_v53, %v2339_v44  ;;  %v1233_v38 = vadd.f32 %v1232_v15, %v1170_v61  ;;  %v1175_v44 = vmul.f32 %v2363_v20, %v2363_v20 }
 0x159   :  { %v1234_v39 = vadd.f32 %v1233_v38, %v1171_v26  ;;  %v1101_v30 = vadd.f32 %v1100_v6, %v2345_v25 }
 0x15b   :  { %v1102_v40 = vadd.f32 %v2337_v43, %v1101_v30  ;;  %v1235_v42 = vadd.f32 %v1234_v39, %v1172_v21  ;;  %v1177_v43 = vmul.f32 %v2361_v19, %v2361_v19 }
 0x15d   :  { %v1236_v45 = vadd.f32 %v1235_v42, %v1173_v24  ;;  %v1103_v46 = vadd.f32 %v2341_v49, %v1102_v40  ;;  %v1178_v49 = vmul.f32 %v2367_v52, %v2367_v52 }
 0x15f   :  { %v1104_v47 = vadd.f32 %v1103_v46, %v2363_v20  ;;  %v1237_v7 = vadd.f32 %v1236_v45, %v1174_v28  ;;  %v1179_v20 = vmul.f32 %v2390_v37, %v2390_v37 }
 0x161   :  { %v1238_v48 = vadd.f32 %v1237_v7, %v1175_v44  ;;  %v1105_v25 = vadd.f32 %v1104_v47, %v2371_v29 }
 0x163   :  { %v1106_v10 = vadd.f32 %v2361_v19, %v1105_v25  ;;  %v1239_v56 = vadd.f32 %v1238_v48, %v1176_v51  ;;  %v1181_v19 = vmul.f32 %v2388_v16, %v2388_v16 }
 0x165   :  { %v1240_v57 = vadd.f32 %v1239_v56, %v1177_v43  ;;  %v1107_v63 = vadd.f32 %v2367_v52, %v1106_v10  ;;  %v1182_v52 = vmul.f32 %v2397_v41, %v2397_v41 }
 0x167   :  { %v1108_v1 = vadd.f32 %v1107_v63, %v2390_v37  ;;  %v1241_v36 = vadd.f32 %v1240_v57, %v1178_v49  ;;  %v1183_v37 = vmul.f32 %v2420_v62, %v2420_v62 }
 0x169   :  { %v1242_v4 = vadd.f32 %v1241_v36, %v1179_v20  ;;  %v1109_v29 = vadd.f32 %v1108_v1, %v2401_v14 }
 0x16b   :  { %v1110_v11 = vadd.f32 %v2388_v16, %v1109_v29  ;;  %v1243_v13 = vadd.f32 %v1242_v4, %v1180_v9  ;;  %v1185_v16 = vmul.f32 %v2418_v59, %v2418_v59 }
 0x16d   :  { %v1244_v17 = vadd.f32 %v1243_v13, %v1181_v19  ;;  %v1111_v2 = vadd.f32 %v2397_v41, %v1110_v11  ;;  %v1186_v41 = vmul.f32 %v2427_v8, %v2427_v8 }
 0x16f   :  { %v1112_v18 = vadd.f32 %v1111_v2, %v2420_v62  ;;  %v1245_v3 = vadd.f32 %v1244_v17, %v1182_v52 }
 0x171   :  { %v1246_v55 = vadd.f32 %v1245_v3, %v1183_v37  ;;  %v1113_v14 = vadd.f32 %v1112_v18, %v2431_v33 }
 0x173   :  { %v1114_v22 = vadd.f32 %v2418_v59, %v1113_v14  ;;  %v1247_v23 = vadd.f32 %v1246_v55, %v1184_v58 }
 0x175   :  { %v1115_v60 = vadd.f32 %v2427_v8, %v1114_v22  ;;  %v1248_v27 = vadd.f32 %v1247_v23, %v1185_v16 }
 0x177   :  { %v1116_v62 = vrot.slane %v1115_v60, 4  ;;  %v1249_v12 = vadd.f32 %v1248_v27, %v1186_v41 }
 0x179   :  { %v1117_v0 = vadd.f32 %v1116_v62, %v1115_v60  ;;  %v1250_v5 = vrot.slane %v1249_v12, 4 }
 0x17b   :  { %v1118_v31 = vrot.slane %v1117_v0, 2  ;;  %v1251_v32 = vadd.f32 %v1250_v5, %v1249_v12 }
 0x17d   :  { %v1119_v34 = vadd.f32 %v1118_v31, %v1117_v0  ;;  %v1252_v33 = vrot.slane %v1251_v32, 2 }
 0x17f   :  { %v1120_v54 = vrot.slane %v1119_v34, 1  ;;  %v1253_v50 = vadd.f32 %v1252_v33, %v1251_v32 }
 0x181   :  { %v1121_v35 = vadd.f32 %v1120_v54, %v1119_v34  ;;  %v1254_v61 = vrot.slane %v1253_v50, 1 }
 0x183   :  { %1122 = vst [vmem:[%s2521_s4] sm:$0x1] %v1121_v35  ;;  %v1255_v59 = vadd.f32 %v1254_v61, %v1253_v50 }
 0x185   :  { %1256 = vst [vmem:[%s2522_s5] sm:$0x1] %v1255_v59 }

// kernel: resnet_below50_block.3
= control target key start
LH: loop header
LB: loop body
LE: loop exit
PB: predicated region body
PF: predicated region fallthrough
CT: control target
= control target key end

     0   :  { %s8694_s15 = smov 0   ;;  %s8696_s16 = smov 0   ;;  %s11468_s0 = inlined_call_operand.vmem [shape: bf16[2,456,128], index: 0, kind: input, shape index: {}]   ;;  %s11469_s1 = inlined_call_operand.vmem [shape: bf16[9,128,128], index: 1, kind: input, shape index: {}]   ;;  %s11470_s2 = inlined_call_operand.vmem [shape: bf16[2,16,16,128], index: 2, kind: output, shape index: {0}]   ;;  %s11471_s3 = inlined_call_operand.vmem [shape: f32[2,1,128], index: 3, kind: output, shape index: {1}]   ;;  %s11472_s4 = inlined_call_operand.vmem [shape: f32[2,1,128], index: 4, kind: output, shape index: {2}]  }
   0x1   :  { %s8698_s17 = smov 0  }
   0x2 LB: > { %s27_s18 = sadd.s32 1, %s8663_s16  ;;  %p6524_p0 = scmp.ge.s32.totalorder %s8667_s17, 1  ;;  %s8667_s17 = sphi %s8698_s17, %s15_s17   ;;  %s8663_s16 = sphi %s8696_s16, %s12039_s16   ;;  %s8659_s15 = sphi %s8694_s15, %s12038_s15  }
   0x3   : > { %p29_p1 = scmp.ge.s32.totalorder %s27_s18, 2  ;;  %p194_p2 = scmp.lt.s32.totalorder %s8667_s17, 3 }
   0x5   : > { %s12041_s18 = smov (%p29_p1, %s27_s18), 0  ;;  %p195_p3 = pnand %p6524_p0, %p194_p2 }
   0x7   : > { %198 = sbr.rel (%p195_p3) target bundleno = 736 (0x2e0), region = 28 }
   0xe   : > { %v8401_v0 = vld [vmem:[%s11469_s1 + $0x40] sm:$0xff]   ;;  %p239_p4 = scmp.lt.s32.totalorder %s8659_s15, 1  ;;  %v8403_v2 = vld [vmem:[%s11469_s1 + $0x48] sm:$0xff]   ;;  %v8405_v4 = vld [vmem:[%s11469_s1 + $0x50] sm:$0xff]   ;;  %vm474_vm0 = vsmask.f32 7424 }
   0xf   : > { %v8402_v1 = vld [vmem:[%s11469_s1 + $0x100] sm:$0xff]   ;;  %7304 = vmatprep.subr.bf16.mxu1 %v8401_v0  ;;  %v8404_v3 = vld [vmem:[%s11469_s1 + $0x108] sm:$0xff]   ;;  %v8406_v5 = vld [vmem:[%s11469_s1 + $0x110] sm:$0xff]   ;;  %vm1286_vm1 = vcmask 1046528  }
  0x10   : > { %7560 = vmatprep.subr.bf16.mxu0 %v8402_v1  ;;  %7305 = vmatpush3.bf16.msra.mxu1 %v8401_v0  ;;  %s12043_s15 = smov (!%p239_p4, %s8659_s15), 1  ;;  %v8407_v6 = vld [vmem:[%s11469_s1 + $0x58] sm:$0xff]   ;;  %v8409_v8 = vld [vmem:[%s11469_s1 + $0x60] sm:$0xff]   ;;  %v8411_v10 = vld [vmem:[%s11469_s1 + $0x68] sm:$0xff]  }
  0x11   : > { %7561 = vmatpush3.bf16.msra.mxu0 %v8402_v1  ;;  %7306 = vmatprep.subr.bf16.mxu1 %v8403_v2  ;;  %v8408_v7 = vld [vmem:[%s11469_s1 + $0x118] sm:$0xff]   ;;  %s8280_s9 = smul.u32 228, %s12043_s15  ;;  %v8410_v9 = vld [vmem:[%s11469_s1 + $0x120] sm:$0xff]   ;;  %v8412_v11 = vld [vmem:[%s11469_s1 + $0x128] sm:$0xff]   ;;  %s261_s14 = scalar_lea.vmem %s11471_s3, %s12043_s15 }
  0x12   : > { %7562 = vmatprep.subr.bf16.mxu0 %v8404_v3  ;;  %v8413_v17 = vld [vmem:[%s11469_s1 + $0x70] sm:$0xff]   ;;  %v8415_v31 = vld [vmem:[%s11469_s1 + $0x78] sm:$0xff]   ;;  %v8422_v46 = vld [vmem:[%s11469_s1] sm:$0xff]   ;;  %s267_s22 = scalar_lea.vmem %s11472_s4, %s12043_s15 }
  0x13   : > { %s8748_s20 = scalar_lea.vmem %s11468_s0, %s8280_s9  ;;  %v8414_v25 = vld [vmem:[%s11469_s1 + $0x130] sm:$0xff]   ;;  %v8416_v40 = vld [vmem:[%s11469_s1 + $0x138] sm:$0xff]   ;;  %v8424_v48 = vld [vmem:[%s11469_s1 + $0x140] sm:$0xff]  }
  0x14   : > { %7307 = vmatpush3.bf16.msra.mxu1 %v8403_v2  ;;  %v269_v12 = vld [vmem:[%s8748_s20] sm:$0xf]  ;;  %v270_v13 = vld [vmem:[%s8748_s20 + $0x4] sm:$0xf]  ;;  %v8418_v15 = vld [vmem:[%s8748_s20 + $0x8] sm:$0xff]  }
  0x15   : > { %7563 = vmatpush3.bf16.msra.mxu0 %v8404_v3  ;;  %7308 = vmatprep.subr.bf16.mxu1 %v8405_v4  ;;  %v8758_v14 = vcombine.low %v269_v12, %v270_v13  ;;  %v8762_v16 = vld [vmem:[%s8748_s20 + $0x14] sm:$0xff]   ;;  %v2211_v18 = vld [vmem:[%s8748_s20 + $0xc] sm:$0xf]  ;;  %v8769_v19 = vld [vmem:[%s8748_s20 + $0x10] sm:$0xf]  ;;  %v483_v22 = vshll.u32 %v8418_v15, 16 }
  0x16   : > { %7564 = vmatprep.subr.bf16.mxu0 %v8406_v5  ;;  %v6674_v23 = vcombine.low %v2211_v18, %v8769_v19  ;;  %v8421_v24 = vld [vmem:[%s8748_s20 + $0x10] sm:$0xff]   ;;  %v2408_v26 = vshll.u32 %v8762_v16, 16  ;;  %v487_v32 = vshrl.u32 %v8418_v15, 16  ;;  %v8783_v34 = vld [vmem:[%s8748_s20 + $0x1c] sm:$0xff]   ;;  %v2412_v38 = vshrl.u32 %v8762_v16, 16  ;;  %v8801_v53 = vld [vmem:[%s8748_s20 + $0x24] sm:$0xff]  }
  0x17   : > { %v476_v20 = vshrl.u32 %v8758_v14, 16  ;;  %v478_v21 = vshll.u32 %v8758_v14, 16  ;;  %v485_v28 = vrot.slane %v483_v22, 1  ;;  %v491_v33 = vshll.u32 %v8421_v24, 16  ;;  %v8426_v49 = vld [vmem:[%s8748_s20 + $0x18] sm:$0xff]   ;;  %v8428_v56 = vld [vmem:[%s8748_s20 + $0x20] sm:$0xff]  }
  0x18   : > { %7309 = vmatpush3.bf16.msra.mxu1 %v8405_v4  ;;  %v2401_v29 = vshrl.u32 %v6674_v23, 16  ;;  %v2403_v30 = vshll.u32 %v6674_v23, 16  ;;  %v2410_v37 = vrot.slane %v2408_v26, 1  ;;  %v2416_v39 = vshll.u32 %v8783_v34, 16  ;;  %v8805_v57 = vld [vmem:[%s8748_s20 + $0x2c] sm:$0xff]   ;;  %v8822_v13 = vld [vmem:[%s8748_s20 + $0x34] sm:$0xff]  }
  0x19   : > { %7565 = vmatpush3.bf16.msra.mxu0 %v8406_v5  ;;  %7310 = vmatprep.subr.bf16.mxu1 %v8407_v6  ;;  %v480_v27 = vrot.slane %v478_v21, 1  ;;  %v495_v43 = vshrl.u32 %v8421_v24, 16  ;;  %v489_v44 = vor.u32 %v487_v32, %v485_v28  ;;  %v493_v45 = vrot.slane %v491_v33, 1  ;;  %v8425_v62 = vld [vmem:[%s11469_s1 + $0x148] sm:$0xff]   ;;  %v8434_v21 = vld [vmem:[%s8748_s20 + $0x30] sm:$0xff]   ;;  %v8827_v22 = vld [vmem:[%s8748_s20 + $0x3c] sm:$0xff]  }
  0x1a   : > { %7566 = vmatprep.subr.bf16.mxu0 %v8408_v7  ;;  %v2405_v36 = vrot.slane %v2403_v30, 1  ;;  %v2420_v50 = vshrl.u32 %v8783_v34, 16  ;;  %v2414_v51 = vor.u32 %v2412_v38, %v2410_v37  ;;  %v2418_v52 = vrot.slane %v2416_v39, 1  ;;  %v8430_v5 = vld [vmem:[%s11469_s1 + $0x8] sm:$0xff]   ;;  %v8431_v23 = vld [vmem:[%s11469_s1 + $0x150] sm:$0xff]   ;;  %v8437_v32 = vld [vmem:[%s8748_s20 + $0x38] sm:$0xff]  }
  0x1b   : > { %v481_v35 = vor.u32 %v480_v27, %v476_v20  ;;  %v497_v54 = vor.u32 %v495_v43, %v493_v45  ;;  %v499_v55 = vshll.u32 %v8426_v49, 16  ;;  %v494_v58 = vsel %vm474_vm0, %v489_v44, %v493_v45 }
  0x1c   : > { %7311 = vmatpush3.bf16.msra.mxu1 %v8407_v6  ;;  %v2406_v42 = vor.u32 %v2405_v36, %v2401_v29  ;;  %v2422_v59 = vor.u32 %v2420_v50, %v2418_v52  ;;  %v2424_v60 = vshll.u32 %v8801_v53, 16  ;;  %v503_v61 = vshrl.u32 %v8426_v49, 16  ;;  %v8853_v49 = vld [vmem:[%s8748_s20 + $0x4c] sm:$0xff]  }
  0x1d   : > { %7567 = vmatpush3.bf16.msra.mxu0 %v8408_v7  ;;  %7312 = vmatprep.subr.bf16.mxu1 %v8409_v8  ;;  %v486_v41 = vsel %vm474_vm0, %v481_v35, %v485_v28  ;;  %v501_v63 = vrot.slane %v499_v55, 1  ;;  %v507_v0 = vshll.u32 %v8428_v56, 16  ;;  %v2428_v1 = vshrl.u32 %v8801_v53, 16 }
  0x1e   : > { %7568 = vmatprep.subr.bf16.mxu0 %v8410_v9  ;;  %7320 = vmatprep.mubr.bf16.mxu1 %v486_v41  ;;  %v2411_v47 = vsel %vm474_vm0, %v2406_v42, %v2410_v37  ;;  %v2432_v2 = vshll.u32 %v8805_v57, 16  ;;  %v2419_v3 = vsel %vm474_vm0, %v2414_v51, %v2418_v52  ;;  %v2426_v4 = vrot.slane %v2424_v60, 1  ;;  %v8436_v37 = vld [vmem:[%s11469_s1 + $0x158] sm:$0xff]   ;;  %v8844_v41 = vld [vmem:[%s8748_s20 + $0x44] sm:$0xff]  }
  0x1f   : > { %7576 = vmatprep.mubr.bf16.mxu0 %v2411_v47  ;;  %v502_v6 = vsel %vm474_vm0, %v497_v54, %v501_v63  ;;  %v509_v7 = vrot.slane %v507_v0, 1  ;;  %v505_v12 = vor.u32 %v503_v61, %v501_v63  ;;  %v2436_v15 = vshrl.u32 %v8805_v57, 16  ;;  %v8439_v42 = vld [vmem:[%s8748_s20 + $0x40] sm:$0xff]   ;;  %v8443_v63 = vld [vmem:[%s11469_s1 + $0x168] sm:$0xff]  }
  0x20   : > { %7313 = vmatpush3.bf16.msra.mxu1 %v8409_v8  ;;  %v2434_v8 = vrot.slane %v2432_v2, 1  ;;  %v523_v28 = vshll.u32 %v8434_v21, 16  ;;  %v2448_v29 = vshll.u32 %v8827_v22, 16  ;;  %v2444_v36 = vshrl.u32 %v8822_v13, 16  ;;  %v8442_v60 = vld [vmem:[%s11469_s1 + $0x160] sm:$0xff]   ;;  %v8444_v2 = vld [vmem:[%s8748_s20 + $0x48] sm:$0xff]  }
  0x21   : > { %7569 = vmatpush3.bf16.msra.mxu0 %v8410_v9  ;;  %7314 = vmatprep.subr.bf16.mxu1 %v8411_v10  ;;  %v2427_v9 = vsel %vm474_vm0, %v2422_v59, %v2426_v4  ;;  %v510_v30 = vsel %vm474_vm0, %v505_v12, %v509_v7  ;;  %v527_v39 = vshrl.u32 %v8434_v21, 16  ;;  %v2452_v44 = vshrl.u32 %v8827_v22, 16 }
  0x22   : > { %7570 = vmatprep.subr.bf16.mxu0 %v8412_v11  ;;  %v2438_v24 = vor.u32 %v2436_v15, %v2434_v8  ;;  %v525_v43 = vrot.slane %v523_v28, 1  ;;  %v2456_v47 = vshll.u32 %v8844_v41, 16  ;;  %v535_v54 = vshrl.u32 %v8437_v32, 16  ;;  %v8875_v15 = vld [vmem:[%s8748_s20 + $0x5c] sm:$0xff]  }
  0x23   : > { %v2464_v59 = vshll.u32 %v8853_v49, 16 }
  0x24   : > { %7315 = vmatpush3.bf16.msra.mxu1 %v8411_v10  ;;  %v8432_v10 = vld [vmem:[%s8748_s20 + $0x28] sm:$0xff]   ;;  %v529_v51 = vor.u32 %v527_v39, %v525_v43 }
  0x25   : > { %7571 = vmatpush3.bf16.msra.mxu0 %v8412_v11  ;;  %7316 = vmatprep.subr.bf16.mxu1 %v8413_v17  ;;  %v511_v11 = vshrl.u32 %v8428_v56, 16  ;;  %v515_v20 = vshll.u32 %v8432_v10, 16  ;;  %v519_v27 = vshrl.u32 %v8432_v10, 16  ;;  %v2458_v56 = vrot.slane %v2456_v47, 1  ;;  %v8446_v10 = vld [vmem:[%s8748_s20 + $0x50] sm:$0xff]   ;;  %v8454_v47 = vld [vmem:[%s11469_s1 + $0x178] sm:$0xff]  }
  0x26   : > { %7572 = vmatprep.subr.bf16.mxu0 %v8414_v25  ;;  %v555_v21 = vshll.u32 %v8446_v10, 16 }
  0x27   : > { %v513_v18 = vor.u32 %v511_v11, %v509_v7  ;;  %v517_v26 = vrot.slane %v515_v20, 1 }
  0x28   : > { %7317 = vmatpush3.bf16.msra.mxu1 %v8413_v17  ;;  %v2430_v17 = vor.u32 %v2428_v1, %v2426_v4 }
  0x29   : > { %7573 = vmatpush3.bf16.msra.mxu0 %v8414_v25  ;;  %7318 = vmatprep.subr.bf16.mxu1 %v8415_v31  ;;  %v2440_v25 = vshll.u32 %v8822_v13, 16  ;;  %v518_v35 = vsel %vm474_vm0, %v513_v18, %v517_v26  ;;  %v521_v45 = vor.u32 %v519_v27, %v517_v26  ;;  %v8449_v26 = vld [vmem:[%s11469_s1 + $0x170] sm:$0xff]   ;;  %v551_v27 = vshrl.u32 %v8444_v2, 16 }
  0x2a   : > { %7574 = vmatprep.subr.bf16.mxu0 %v8416_v40  ;;  %v2435_v33 = vsel %vm474_vm0, %v2430_v17, %v2434_v8  ;;  %v2466_v8 = vrot.slane %v2464_v59, 1  ;;  %v2941_v59 = vld [vmem:[%s8748_s20 + $0xc] sm:$0xe] }
  0x2b   : > { %v526_v61 = vsel %vm474_vm0, %v521_v45, %v525_v43  ;;  %v8899_v43 = vld [vmem:[%s8748_s20 + $0x60] sm:$0xff]  }
  0x2c   : > { %7319 = vmatpush3.bf16.msra.mxu1 %v8415_v31  ;;  %v2442_v31 = vrot.slane %v2440_v25, 1 }
  0x2d   : > { %7575 = vmatpush3.bf16.msra.mxu0 %v8416_v40  ;;  %7368 = vmatprep.subr.bf16.mxu1 %v8422_v46  ;;  %v531_v40 = vshll.u32 %v8437_v32, 16 }
  0x2e   : > { %7624 = vmatprep.subr.bf16.mxu0 %v8424_v48  ;;  %v2443_v38 = vsel %vm474_vm0, %v2438_v24, %v2442_v31  ;;  %v2446_v50 = vor.u32 %v2444_v36, %v2442_v31  ;;  %v8887_v31 = vld [vmem:[%s8748_s20 + $0x58] sm:$0xff]   ;;  %v8892_v36 = vld [vmem:[%s8748_s20 + $0x64] sm:$0xff]  }
  0x2f   : > { %7321 = vmatmul.mubr.bf16.vlgmr.msra.gmra.mrb[0].mxu1 %v494_v58  ;;  %v533_v52 = vrot.slane %v531_v40, 1  ;;  %v539_v58 = vshll.u32 %v8439_v42, 16  ;;  %v563_v39 = vshll.u32 %v8887_v31, 16  ;;  %v2484_v40 = vshrl.u32 %v8875_v15, 16 }
  0x30   : > { %7577 = vmatmul.mubr.bf16.vlgmr.msra.gmra.mrb[0].mxu0 %v2419_v3  ;;  %7369 = vmatpush3.bf16.msra.mxu1 %v8422_v46  ;;  %v2450_v46 = vrot.slane %v2448_v29, 1  ;;  %v543_v3 = vshrl.u32 %v8439_v42, 16  ;;  %v2488_v42 = vshll.u32 %v8892_v36, 16 }
  0x31   : > { %7625 = vmatpush3.bf16.msra.mxu0 %v8424_v48  ;;  %7324 = vmatprep.mubr.bf16.mxu1 %v502_v6  ;;  %v8440_v48 = vld [vmem:[%s11469_s1 + $0x10] sm:$0xff]   ;;  %v534_v1 = vsel %vm474_vm0, %v529_v51, %v533_v52  ;;  %v2468_v6 = vshrl.u32 %v8853_v49, 16  ;;  %v541_v7 = vrot.slane %v539_v58, 1  ;;  %v537_v11 = vor.u32 %v535_v54, %v533_v52  ;;  %v8908_v52 = vld [vmem:[%s8748_s20 + $0x68] sm:$0xff]  }
  0x32   : > { %7626 = vmatprep.subr.bf16.mxu0 %v8425_v62  ;;  %7580 = vmatprep.mubr.bf16.mxu0 %v2427_v9  ;;  %v2454_v55 = vor.u32 %v2452_v44, %v2450_v46  ;;  %v2451_v0 = vsel %vm474_vm0, %v2446_v50, %v2450_v46  ;;  %v547_v9 = vshll.u32 %v8444_v2, 16  ;;  %v8902_v46 = vld [vmem:[%s8748_s20 + $0x6c] sm:$0xff]   ;;  %v565_v51 = vrot.slane %v563_v39, 1 }
  0x33   : > { %7370 = vmatprep.subr.bf16.mxu1 %v8430_v5  ;;  %v545_v18 = vor.u32 %v543_v3, %v541_v7  ;;  %v2470_v24 = vor.u32 %v2468_v6, %v2466_v8  ;;  %v542_v29 = vsel %vm474_vm0, %v537_v11, %v541_v7  ;;  %v571_v58 = vshll.u32 %v8899_v43, 16  ;;  %v8459_v7 = vld [vmem:[%s11469_s1 + $0x180] sm:$0xff]  }
  0x34   : > { %7371 = vmatpush3.bf16.msra.mxu1 %v8430_v5  ;;  %v2459_v4 = vsel %vm474_vm0, %v2454_v55, %v2458_v56  ;;  %v8869_v5 = vld [vmem:[%s8748_s20 + $0x54] sm:$0xff]   ;;  %v549_v20 = vrot.slane %v547_v9, 1  ;;  %v2490_v55 = vrot.slane %v2488_v42, 1  ;;  %v575_v2 = vshrl.u32 %v8899_v43, 16 }
  0x35   : > { %7627 = vmatpush3.bf16.msra.mxu0 %v8425_v62  ;;  %7372 = vmatprep.subr.bf16.mxu1 %v8440_v48  ;;  %v2460_v62 = vshrl.u32 %v8844_v41, 16  ;;  %v2472_v12 = vshll.u32 %v8869_v5, 16  ;;  %v2476_v28 = vshrl.u32 %v8869_v5, 16  ;;  %v579_v3 = vshll.u32 %v8908_v52, 16  ;;  %v8929_v9 = vld [vmem:[%s8748_s20 + $0x70] sm:$0xff]  }
  0x36   : > { %7628 = vmatprep.subr.bf16.mxu0 %v8431_v23  ;;  %v553_v44 = vor.u32 %v551_v27, %v549_v20  ;;  %v6723_v6 = vcombine.low %v2941_v59, %v8769_v19  ;;  %v8934_v19 = vld [vmem:[%s8748_s20 + $0x78] sm:$0xff]   ;;  %v8468_v42 = vld [vmem:[%s11469_s1 + $0x30] sm:$0xff]  }
  0x37   : > { %7325 = vmatmul.mubr.bf16.gmra.mrb[4].mxu1 %v510_v30  ;;  %v2462_v17 = vor.u32 %v2460_v62, %v2458_v56  ;;  %v2474_v25 = vrot.slane %v2472_v12, 1  ;;  %v2480_v30 = vshll.u32 %v8875_v15, 16  ;;  %v567_v56 = vshrl.u32 %v8887_v31, 16  ;;  %v8975_v59 = vld [vmem:[%s8748_s20 + $0x90] sm:$0xff]  }
  0x38   : > { %7581 = vmatmul.mubr.bf16.gmra.mrb[4].mxu0 %v2435_v33  ;;  %7328 = vmatprep.mubr.bf16.mxu1 %v518_v35  ;;  %v550_v33 = vsel %vm474_vm0, %v545_v18, %v549_v20  ;;  %v559_v35 = vshrl.u32 %v8446_v10, 16  ;;  %v2492_v62 = vshrl.u32 %v8892_v36, 16  ;;  %v581_v18 = vrot.slane %v579_v3, 1  ;;  %v8462_v20 = vld [vmem:[%s11469_s1 + $0x28] sm:$0xff]   ;;  %v8988_v3 = vld [vmem:[%s11469_s1 + $0x80] sm:$0xff]  }
  0x39   : > { %7629 = vmatpush3.bf16.msra.mxu0 %v8431_v23  ;;  %7584 = vmatprep.mubr.bf16.mxu0 %v2443_v38  ;;  %v8448_v23 = vld [vmem:[%s11469_s1 + $0x18] sm:$0xff]   ;;  %v2467_v32 = vsel %vm474_vm0, %v2462_v17, %v2466_v8  ;;  %v557_v38 = vrot.slane %v555_v21, 1  ;;  %v2482_v45 = vrot.slane %v2480_v30, 1  ;;  %v573_v8 = vrot.slane %v571_v58, 1 }
  0x3a   : > { %7630 = vmatprep.subr.bf16.mxu0 %v8436_v37  ;;  %7373 = vmatpush3.bf16.msra.mxu1 %v8440_v48  ;;  %v2478_v48 = vor.u32 %v2476_v28, %v2474_v25  ;;  %v569_v10 = vor.u32 %v567_v56, %v565_v51  ;;  %v2494_v11 = vor.u32 %v2492_v62, %v2490_v55  ;;  %v2962_v21 = vrot.slane %v6723_v6, 1  ;;  %v8472_v56 = vld [vmem:[%s11469_s1 + $0x38] sm:$0xff]  }
  0x3b   : > { %7374 = vmatprep.subr.bf16.mxu1 %v8448_v23  ;;  %v561_v50 = vor.u32 %v559_v35, %v557_v38  ;;  %v2486_v54 = vor.u32 %v2484_v40, %v2482_v45  ;;  %v577_v17 = vor.u32 %v575_v2, %v573_v8  ;;  %v595_v30 = vshll.u32 %v8934_v19, 16  ;;  %v8954_v40 = vld [vmem:[%s8748_s20 + $0x88] sm:$0xff]   ;;  %v8469_v2 = vld [vmem:[%s11469_s1 + $0x190] sm:$0xff]  }
  0x3c   : > { %v615_v6 = vshrl.u32 %v8954_v40, 16 }
  0x3d   : > { %7631 = vmatpush3.bf16.msra.mxu0 %v8436_v37  ;;  %v2475_v37 = vsel %vm474_vm0, %v2470_v24, %v2474_v25  ;;  %v587_v24 = vshll.u32 %v8929_v9, 16  ;;  %v574_v25 = vsel %vm474_vm0, %v569_v10, %v573_v8  ;;  %v582_v28 = vsel %vm474_vm0, %v577_v17, %v581_v18  ;;  %v8473_v17 = vld [vmem:[%s11469_s1 + $0x198] sm:$0xff]  }
  0x3e   : > { %7632 = vmatprep.subr.bf16.mxu0 %v8442_v60  ;;  %7375 = vmatpush3.bf16.msra.mxu1 %v8448_v23  ;;  %v2963_v23 = vrot.slane %v8762_v16, 1  ;;  %v597_v39 = vrot.slane %v595_v30, 1  ;;  %v623_v8 = vshrl.u32 %v8975_v59, 16 }
  0x3f   : > { %7329 = vmatmul.mubr.bf16.gmra.mrb[8].mxu1 %v526_v61  ;;  %v558_v61 = vsel %vm474_vm0, %v553_v44, %v557_v38  ;;  %v2967_v44 = vrot.slane %v8801_v53, 1  ;;  %v611_v53 = vshll.u32 %v8954_v40, 16 }
  0x40   : > { %7585 = vmatmul.mubr.bf16.gmra.mrb[8].mxu0 %v2451_v0  ;;  %7332 = vmatprep.mubr.bf16.mxu1 %v534_v1  ;;  %v2483_v0 = vsel %vm474_vm0, %v2478_v48, %v2482_v45  ;;  %v566_v1 = vsel %vm474_vm0, %v561_v50, %v565_v51  ;;  %v2964_v16 = vsel %vm1286_vm1, %v2962_v21, %v2963_v23  ;;  %v599_v48 = vshrl.u32 %v8934_v19, 16 }
  0x41   : > { %7588 = vmatprep.mubr.bf16.mxu0 %v2459_v4  ;;  %7633 = vmatpush3.bf16.msra.mxu0 %v8442_v60  ;;  %v8458_v60 = vld [vmem:[%s11469_s1 + $0x20] sm:$0xff]   ;;  %v2491_v4 = vsel %vm474_vm0, %v2486_v54, %v2490_v55 }
  0x42   : > { %7634 = vmatprep.subr.bf16.mxu0 %v8443_v63  ;;  %7376 = vmatprep.subr.bf16.mxu1 %v8458_v60 }
  0x43   : > { %7377 = vmatpush3.bf16.msra.mxu1 %v8458_v60  ;;  %v601_v60 = vor.u32 %v599_v48, %v597_v39 }
  0x44   : > { %7378 = vmatprep.subr.bf16.mxu1 %v8462_v20 }
  0x45   : > { %7635 = vmatpush3.bf16.msra.mxu0 %v8443_v63  ;;  %v2496_v63 = vshll.u32 %v8902_v46, 16 }
  0x46   : > { %7636 = vmatprep.subr.bf16.mxu0 %v8449_v26 }
  0x47   : > { %7333 = vmatmul.mubr.bf16.gmra.mrb[12].mxu1 %v542_v29  ;;  %v8931_v12 = vrot.slane %v2496_v63, 1  ;;  %v591_v29 = vshrl.u32 %v8929_v9, 16  ;;  %v613_v63 = vrot.slane %v611_v53, 1 }
  0x48   : > { %7589 = vmatmul.mubr.bf16.gmra.mrb[12].mxu0 %v2467_v32  ;;  %7336 = vmatprep.mubr.bf16.mxu1 %v550_v33  ;;  %v589_v32 = vrot.slane %v587_v24, 1  ;;  %v8950_v33 = vld [vmem:[%s8748_s20 + $0x80] sm:$0xff]  }
  0x49   : > { %7592 = vmatprep.mubr.bf16.mxu0 %v2475_v37  ;;  %7637 = vmatpush3.bf16.msra.mxu0 %v8449_v26  ;;  %v583_v26 = vshrl.u32 %v8908_v52, 16  ;;  %v2499_v27 = vsel %vm474_vm0, %v2494_v11, %v8931_v12  ;;  %v2965_v37 = vrot.slane %v8783_v34, 1  ;;  %v603_v45 = vshll.u32 %v8950_v33, 16  ;;  %v8463_v34 = vld [vmem:[%s11469_s1 + $0x188] sm:$0xff]  }
  0x4a   : > { %7638 = vmatprep.subr.bf16.mxu0 %v8454_v47  ;;  %7379 = vmatpush3.bf16.msra.mxu1 %v8462_v20  ;;  %v593_v38 = vor.u32 %v591_v29, %v589_v32  ;;  %v607_v54 = vshrl.u32 %v8950_v33, 16  ;;  %v9003_v20 = vld [vmem:[%s8748_s20 + $0xa0] sm:$0xff]   ;;  %v617_v21 = vor.u32 %v615_v6, %v613_v63  ;;  %v2983_v6 = vrot.slane %v8892_v36, 1 }
  0x4b   : > { %v585_v35 = vor.u32 %v583_v26, %v581_v18  ;;  %7380 = vmatprep.subr.bf16.mxu1 %v8468_v42  ;;  %v2966_v50 = vsel %vm1286_vm1, %v2963_v23, %v2965_v37  ;;  %v2968_v55 = vsel %vm1286_vm1, %v2965_v37, %v2967_v44  ;;  %v605_v58 = vrot.slane %v603_v45, 1  ;;  %v9007_v26 = vld [vmem:[%s8748_s20 + $0xa8] sm:$0xff]  }
  0x4c   : > { %v598_v51 = vsel %vm474_vm0, %v593_v38, %v597_v39  ;;  %v2973_v23 = vrot.slane %v8827_v22, 1  ;;  %v635_v29 = vshll.u32 %v9003_v20, 16  ;;  %v8483_v38 = vld [vmem:[%s11469_s1 + $0x1a8] sm:$0xff]   ;;  %v2977_v45 = vrot.slane %v8853_v49, 1 }
  0x4d   : > { %7639 = vmatpush3.bf16.msra.mxu0 %v8454_v47  ;;  %v590_v47 = vsel %vm474_vm0, %v585_v35, %v589_v32  ;;  %v609_v62 = vor.u32 %v607_v54, %v605_v58  ;;  %v639_v35 = vshrl.u32 %v9003_v20, 16  ;;  %v647_v49 = vshrl.u32 %v9007_v26, 16 }
  0x4e   : > { %7688 = vmatprep.subr.bf16.mxu0 %v8459_v7  ;;  %7381 = vmatpush3.bf16.msra.mxu1 %v8468_v42  ;;  %v637_v39 = vrot.slane %v635_v29, 1  ;;  %v9025_v42 = vld [vmem:[%s8748_s20 + $0xb0] sm:$0xff]  }
  0x4f   : > { %7337 = vmatmul.mubr.bf16.gmra.mrb[16].mxu1 %v558_v61  ;;  %v2969_v61 = vrot.slane %v8805_v57, 1  ;;  %7382 = vmatprep.subr.bf16.mxu1 %v8472_v56  ;;  %v619_v57 = vshll.u32 %v8975_v59, 16  ;;  %v651_v54 = vshll.u32 %v9025_v42, 16 }
  0x50   : > { %7593 = vmatmul.mubr.bf16.gmra.mrb[16].mxu0 %v2483_v0  ;;  %7340 = vmatprep.mubr.bf16.mxu1 %v566_v1  ;;  %v8979_v0 = vld [vmem:[%s8748_s20 + $0x98] sm:$0xff]   ;;  %v2971_v1 = vrot.slane %v8822_v13, 1 }
  0x51   : > { %7596 = vmatprep.mubr.bf16.mxu0 %v2491_v4  ;;  %v606_v4 = vsel %vm474_vm0, %v601_v60, %v605_v58  ;;  %v2970_v13 = vsel %vm1286_vm1, %v2967_v44, %v2969_v61  ;;  %v627_v10 = vshll.u32 %v8979_v0, 16  ;;  %v621_v18 = vrot.slane %v619_v57, 1 }
  0x52   : > { %7383 = vmatpush3.bf16.msra.mxu1 %v8472_v56  ;;  %v2972_v11 = vsel %vm1286_vm1, %v2969_v61, %v2971_v1  ;;  %v631_v22 = vshrl.u32 %v8979_v0, 16  ;;  %v655_v58 = vshrl.u32 %v9025_v42, 16  ;;  %v8475_v61 = vld [vmem:[%s8748_s20 + $0xc0] ss:$0 sps:$4 sm:$0x11]  }
  0x53   : > { %7432 = vmatprep.subr.bf16.mxu1 %v8988_v3  ;;  %v625_v24 = vor.u32 %v623_v8, %v621_v18  ;;  %v622_v30 = vsel %vm474_vm0, %v617_v21, %v621_v18 }
  0x57   : > { %7341 = vmatmul.mubr.bf16.gmra.mrb[20].mxu1 %v574_v25  ;;  %v629_v25 = vrot.slane %v627_v10, 1  ;;  %v667_v10 = vshll.u32 %v8475_v61, 16  ;;  %v8490_v61 = vld [vmem:[%s8748_s20 + $0xb4] sm:$0xff]  }
  0x58   : > { %7597 = vmatmul.mubr.bf16.gmra.mrb[20].mxu0 %v2499_v27  ;;  %7344 = vmatprep.mubr.bf16.mxu1 %v582_v28  ;;  %v2975_v27 = vrot.slane %v8844_v41, 1  ;;  %v8479_v28 = vld [vmem:[%s11469_s1 + $0x1a0] sm:$0xff]   ;;  %v643_v41 = vshll.u32 %v9007_v26, 16 }
  0x59   : > { %7640 = vmatprep.mubr.bf16.mxu0 %v2964_v16  ;;  %v2974_v16 = vsel %vm1286_vm1, %v2971_v1, %v2973_v23  ;;  %v630_v32 = vsel %vm474_vm0, %v625_v24, %v629_v25  ;;  %v633_v44 = vor.u32 %v631_v22, %v629_v25  ;;  %v669_v21 = vrot.slane %v667_v10, 1  ;;  %v8494_v10 = vld [vmem:[%s8748_s20 + $0xc4] sm:$0xff]  }
  0x5a   : > { %v2976_v37 = vsel %vm1286_vm1, %v2973_v23, %v2975_v27  ;;  %v645_v48 = vrot.slane %v643_v41, 1  ;;  %v2985_v23 = vrot.slane %v8902_v46, 1  ;;  %v8481_v46 = vld [vmem:[%s8748_s20 + $0x8c] sm:$0xff]  }
  0x5b   : > { %v638_v53 = vsel %vm474_vm0, %v633_v44, %v637_v39  ;;  %v8487_v44 = vld [vmem:[%s11469_s1 + $0x90] sm:$0xff]  }
  0x5c   : > { %v649_v1 = vor.u32 %v647_v49, %v645_v48 }
  0x5f   : > { %7345 = vmatmul.mubr.bf16.gmra.mrb[24].mxu1 %v590_v47  ;;  %v641_v47 = vor.u32 %v639_v35, %v637_v39  ;;  %v8482_v35 = vld [vmem:[%s11469_s1 + $0x88] sm:$0xff]   ;;  %v2993_v39 = vrot.slane %v8481_v46, 1 }
  0x60   : > { %7641 = vmatmul.mubr.bf16.vlgmr.msra.gmra.mrb[0].mxu0 %v2966_v50  ;;  %7348 = vmatprep.mubr.bf16.mxu1 %v598_v51  ;;  %v2979_v50 = vrot.slane %v8869_v5, 1  ;;  %v8489_v51 = vld [vmem:[%s11469_s1 + $0x1b0] sm:$0xff]   ;;  %v8500_v46 = vld [vmem:[%s8748_s20 + $0x28] sm:$0xff]  }
  0x61   : > { %7689 = vmatpush3.bf16.msra.mxu0 %v8459_v7  ;;  %7644 = vmatprep.mubr.bf16.mxu0 %v2968_v55  ;;  %v614_v7 = vsel %vm474_vm0, %v609_v62, %v613_v63  ;;  %v2978_v55 = vsel %vm1286_vm1, %v2975_v27, %v2977_v45  ;;  %v646_v56 = vsel %vm474_vm0, %v641_v47, %v645_v48  ;;  %v8493_v62 = vld [vmem:[%s11469_s1 + $0x1b8] sm:$0xff]   ;;  %v653_v63 = vrot.slane %v651_v54, 1 }
  0x62   : > { %7690 = vmatprep.subr.bf16.mxu0 %v8463_v34  ;;  %v2980_v5 = vsel %vm1286_vm1, %v2977_v45, %v2979_v50  ;;  %v2986_v27 = vsel %vm1286_vm1, %v2983_v6, %v2985_v23  ;;  %v8485_v47 = vld [vmem:[%s8748_s20 + $0x9c] sm:$0xff]  }
  0x63   : > { %v657_v57 = vor.u32 %v655_v58, %v653_v63  ;;  %v9095_v54 = vld [vmem:[%s8748_s20 + $0x18] sm:$0xff]   ;;  %v2997_v49 = vrot.slane %v8485_v47, 1  ;;  %v8514_v47 = vld [vmem:[%s8748_s20 + $0x68] sm:$0xff]  }
  0x65   : > { %7691 = vmatpush3.bf16.msra.mxu0 %v8463_v34  ;;  %v9029_v34 = vld [vmem:[%s8748_s20 + $0xb8] sm:$0xff]  }
  0x66   : > { %7692 = vmatprep.subr.bf16.mxu0 %v8469_v2  ;;  %v659_v60 = vshll.u32 %v9029_v34, 16  ;;  %v663_v8 = vshrl.u32 %v9029_v34, 16 }
  0x67   : > { %7349 = vmatmul.mubr.bf16.gmra.mrb[28].mxu1 %v606_v4 }
  0x68   : > { %7645 = vmatmul.mubr.bf16.gmra.mrb[4].mxu0 %v2970_v13  ;;  %7352 = vmatprep.mubr.bf16.mxu1 %v614_v7  ;;  %v661_v4 = vrot.slane %v659_v60, 1  ;;  %v9052_v13 = vld [vmem:[%s11469_s1 + $0x1c0] sm:$0xff]   ;;  %v654_v7 = vsel %vm474_vm0, %v649_v1, %v653_v63  ;;  %v8488_v60 = vld [vmem:[%s8748_s20 + $0xac] sm:$0xff]  }
  0x69   : > { %7648 = vmatprep.mubr.bf16.mxu0 %v2972_v11  ;;  %7693 = vmatpush3.bf16.msra.mxu0 %v8469_v2  ;;  %v2981_v2 = vrot.slane %v8875_v15, 1  ;;  %v9113_v63 = vld [vmem:[%s8748_s20 + $0x28] sm:$0xff]   ;;  %v9117_v1 = vld [vmem:[%s8748_s20 + $0x30] sm:$0xff]  }
  0x6a   : > { %7694 = vmatprep.subr.bf16.mxu0 %v8473_v17  ;;  %v662_v15 = vsel %vm474_vm0, %v657_v57, %v661_v4  ;;  %v665_v18 = vor.u32 %v663_v8, %v661_v4  ;;  %v3003_v57 = vrot.slane %v8490_v61, 1  ;;  %v8507_v4 = vld [vmem:[%s11469_s1 + $0xb0] sm:$0xff]  }
  0x6b   : > { %v2982_v11 = vsel %vm1286_vm1, %v2979_v50, %v2981_v2  ;;  %v2984_v36 = vsel %vm1286_vm1, %v2981_v2, %v2983_v6  ;;  %v8486_v50 = vld [vmem:[%s8748_s20 + $0xa4] sm:$0xff]   ;;  %v3001_v2 = vrot.slane %v8488_v60, 1  ;;  %v8522_v61 = vld [vmem:[%s8748_s20 + $0x90] sm:$0xff]  }
  0x6c   : > { %v670_v25 = vsel %vm474_vm0, %v665_v18, %v669_v21  ;;  %v3007_v18 = vrot.slane %v8494_v10, 1  ;;  %v9141_v21 = vld [vmem:[%s11469_s1 + $0xc0] sm:$0xff]   ;;  %v8523_v60 = vld [vmem:[%s11469_s1 + $0xc8] sm:$0xff]  }
  0x6d   : > { %7695 = vmatpush3.bf16.msra.mxu0 %v8473_v17  ;;  %v8476_v17 = vld [vmem:[%s8748_s20 + $0x74] sm:$0xff]   ;;  %v3004_v8 = vsel %vm1286_vm1, %v3001_v2, %v3003_v57  ;;  %v8527_v10 = vld [vmem:[%s8748_s20 + $0xa8] sm:$0xff]  }
  0x6e   : > { %7696 = vmatprep.subr.bf16.mxu0 %v8479_v28  ;;  %v2987_v24 = vrot.slane %v8476_v17, 1 }
  0x6f   : > { %7353 = vmatmul.mubr.bf16.gmra.mrb[32].mxu1 %v622_v30  ;;  %v8480_v30 = vld [vmem:[%s8748_s20 + $0x84] sm:$0xff]  }
  0x70   : > { %7649 = vmatmul.mubr.bf16.gmra.mrb[8].mxu0 %v2974_v16  ;;  %7356 = vmatprep.mubr.bf16.mxu1 %v630_v32  ;;  %v2988_v29 = vsel %vm1286_vm1, %v2985_v23, %v2987_v24  ;;  %v2991_v16 = vrot.slane %v8480_v30, 1  ;;  %v8495_v23 = vld [vmem:[%s8748_s20 + $0xcc] ss:$0 sps:$4 sm:$0x11]  }
  0x71   : > { %7652 = vmatprep.mubr.bf16.mxu0 %v2976_v37  ;;  %7697 = vmatpush3.bf16.msra.mxu0 %v8479_v28  ;;  %v8478_v28 = vld [vmem:[%s8748_s20 + $0x7c] sm:$0xff]   ;;  %v8484_v37 = vld [vmem:[%s8748_s20 + $0x94] sm:$0xff]  }
  0x72   : > { %7698 = vmatprep.subr.bf16.mxu0 %v8483_v38  ;;  %v2989_v22 = vrot.slane %v8478_v28, 1  ;;  %v2995_v45 = vrot.slane %v8484_v37, 1  ;;  %v2994_v48 = vsel %vm1286_vm1, %v2991_v16, %v2993_v39  ;;  %v9152_v28 = vld [vmem:[%s8748_s20 + $0x50] sm:$0xff]   ;;  %v8524_v37 = vld [vmem:[%s11469_s1 + $0x1e8] sm:$0xff]  }
  0x74   : > { %v2990_v32 = vsel %vm1286_vm1, %v2987_v24, %v2989_v22  ;;  %v2992_v41 = vsel %vm1286_vm1, %v2989_v22, %v2991_v16  ;;  %v2998_v58 = vsel %vm1286_vm1, %v2995_v45, %v2997_v49  ;;  %v8496_v22 = vld [vmem:[%s8748_s20 + $0x18] sm:$0xff]   ;;  %v8498_v16 = vld [vmem:[%s8748_s20 + $0x20] sm:$0xff]  }
  0x75   : > { %7699 = vmatpush3.bf16.msra.mxu0 %v8483_v38  ;;  %v9076_v38 = vld [vmem:[%s8748_s20 + $0x8] sm:$0xff]  }
  0x76   : > { %7700 = vmatprep.subr.bf16.mxu0 %v8489_v51 }
  0x77   : > { %7357 = vmatmul.mubr.bf16.gmra.mrb[36].mxu1 %v638_v53  ;;  %v9099_v53 = vld [vmem:[%s8748_s20 + $0x20] sm:$0xff]  }
  0x78   : > { %7653 = vmatmul.mubr.bf16.gmra.mrb[12].mxu0 %v2978_v55  ;;  %7360 = vmatprep.mubr.bf16.mxu1 %v646_v56  ;;  %v2999_v55 = vrot.slane %v8486_v50, 1  ;;  %v8497_v56 = vld [vmem:[%s11469_s1 + $0xa0] sm:$0xff]  }
  0x79   : > { %7656 = vmatprep.mubr.bf16.mxu0 %v2980_v5  ;;  %7701 = vmatpush3.bf16.msra.mxu0 %v8489_v51  ;;  %v8492_v51 = vld [vmem:[%s11469_s1 + $0x98] sm:$0xff]  }
  0x7a   : > { %7702 = vmatprep.subr.bf16.mxu0 %v8493_v62  ;;  %v3000_v5 = vsel %vm1286_vm1, %v2997_v49, %v2999_v55  ;;  %v3002_v6 = vsel %vm1286_vm1, %v2999_v55, %v3001_v2  ;;  %v8517_v49 = vld [vmem:[%s8748_s20 + $0x78] sm:$0xff]  }
  0x7b   : > { %v8525_v2 = vld [vmem:[%s8748_s20 + $0x98] sm:$0xff]  }
  0x7d   : > { %7703 = vmatpush3.bf16.msra.mxu0 %v8493_v62  ;;  %v8502_v62 = vld [vmem:[%s11469_s1 + $0xa8] sm:$0xff]  }
  0x7e   : > { %7752 = vmatprep.subr.bf16.mxu0 %v9052_v13 }
  0x7f   : > { %7361 = vmatmul.mubr.bf16.gmra.mrb[40].mxu1 %v654_v7  ;;  %v8491_v7 = vld [vmem:[%s8748_s20 + $0xbc] sm:$0xff]  }
  0x80   : > { %7657 = vmatmul.mubr.bf16.gmra.mrb[16].mxu0 %v2982_v11  ;;  %7364 = vmatprep.mubr.bf16.mxu1 %v662_v15  ;;  %v8512_v11 = vld [vmem:[%s11469_s1 + $0xb8] sm:$0xff]   ;;  %v3005_v17 = vrot.slane %v8491_v7, 1  ;;  %v8526_v7 = vld [vmem:[%s8748_s20 + $0xa0] sm:$0xff]  }
  0x81   : > { %7660 = vmatprep.mubr.bf16.mxu0 %v2984_v36  ;;  %v9131_v15 = vld [vmem:[%s8748_s20 + $0x38] sm:$0xff]   ;;  %v9135_v36 = vld [vmem:[%s8748_s20 + $0x40] sm:$0xff]  }
  0x82   : > { %v3006_v24 = vsel %vm1286_vm1, %v3003_v57, %v3005_v17  ;;  %v1300_v57 = vrot.slane %v9131_v15, 1 }
  0x87   : > { %7365 = vmatmul.mubr.bf16.gmra.mrb[44].mxu1 %v670_v25  ;;  %v3008_v25 = vsel %vm1286_vm1, %v3005_v17, %v3007_v18  ;;  %v8549_v17 = vld [vmem:[%s11469_s1 + $0xf0] sm:$0xff]  }
  0x88   : > { %7661 = vmatmul.mubr.bf16.gmra.mrb[20].mxu0 %v2986_v27  ;;  %7384 = vmatprep.mubr.bf16.mxu1 %v8758_v14  ;;  %v9081_v14 = vld [vmem:[%s8748_s20 + $0x10] sm:$0xff]   ;;  %v9148_v27 = vld [vmem:[%s8748_s20 + $0x48] sm:$0xff]  }
  0x89   : > { %7664 = vmatprep.mubr.bf16.mxu0 %v2988_v29  ;;  %v3009_v29 = vrot.slane %v8495_v23, 1  ;;  %v1290_v55 = vrot.slane %v9081_v14, 1 }
  0x8b   : > { %v3010_v30 = vsel %vm1286_vm1, %v3007_v18, %v3009_v29  ;;  %v3886_v18 = vld [vmem:[%s8748_s20 + $0x18] sm:$0xf] }
  0x8c   : > { %v8554_v29 = vld [vmem:[%s11469_s1 + $0xf8] sm:$0xff]  }
  0x8f   : > { %7385 = vmatmul.mubr.bf16.vlgmr.msra.gmra.mrb[0].mxu1 %v9076_v38 }
  0x90   : > { %7665 = vmatmul.mubr.bf16.gmra.mrb[24].mxu0 %v2990_v32  ;;  %7433 = vmatpush3.bf16.msra.mxu1 %v8988_v3  ;;  %v2996_v3 = vsel %vm1286_vm1, %v2993_v39, %v2995_v45  ;;  %v8503_v32 = vld [vmem:[%s11469_s1 + $0x1c8] sm:$0xff]   ;;  %v8510_v39 = vld [vmem:[%s8748_s20 + $0x58] sm:$0xff]   ;;  %v8511_v45 = vld [vmem:[%s8748_s20 + $0x60] sm:$0xff]  }
  0x91   : > { %7388 = vmatprep.mubr.bf16.mxu1 %v9081_v14  ;;  %7668 = vmatprep.mubr.bf16.mxu0 %v2992_v41  ;;  %v8506_v41 = vld [vmem:[%s8748_s20 + $0x48] sm:$0xff]   ;;  %v1296_v14 = vrot.slane %v9113_v63, 1 }
  0x92   : > { %7434 = vmatprep.subr.bf16.mxu1 %v8482_v35 }
  0x94   : > { %7435 = vmatpush3.bf16.msra.mxu1 %v8482_v35  ;;  %v8504_v35 = vld [vmem:[%s8748_s20 + $0x38] sm:$0xff]  }
  0x95   : > { %7436 = vmatprep.subr.bf16.mxu1 %v8487_v44 }
  0x97   : > { %7389 = vmatmul.mubr.bf16.gmra.mrb[4].mxu1 %v9095_v54 }
  0x98   : > { %7669 = vmatmul.mubr.bf16.gmra.mrb[28].mxu0 %v2994_v48  ;;  %7392 = vmatprep.mubr.bf16.mxu1 %v9099_v53  ;;  %v8609_v48 = vld [vmem:[%s8748_s20 + $0x4] sm:$0xf] }
  0x99   : > { %7672 = vmatprep.mubr.bf16.mxu0 %v2996_v3  ;;  %7437 = vmatpush3.bf16.msra.mxu1 %v8487_v44  ;;  %v9201_v44 = vld [vmem:[%s11469_s1 + $0x200] sm:$0xff]   ;;  %v8515_v3 = vld [vmem:[%s8748_s20 + $0x70] sm:$0xff]  }
  0x9a   : > { %7438 = vmatprep.subr.bf16.mxu1 %v8492_v51 }
  0x9d   : > { %7439 = vmatpush3.bf16.msra.mxu1 %v8492_v51 }
  0x9e   : > { %7440 = vmatprep.subr.bf16.mxu1 %v8497_v56 }
  0x9f   : > { %7393 = vmatmul.mubr.bf16.gmra.mrb[8].mxu1 %v9113_v63  ;;  %v1298_v63 = vrot.slane %v9117_v1, 1 }
  0xa0   : > { %7673 = vmatmul.mubr.bf16.gmra.mrb[32].mxu0 %v2998_v58  ;;  %7396 = vmatprep.mubr.bf16.mxu1 %v9117_v1  ;;  %v8521_v58 = vld [vmem:[%s8748_s20 + $0x88] sm:$0xff]  }
  0xa1   : > { %7676 = vmatprep.mubr.bf16.mxu0 %v3000_v5  ;;  %7441 = vmatpush3.bf16.msra.mxu1 %v8497_v56  ;;  %v8519_v56 = vld [vmem:[%s8748_s20 + $0x80] sm:$0xff]   ;;  %v8544_v1 = vld [vmem:[%s11469_s1 + $0xe8] sm:$0xff]  }
  0xa2   : > { %7442 = vmatprep.subr.bf16.mxu1 %v8502_v62 }
  0xa5   : > { %7443 = vmatpush3.bf16.msra.mxu1 %v8502_v62 }
  0xa6   : > { %7444 = vmatprep.subr.bf16.mxu1 %v8507_v4 }
  0xa7   : > { %7397 = vmatmul.mubr.bf16.gmra.mrb[12].mxu1 %v9131_v15  ;;  %v1304_v15 = vrot.slane %v9148_v27, 1 }
  0xa8   : > { %7677 = vmatmul.mubr.bf16.gmra.mrb[36].mxu0 %v3002_v6  ;;  %7400 = vmatprep.mubr.bf16.mxu1 %v9135_v36  ;;  %v1299_v6 = vsel %vm1286_vm1, %v1296_v14, %v1298_v63 }
  0xa9   : > { %7680 = vmatprep.mubr.bf16.mxu0 %v3004_v8  ;;  %7445 = vmatpush3.bf16.msra.mxu1 %v8507_v4  ;;  %v8539_v4 = vld [vmem:[%s11469_s1 + $0xe0] sm:$0xff]   ;;  %v1301_v8 = vsel %vm1286_vm1, %v1298_v63, %v1300_v57 }
  0xaa   : > { %7446 = vmatprep.subr.bf16.mxu1 %v8512_v11 }
  0xad   : > { %7447 = vmatpush3.bf16.msra.mxu1 %v8512_v11  ;;  %v1302_v11 = vrot.slane %v9135_v36, 1  ;;  %v8531_v36 = vld [vmem:[%s8748_s20 + $0xb8] sm:$0xff]  }
  0xae   : > { %7496 = vmatprep.subr.bf16.mxu1 %v9141_v21 }
  0xaf   : > { %7401 = vmatmul.mubr.bf16.gmra.mrb[16].mxu1 %v9148_v27  ;;  %v1303_v23 = vsel %vm1286_vm1, %v1300_v57, %v1302_v11 }
  0xb0   : > { %7681 = vmatmul.mubr.bf16.gmra.mrb[40].mxu0 %v3006_v24  ;;  %7404 = vmatprep.mubr.bf16.mxu1 %v9152_v28  ;;  %v8529_v24 = vld [vmem:[%s8748_s20 + $0xb0] sm:$0xff]  }
  0xb1   : > { %7684 = vmatprep.mubr.bf16.mxu0 %v3008_v25  ;;  %v1305_v25 = vsel %vm1286_vm1, %v1302_v11, %v1304_v15  ;;  %v9318_v11 = vld [vmem:[%s8748_s20 + $0x48] sm:$0xff]  }
  0xb7   : > { %7405 = vmatmul.mubr.bf16.gmra.mrb[20].mxu1 %v8887_v31  ;;  %v8509_v31 = vld [vmem:[%s11469_s1 + $0x1d0] sm:$0xff]  }
  0xb8   : > { %7685 = vmatmul.mubr.bf16.gmra.mrb[44].mxu0 %v3010_v30  ;;  %7408 = vmatprep.mubr.bf16.mxu1 %v8899_v43  ;;  %v8501_v43 = vld [vmem:[%s8748_s20 + $0x30] sm:$0xff]   ;;  %v1306_v30 = vrot.slane %v9152_v28, 1 }
  0xb9   : > { %7704 = vmatprep.mubr.bf16.mxu0 %v8496_v22  ;;  %v8610_v22 = vld [vmem:[%s8748_s20 + $0x58] sm:$0xff]  }
  0xbf   : > { %7409 = vmatmul.mubr.bf16.gmra.mrb[24].mxu1 %v8908_v52  ;;  %v8513_v52 = vld [vmem:[%s11469_s1 + $0x1d8] sm:$0xff]  }
  0xc0   : > { %7705 = vmatmul.mubr.bf16.vlgmr.msra.gmra.mrb[0].mxu0 %v8498_v16  ;;  %7412 = vmatprep.mubr.bf16.mxu1 %v8929_v9  ;;  %v8520_v9 = vld [vmem:[%s11469_s1 + $0x1e0] sm:$0xff]   ;;  %v1308_v16 = vrot.slane %v8610_v22, 1 }
  0xc1   : > { %7753 = vmatpush3.bf16.msra.mxu0 %v9052_v13  ;;  %7708 = vmatprep.mubr.bf16.mxu0 %v8500_v46  ;;  %v8505_v13 = vld [vmem:[%s8748_s20 + $0x40] sm:$0xff]  }
  0xc2   : > { %7754 = vmatprep.subr.bf16.mxu0 %v8503_v32  ;;  %v9268_v46 = vld [vmem:[%s8748_s20 + $0x20] sm:$0xff]  }
  0xc5   : > { %7755 = vmatpush3.bf16.msra.mxu0 %v8503_v32 }
  0xc6   : > { %7756 = vmatprep.subr.bf16.mxu0 %v8509_v31 }
  0xc7   : > { %7413 = vmatmul.mubr.bf16.gmra.mrb[28].mxu1 %v8934_v19  ;;  %v8530_v19 = vld [vmem:[%s11469_s1 + $0x1f0] sm:$0xff]  }
  0xc8   : > { %7709 = vmatmul.mubr.bf16.gmra.mrb[4].mxu0 %v8501_v43  ;;  %7416 = vmatprep.mubr.bf16.mxu1 %v8950_v33  ;;  %v8508_v33 = vld [vmem:[%s8748_s20 + $0x50] sm:$0xff]   ;;  %v8532_v43 = vld [vmem:[%s8748_s20 + $0xc0] sm:$0xff]  }
  0xc9   : > { %7712 = vmatprep.mubr.bf16.mxu0 %v8504_v35  ;;  %7757 = vmatpush3.bf16.msra.mxu0 %v8509_v31  ;;  %v1307_v31 = vsel %vm1286_vm1, %v1304_v15, %v1306_v30  ;;  %v1309_v35 = vsel %vm1286_vm1, %v1306_v30, %v1308_v16 }
  0xca   : > { %7758 = vmatprep.subr.bf16.mxu0 %v8513_v52 }
  0xcd   : > { %7759 = vmatpush3.bf16.msra.mxu0 %v8513_v52  ;;  %v8535_v52 = vld [vmem:[%s8748_s20 + $0xc8] sm:$0xff]  }
  0xce   : > { %7760 = vmatprep.subr.bf16.mxu0 %v8520_v9 }
  0xcf   : > { %7417 = vmatmul.mubr.bf16.gmra.mrb[32].mxu1 %v8954_v40  ;;  %v8534_v40 = vld [vmem:[%s11469_s1 + $0x1f8] sm:$0xff]  }
  0xd0   : > { %7713 = vmatmul.mubr.bf16.gmra.mrb[8].mxu0 %v8505_v13  ;;  %7420 = vmatprep.mubr.bf16.mxu1 %v8975_v59  ;;  %v1265_v59 = vld [vmem:[%s8748_s20] sm:$0xe]  ;;  %v4083_v13 = vshll.u32 %v9268_v46, 16 }
  0xd1   : > { %7716 = vmatprep.mubr.bf16.mxu0 %v8506_v41  ;;  %7761 = vmatpush3.bf16.msra.mxu0 %v8520_v9  ;;  %v6601_v50 = vcombine.low %v1265_v59, %v8609_v48  ;;  %v9278_v41 = vld [vmem:[%s11469_s1 + $0x100] sm:$0xff]  }
  0xd2   : > { %7762 = vmatprep.subr.bf16.mxu0 %v8524_v37 }
  0xd5   : > { %7763 = vmatpush3.bf16.msra.mxu0 %v8524_v37  ;;  %v8612_v37 = vld [vmem:[%s8748_s20 + $0x60] sm:$0xff]  }
  0xd6   : > { %7764 = vmatprep.subr.bf16.mxu0 %v8530_v19 }
  0xd7   : > { %7421 = vmatmul.mubr.bf16.gmra.mrb[36].mxu1 %v8979_v0  ;;  %v1287_v0 = vrot.slane %v6601_v50, 1  ;;  %v8536_v50 = vld [vmem:[%s8748_s20 + $0xd0] sm:$0xff]  }
  0xd8   : > { %7717 = vmatmul.mubr.bf16.gmra.mrb[12].mxu0 %v8508_v33  ;;  %7424 = vmatprep.mubr.bf16.mxu1 %v9003_v20  ;;  %v1288_v20 = vrot.slane %v9076_v38, 1  ;;  %v9283_v33 = vld [vmem:[%s8748_s20 + $0x28] sm:$0xff]  }
  0xd9   : > { %7720 = vmatprep.mubr.bf16.mxu0 %v8510_v39  ;;  %7765 = vmatpush3.bf16.msra.mxu0 %v8530_v19  ;;  %v1310_v19 = vrot.slane %v8612_v37, 1  ;;  %v8613_v39 = vld [vmem:[%s8748_s20 + $0x68] sm:$0xff]   ;;  %v8619_v37 = vld [vmem:[%s8748_s20 + $0x98] sm:$0xff]  }
  0xda   : > { %7766 = vmatprep.subr.bf16.mxu0 %v8534_v40  ;;  %v1289_v51 = vsel %vm1286_vm1, %v1287_v0, %v1288_v20  ;;  %v4091_v0 = vshll.u32 %v9283_v33, 16 }
  0xdb   : > { %v1311_v48 = vsel %vm1286_vm1, %v1308_v16, %v1310_v19 }
  0xdd   : > { %7767 = vmatpush3.bf16.msra.mxu0 %v8534_v40  ;;  %v1312_v40 = vrot.slane %v8613_v39, 1 }
  0xde   : > { %7816 = vmatprep.subr.bf16.mxu0 %v9201_v44 }
  0xdf   : > { %7425 = vmatmul.mubr.bf16.gmra.mrb[40].mxu1 %v9007_v26  ;;  %v1292_v26 = vrot.slane %v9095_v54, 1  ;;  %v8528_v54 = vld [vmem:[%s11469_s1 + $0xd0] sm:$0xff]  }
  0xe0   : > { %7721 = vmatmul.mubr.bf16.gmra.mrb[16].mxu0 %v8511_v45  ;;  %7428 = vmatprep.mubr.bf16.mxu1 %v9025_v42  ;;  %v1291_v42 = vsel %vm1286_vm1, %v1288_v20, %v1290_v55  ;;  %v4085_v45 = vrot.slane %v4083_v13, 1  ;;  %v1313_v20 = vsel %vm1286_vm1, %v1310_v19, %v1312_v40  ;;  %v1324_v19 = vrot.slane %v8619_v37, 1  ;;  %v8624_v37 = vld [vmem:[%s8748_s20 + $0xc0] ss:$0 sps:$4 sm:$0x11]  }
  0xe1   : > { %7724 = vmatprep.mubr.bf16.mxu0 %v8514_v47  ;;  %v1293_v38 = vsel %vm1286_vm1, %v1290_v55, %v1292_v26  ;;  %v9287_v47 = vld [vmem:[%s8748_s20 + $0x30] sm:$0xff]  }
  0xe2   : > { %v4099_v55 = vshll.u32 %v9287_v47, 16  ;;  %v4103_v63 = vshrl.u32 %v9287_v47, 16 }
  0xe7   : > { %7429 = vmatmul.mubr.bf16.gmra.mrb[44].mxu1 %v9029_v34  ;;  %v1294_v34 = vrot.slane %v9099_v53, 1  ;;  %v8533_v53 = vld [vmem:[%s11469_s1 + $0xd8] sm:$0xff]  }
  0xe8   : > { %7725 = vmatmul.mubr.bf16.gmra.mrb[20].mxu0 %v8515_v3  ;;  %7448 = vmatprep.mubr.bf16.mxu1 %v1289_v51  ;;  %v4087_v3 = vshrl.u32 %v9268_v46, 16 }
  0xe9   : > { %7728 = vmatprep.mubr.bf16.mxu0 %v8517_v49  ;;  %v1295_v5 = vsel %vm1286_vm1, %v1292_v26, %v1294_v34  ;;  %v1297_v62 = vsel %vm1286_vm1, %v1294_v34, %v1296_v14  ;;  %v4095_v49 = vshrl.u32 %v9283_v33, 16  ;;  %v8614_v26 = vld [vmem:[%s8748_s20 + $0x70] sm:$0xff]  }
  0xef   : > { %7449 = vmatmul.mubr.bf16.vlgmr.msra.gmra.mrb[0].mxu1 %v1291_v42  ;;  %v1314_v42 = vrot.slane %v8614_v26, 1  ;;  %v8567_v26 = vld [vmem:[%s11469_s1 + $0x228] sm:$0xff]  }
  0xf0   : > { %7729 = vmatmul.mubr.bf16.gmra.mrb[24].mxu0 %v8519_v56  ;;  %7497 = vmatpush3.bf16.msra.mxu1 %v9141_v21  ;;  %v9255_v21 = vld [vmem:[%s8748_s20 + $0x1c] sm:$0xf]  ;;  %v4093_v56 = vrot.slane %v4091_v0, 1 }
  0xf1   : > { %7452 = vmatprep.mubr.bf16.mxu1 %v1293_v38  ;;  %7732 = vmatprep.mubr.bf16.mxu0 %v8521_v58  ;;  %v6796_v27 = vcombine.low %v3886_v18, %v9255_v21  ;;  %v9299_v58 = vld [vmem:[%s8748_s20 + $0x38] sm:$0xff]   ;;  %v4089_v38 = vor.u32 %v4087_v3, %v4085_v45 }
  0xf2   : > { %7498 = vmatprep.subr.bf16.mxu1 %v8523_v60  ;;  %v4097_v14 = vor.u32 %v4095_v49, %v4093_v56 }
  0xf3   : > { %v4078_v32 = vshll.u32 %v6796_v27, 16  ;;  %v4076_v9 = vshrl.u32 %v6796_v27, 16 }
  0xf4   : > { %7499 = vmatpush3.bf16.msra.mxu1 %v8523_v60  ;;  %v8615_v60 = vld [vmem:[%s8748_s20 + $0x78] sm:$0xff]  }
  0xf5   : > { %7500 = vmatprep.subr.bf16.mxu1 %v8528_v54  ;;  %v4080_v28 = vrot.slane %v4078_v32, 1  ;;  %v1316_v34 = vrot.slane %v8615_v60, 1  ;;  %v4127_v32 = vshrl.u32 %v9318_v11, 16  ;;  %v9363_v60 = vld [vmem:[%s8748_s20 + $0x68] sm:$0xff]  }
  0xf7   : > { %7453 = vmatmul.mubr.bf16.gmra.mrb[4].mxu1 %v1295_v5  ;;  %v4081_v59 = vor.u32 %v4080_v28, %v4076_v9  ;;  %v9303_v5 = vld [vmem:[%s8748_s20 + $0x40] sm:$0xff]   ;;  %v9341_v28 = vld [vmem:[%s8748_s20 + $0x58] sm:$0xff]  }
  0xf8   : > { %7733 = vmatmul.mubr.bf16.gmra.mrb[28].mxu0 %v8522_v61  ;;  %7456 = vmatprep.mubr.bf16.mxu1 %v1297_v62  ;;  %v1315_v61 = vsel %vm1286_vm1, %v1312_v40, %v1314_v42  ;;  %v4107_v62 = vshll.u32 %v9299_v58, 16  ;;  %v4119_v22 = vshrl.u32 %v9303_v5, 16  ;;  %v4143_v49 = vshrl.u32 %v9341_v28, 16 }
  0xf9   : > { %7736 = vmatprep.mubr.bf16.mxu0 %v8525_v2  ;;  %7501 = vmatpush3.bf16.msra.mxu1 %v8528_v54  ;;  %v4086_v51 = vsel %vm474_vm0, %v4081_v59, %v4085_v45  ;;  %v4101_v54 = vrot.slane %v4099_v55, 1  ;;  %v4094_v2 = vsel %vm474_vm0, %v4089_v38, %v4093_v56  ;;  %v9345_v59 = vld [vmem:[%s8748_s20 + $0x60] sm:$0xff]  }
  0xfa   : > { %7502 = vmatprep.subr.bf16.mxu1 %v8533_v53  ;;  %v8562_v45 = vld [vmem:[%s11469_s1 + $0x220] sm:$0xff]   ;;  %v4147_v55 = vshll.u32 %v9345_v59, 16 }
  0xfb   : > { %v4102_v57 = vsel %vm474_vm0, %v4097_v14, %v4101_v54  ;;  %v4105_v15 = vor.u32 %v4103_v63, %v4101_v54  ;;  %v8621_v14 = vld [vmem:[%s8748_s20 + $0xa8] sm:$0xff]  }
  0xfc   : > { %v1328_v54 = vrot.slane %v8621_v14, 1 }
  0xfd   : > { %7503 = vmatpush3.bf16.msra.mxu1 %v8533_v53  ;;  %v1317_v53 = vsel %vm1286_vm1, %v1314_v42, %v1316_v34  ;;  %v8620_v42 = vld [vmem:[%s8748_s20 + $0xa0] sm:$0xff]  }
  0xfe   : > { %7504 = vmatprep.subr.bf16.mxu1 %v8539_v4  ;;  %v1326_v56 = vrot.slane %v8620_v42, 1 }
  0xff   : > { %7457 = vmatmul.mubr.bf16.gmra.mrb[8].mxu1 %v1299_v6  ;;  %v4111_v6 = vshrl.u32 %v9299_v58, 16 }
 0x100   : > { %7737 = vmatmul.mubr.bf16.gmra.mrb[32].mxu0 %v8526_v7  ;;  %7460 = vmatprep.mubr.bf16.mxu1 %v1301_v8  ;;  %v4115_v7 = vshll.u32 %v9303_v5, 16  ;;  %v8616_v8 = vld [vmem:[%s8748_s20 + $0x80] sm:$0xff]   ;;  %v1327_v63 = vsel %vm1286_vm1, %v1324_v19, %v1326_v56 }
 0x101   : > { %7740 = vmatprep.mubr.bf16.mxu0 %v8527_v10  ;;  %7505 = vmatpush3.bf16.msra.mxu1 %v8539_v4  ;;  %v8545_v4 = vld [vmem:[%s11469_s1 + $0x208] sm:$0xff]   ;;  %v1318_v10 = vrot.slane %v8616_v8, 1 }
 0x102   : > { %7506 = vmatprep.subr.bf16.mxu1 %v8544_v1 }
 0x103   : > { %v1319_v27 = vsel %vm1286_vm1, %v1316_v34, %v1318_v10 }
 0x105   : > { %7507 = vmatpush3.bf16.msra.mxu1 %v8544_v1  ;;  %v4109_v1 = vrot.slane %v4107_v62, 1  ;;  %v4149_v62 = vrot.slane %v4147_v55, 1 }
 0x106   : > { %7508 = vmatprep.subr.bf16.mxu1 %v8549_v17 }
 0x107   : > { %7461 = vmatmul.mubr.bf16.gmra.mrb[12].mxu1 %v1303_v23  ;;  %v4113_v23 = vor.u32 %v4111_v6, %v4109_v1  ;;  %v1329_v6 = vsel %vm1286_vm1, %v1326_v56, %v1328_v54 }
 0x108   : > { %7741 = vmatmul.mubr.bf16.gmra.mrb[36].mxu0 %v8529_v24  ;;  %7464 = vmatprep.mubr.bf16.mxu1 %v1305_v25  ;;  %v4117_v24 = vrot.slane %v4115_v7, 1  ;;  %v9323_v25 = vld [vmem:[%s8748_s20 + $0x50] sm:$0xff]   ;;  %v4151_v7 = vshrl.u32 %v9345_v59, 16 }
 0x109   : > { %7744 = vmatprep.mubr.bf16.mxu0 %v8531_v36  ;;  %7509 = vmatpush3.bf16.msra.mxu1 %v8549_v17  ;;  %v8617_v17 = vld [vmem:[%s8748_s20 + $0x88] sm:$0xff]   ;;  %v8551_v36 = vld [vmem:[%s11469_s1 + $0x210] sm:$0xff]   ;;  %v4135_v3 = vshrl.u32 %v9323_v25, 16 }
 0x10a   : > { %7510 = vmatprep.subr.bf16.mxu1 %v8554_v29  ;;  %v1320_v18 = vrot.slane %v8617_v17, 1  ;;  %v4118_v16 = vsel %vm474_vm0, %v4113_v23, %v4117_v24  ;;  %v4121_v13 = vor.u32 %v4119_v22, %v4117_v24  ;;  %v8622_v17 = vld [vmem:[%s8748_s20 + $0xb0] sm:$0xff]   ;;  %v9385_v24 = vld [vmem:[%s8748_s20 + $0x78] sm:$0xff]   ;;  %v9389_v22 = vld [vmem:[%s8748_s20 + $0x80] sm:$0xff]  }
 0x10b   : > { %v4183_v55 = vshrl.u32 %v9389_v22, 16 }
 0x10c   : > { %v1321_v30 = vsel %vm1286_vm1, %v1318_v10, %v1320_v18  ;;  %v4159_v10 = vshrl.u32 %v9363_v60, 16 }
 0x10d   : > { %7511 = vmatpush3.bf16.msra.mxu1 %v8554_v29  ;;  %v4123_v29 = vshll.u32 %v9318_v11, 16 }
 0x10e   : > { %7880 = vmatprep.subr.bf16.mxu1 %v9278_v41 }
 0x10f   : > { %7465 = vmatmul.mubr.bf16.gmra.mrb[16].mxu1 %v1307_v31  ;;  %v4131_v31 = vshll.u32 %v9323_v25, 16  ;;  %v4125_v9 = vrot.slane %v4123_v29, 1 }
 0x110   : > { %7745 = vmatmul.mubr.bf16.gmra.mrb[40].mxu0 %v8532_v43  ;;  %7468 = vmatprep.mubr.bf16.mxu1 %v1309_v35  ;;  %v8555_v43 = vld [vmem:[%s11469_s1 + $0x218] sm:$0xff]   ;;  %v8618_v35 = vld [vmem:[%s8748_s20 + $0x90] sm:$0xff]  }
 0x111   : > { %7748 = vmatprep.mubr.bf16.mxu0 %v8535_v52  ;;  %v1322_v52 = vrot.slane %v8618_v35, 1  ;;  %v4129_v39 = vor.u32 %v4127_v32, %v4125_v9  ;;  %v4133_v40 = vrot.slane %v4131_v31, 1  ;;  %v4126_v0 = vsel %vm474_vm0, %v4121_v13, %v4125_v9 }
 0x112   : > { %v4171_v32 = vshll.u32 %v9385_v24, 16  ;;  %v4175_v9 = vshrl.u32 %v9385_v24, 16  ;;  %v4179_v13 = vshll.u32 %v9389_v22, 16 }
 0x113   : > { %v4137_v34 = vor.u32 %v4135_v3, %v4133_v40  ;;  %v8558_v3 = vld [vmem:[%s8748_s20 + $0xc] sm:$0xff]  }
 0x117   : > { %7469 = vmatmul.mubr.bf16.gmra.mrb[20].mxu1 %v1311_v48  ;;  %v1323_v48 = vsel %vm1286_vm1, %v1320_v18, %v1322_v52  ;;  %v1330_v18 = vrot.slane %v8622_v17, 1 }
 0x118   : > { %7749 = vmatmul.mubr.bf16.gmra.mrb[44].mxu0 %v8536_v50  ;;  %7472 = vmatprep.mubr.bf16.mxu1 %v1313_v20  ;;  %v4139_v50 = vshll.u32 %v9341_v28, 16  ;;  %v1325_v20 = vsel %vm1286_vm1, %v1322_v52, %v1324_v19  ;;  %v1334_v19 = vrot.slane %v8624_v37, 1 }
 0x119   : > { %7768 = vmatprep.mubr.bf16.mxu0 %v4086_v51  ;;  %v4134_v51 = vsel %vm474_vm0, %v4129_v39, %v4133_v40  ;;  %v4173_v39 = vrot.slane %v4171_v32, 1  ;;  %v9401_v40 = vld [vmem:[%s8748_s20 + $0x88] sm:$0xff]   ;;  %v8626_v32 = vld [vmem:[%s11469_s1 + $0x110] sm:$0xff]  }
 0x11a   : > { %v4141_v38 = vrot.slane %v4139_v50, 1  ;;  %v4181_v50 = vrot.slane %v4179_v13, 1  ;;  %v4191_v42 = vshrl.u32 %v9401_v40, 16 }
 0x11c   : > { %v4185_v14 = vor.u32 %v4183_v55, %v4181_v50 }
 0x11f   : > { %7473 = vmatmul.mubr.bf16.gmra.mrb[24].mxu1 %v1315_v61  ;;  %v4145_v61 = vor.u32 %v4143_v49, %v4141_v38 }
 0x120   : > { %7769 = vmatmul.mubr.bf16.vlgmr.msra.gmra.mrb[0].mxu0 %v4094_v2  ;;  %7476 = vmatprep.mubr.bf16.mxu1 %v1317_v53  ;;  %v9367_v2 = vld [vmem:[%s8748_s20 + $0x70] sm:$0xff]  }
 0x121   : > { %7817 = vmatpush3.bf16.msra.mxu0 %v9201_v44  ;;  %7772 = vmatprep.mubr.bf16.mxu0 %v4102_v57  ;;  %v4110_v44 = vsel %vm474_vm0, %v4105_v15, %v4109_v1  ;;  %v8576_v53 = vld [vmem:[%s11469_s1 + $0x230] sm:$0xff]   ;;  %v4155_v57 = vshll.u32 %v9363_v60, 16  ;;  %v4150_v8 = vsel %vm474_vm0, %v4145_v61, %v4149_v62  ;;  %v4163_v1 = vshll.u32 %v9367_v2, 16  ;;  %v8581_v15 = vld [vmem:[%s11469_s1 + $0x238] sm:$0xff]  }
 0x122   : > { %7818 = vmatprep.subr.bf16.mxu0 %v8545_v4  ;;  %v4167_v35 = vshrl.u32 %v9367_v2, 16 }
 0x123   : > { %v4157_v23 = vrot.slane %v4155_v57, 1 }
 0x125   : > { %7819 = vmatpush3.bf16.msra.mxu0 %v8545_v4  ;;  %v4142_v4 = vsel %vm474_vm0, %v4137_v34, %v4141_v38  ;;  %v9415_v34 = vld [vmem:[%s8748_s20 + $0x98] sm:$0xff]  }
 0x126   : > { %7820 = vmatprep.subr.bf16.mxu0 %v8551_v36 }
 0x127   : > { %7477 = vmatmul.mubr.bf16.gmra.mrb[28].mxu1 %v1319_v27  ;;  %v8623_v27 = vld [vmem:[%s8748_s20 + $0xb8] sm:$0xff]  }
 0x128   : > { %7773 = vmatmul.mubr.bf16.gmra.mrb[4].mxu0 %v4110_v44  ;;  %7480 = vmatprep.mubr.bf16.mxu1 %v1321_v30  ;;  %v1332_v29 = vrot.slane %v8623_v27, 1  ;;  %v4161_v44 = vor.u32 %v4159_v10, %v4157_v23  ;;  %v4165_v30 = vrot.slane %v4163_v1, 1  ;;  %v9436_v27 = vld [vmem:[%s8748_s20 + $0xb0] sm:$0xff]  }
 0x129   : > { %7776 = vmatprep.mubr.bf16.mxu0 %v4118_v16  ;;  %7821 = vmatpush3.bf16.msra.mxu0 %v8551_v36  ;;  %v4153_v36 = vor.u32 %v4151_v7, %v4149_v62  ;;  %v1331_v16 = vsel %vm1286_vm1, %v1328_v54, %v1330_v18  ;;  %v9418_v62 = vld [vmem:[%s8748_s20 + $0xa0] sm:$0xff]  }
 0x12a   : > { %7822 = vmatprep.subr.bf16.mxu0 %v8555_v43  ;;  %v4166_v52 = vsel %vm474_vm0, %v4161_v44, %v4165_v30  ;;  %v4211_v10 = vshll.u32 %v9418_v62, 16  ;;  %v8568_v44 = vld [vmem:[%s8748_s20 + $0x2c] sm:$0xff]  }
 0x12b   : > { %v4158_v31 = vsel %vm474_vm0, %v4153_v36, %v4157_v23 }
 0x12c   : > { %v4213_v36 = vrot.slane %v4211_v10, 1 }
 0x12d   : > { %7823 = vmatpush3.bf16.msra.mxu0 %v8555_v43  ;;  %v1333_v43 = vsel %vm1286_vm1, %v1330_v18, %v1332_v29  ;;  %v8625_v18 = vld [vmem:[%s11469_s1 + $0x108] sm:$0xff]  }
 0x12e   : > { %7824 = vmatprep.subr.bf16.mxu0 %v8562_v45 }
 0x12f   : > { %7481 = vmatmul.mubr.bf16.gmra.mrb[32].mxu1 %v1323_v48  ;;  %v4177_v48 = vor.u32 %v4175_v9, %v4173_v39  ;;  %v9450_v9 = vld [vmem:[%s8748_s20 + $0xb8] sm:$0xff]  }
 0x130   : > { %7777 = vmatmul.mubr.bf16.gmra.mrb[8].mxu0 %v4126_v0  ;;  %7484 = vmatprep.mubr.bf16.mxu1 %v1325_v20  ;;  %v9404_v0 = vld [vmem:[%s8748_s20 + $0x90] sm:$0xff]   ;;  %v1335_v20 = vsel %vm1286_vm1, %v1332_v29, %v1334_v19  ;;  %v8565_v29 = vld [vmem:[%s8748_s20 + $0x24] sm:$0xff]   ;;  %v4239_v55 = vshrl.u32 %v9450_v9, 16 }
 0x131   : > { %7780 = vmatprep.mubr.bf16.mxu0 %v4134_v51  ;;  %7825 = vmatpush3.bf16.msra.mxu0 %v8562_v45  ;;  %v4169_v45 = vor.u32 %v4167_v35, %v4165_v30  ;;  %v4187_v51 = vshll.u32 %v9401_v40, 16  ;;  %v4195_v56 = vshll.u32 %v9404_v0, 16  ;;  %v4227_v35 = vshll.u32 %v9436_v27, 16 }
 0x132   : > { %7826 = vmatprep.subr.bf16.mxu0 %v8567_v26 }
 0x133   : > { %v4174_v49 = vsel %vm474_vm0, %v4169_v45, %v4173_v39  ;;  %v4189_v38 = vrot.slane %v4187_v51, 1  ;;  %v4197_v61 = vrot.slane %v4195_v56, 1  ;;  %v4229_v19 = vrot.slane %v4227_v35, 1  ;;  %v9453_v39 = vld [vmem:[%s8748_s20 + $0xc0] sm:$0xff]   ;;  %v8627_v45 = vld [vmem:[%s11469_s1 + $0x118] sm:$0xff]  }
 0x134   : > { %v4231_v51 = vshrl.u32 %v9436_v27, 16 }
 0x135   : > { %7827 = vmatpush3.bf16.msra.mxu0 %v8567_v26  ;;  %v4182_v26 = vsel %vm474_vm0, %v4177_v48, %v4181_v50  ;;  %v4193_v54 = vor.u32 %v4191_v42, %v4189_v38  ;;  %v4190_v57 = vsel %vm474_vm0, %v4185_v14, %v4189_v38  ;;  %v8570_v48 = vld [vmem:[%s8748_s20 + $0x34] sm:$0xff]   ;;  %v8572_v50 = vld [vmem:[%s8748_s20 + $0x3c] sm:$0xff]   ;;  %v9470_v38 = vld [vmem:[%s8748_s20 + $0xc8] sm:$0xff]  }
 0x136   : > { %7828 = vmatprep.subr.bf16.mxu0 %v8576_v53  ;;  %v8628_v42 = vld [vmem:[%s11469_s1 + $0x120] sm:$0xff]   ;;  %v4233_v14 = vor.u32 %v4231_v51, %v4229_v19 }
 0x137   : > { %7485 = vmatmul.mubr.bf16.gmra.mrb[36].mxu1 %v1327_v63  ;;  %v4203_v63 = vshll.u32 %v9415_v34, 16  ;;  %v4198_v7 = vsel %vm474_vm0, %v4193_v54, %v4197_v61 }
 0x138   : > { %7781 = vmatmul.mubr.bf16.gmra.mrb[12].mxu0 %v4142_v4  ;;  %7488 = vmatprep.mubr.bf16.mxu1 %v1329_v6  ;;  %v8563_v4 = vld [vmem:[%s8748_s20 + $0x1c] sm:$0xff]   ;;  %v4199_v6 = vshrl.u32 %v9404_v0, 16 }
 0x139   : > { %7784 = vmatprep.mubr.bf16.mxu0 %v4150_v8  ;;  %7829 = vmatpush3.bf16.msra.mxu0 %v8576_v53  ;;  %v8560_v53 = vld [vmem:[%s8748_s20 + $0x14] sm:$0xff]   ;;  %v4207_v8 = vshrl.u32 %v9415_v34, 16  ;;  %v4205_v1 = vrot.slane %v4203_v63, 1  ;;  %v8629_v63 = vld [vmem:[%s11469_s1 + $0x128] sm:$0xff]  }
 0x13a   : > { %7830 = vmatprep.subr.bf16.mxu0 %v8581_v15  ;;  %v4201_v17 = vor.u32 %v4199_v6, %v4197_v61  ;;  %v4251_v6 = vshll.u32 %v9470_v38, 16 }
 0x13b   : > { %v4209_v23 = vor.u32 %v4207_v8, %v4205_v1  ;;  %v4247_v8 = vshrl.u32 %v9453_v39, 16 }
 0x13c   : > { %v4206_v30 = vsel %vm474_vm0, %v4201_v17, %v4205_v1  ;;  %v4255_v1 = vshrl.u32 %v9470_v38, 16 }
 0x13d   : > { %7831 = vmatpush3.bf16.msra.mxu0 %v8581_v15  ;;  %v9430_v15 = vld [vmem:[%s8748_s20 + $0xa8] sm:$0xff]  }
 0x13f   : > { %7489 = vmatmul.mubr.bf16.gmra.mrb[40].mxu1 %v1331_v16  ;;  %v4215_v16 = vshrl.u32 %v9418_v62, 16 }
 0x140   : > { %7785 = vmatmul.mubr.bf16.gmra.mrb[16].mxu0 %v4158_v31  ;;  %7492 = vmatprep.mubr.bf16.mxu1 %v1333_v43  ;;  %v4214_v31 = vsel %vm474_vm0, %v4209_v23, %v4213_v36  ;;  %v4223_v43 = vshrl.u32 %v9430_v15, 16  ;;  %v4253_v23 = vrot.slane %v4251_v6, 1  ;;  %v8592_v6 = vld [vmem:[%s8748_s20 + $0x94] sm:$0xff]  }
 0x141   : > { %7788 = vmatprep.mubr.bf16.mxu0 %v4166_v52  ;;  %v4217_v13 = vor.u32 %v4215_v16, %v4213_v36  ;;  %v8579_v16 = vld [vmem:[%s8748_s20 + $0x54] sm:$0xff]  }
 0x147   : > { %7493 = vmatmul.mubr.bf16.gmra.mrb[44].mxu1 %v1335_v20  ;;  %v4235_v20 = vshll.u32 %v9450_v9, 16 }
 0x148   : > { %7789 = vmatmul.mubr.bf16.gmra.mrb[20].mxu0 %v4174_v49  ;;  %7512 = vmatprep.mubr.bf16.mxu1 %v8558_v3 }
 0x149   : > { %7792 = vmatprep.mubr.bf16.mxu0 %v4182_v26  ;;  %v4243_v26 = vshll.u32 %v9453_v39, 16  ;;  %v4237_v56 = vrot.slane %v4235_v20, 1  ;;  %v8584_v20 = vld [vmem:[%s8748_s20 + $0x64] sm:$0xff]  }
 0x14b   : > { %v4241_v54 = vor.u32 %v4239_v55, %v4237_v56  ;;  %v4245_v61 = vrot.slane %v4243_v26, 1  ;;  %v4642_v55 = vrot.slane %v9287_v47, 1  ;;  %v8588_v26 = vld [vmem:[%s8748_s20 + $0x74] sm:$0xff]  }
 0x14d   : > { %v4246_v10 = vsel %vm474_vm0, %v4241_v54, %v4245_v61  ;;  %v4249_v36 = vor.u32 %v4247_v8, %v4245_v61  ;;  %v4646_v54 = vrot.slane %v9303_v5, 1  ;;  %v8590_v61 = vld [vmem:[%s8748_s20 + $0x84] sm:$0xff]   ;;  %v4652_v8 = vrot.slane %v9341_v28, 1  ;;  %v8597_v28 = vld [vmem:[%s8748_s20 + $0xbc] sm:$0xff]  }
 0x14f   : > { %7513 = vmatmul.mubr.bf16.vlgmr.msra.gmra.mrb[0].mxu1 %v8560_v53  ;;  %v9473_v53 = vld [vmem:[%s8748_s20 + $0xd0] sm:$0xff]  }
 0x150   : > { %7793 = vmatmul.mubr.bf16.gmra.mrb[24].mxu0 %v4190_v57  ;;  %7888 = vmatpush3.bf16.msra.mxu1 %v9278_v41  ;;  %v4219_v41 = vshll.u32 %v9430_v15, 16  ;;  %v8574_v57 = vld [vmem:[%s8748_s20 + $0x44] sm:$0xff]   ;;  %v4259_v17 = vshll.u32 %v9473_v53, 16  ;;  %v4263_v35 = vshrl.u32 %v9473_v53, 16 }
 0x151   : > { %7516 = vmatprep.mubr.bf16.mxu1 %v8563_v4  ;;  %7796 = vmatprep.mubr.bf16.mxu0 %v4198_v7  ;;  %v8577_v4 = vld [vmem:[%s8748_s20 + $0x4c] sm:$0xff]   ;;  %v4238_v7 = vsel %vm474_vm0, %v4233_v14, %v4237_v56  ;;  %v4644_v14 = vrot.slane %v9299_v58, 1  ;;  %v8593_v58 = vld [vmem:[%s8748_s20 + $0x9c] sm:$0xff]  }
 0x152   : > { %7881 = vmatprep.subr.bf16.mxu1 %v8625_v18  ;;  %v4221_v52 = vrot.slane %v4219_v41, 1  ;;  %v4261_v41 = vrot.slane %v4259_v17, 1 }
 0x153   : > { %v4645_v47 = vsel %vm1286_vm1, %v4642_v55, %v4644_v14 }
 0x154   : > { %7889 = vmatpush3.bf16.msra.mxu1 %v8625_v18  ;;  %v4225_v37 = vor.u32 %v4223_v43, %v4221_v52  ;;  %v4222_v3 = vsel %vm474_vm0, %v4217_v13, %v4221_v52  ;;  %v8630_v18 = vld [vmem:[%s11469_s1 + $0x130] sm:$0xff]   ;;  %v4254_v43 = vsel %vm474_vm0, %v4249_v36, %v4253_v23 }
 0x155   : > { %7882 = vmatprep.subr.bf16.mxu1 %v8626_v32  ;;  %v8596_v36 = vld [vmem:[%s8748_s20 + $0xb4] sm:$0xff]  }
 0x156   : > { %v4230_v49 = vsel %vm474_vm0, %v4225_v37, %v4229_v19  ;;  %v4265_v19 = vor.u32 %v4263_v35, %v4261_v41  ;;  %v8598_v35 = vld [vmem:[%s8748_s20 + $0xc4] sm:$0xff]  }
 0x157   : > { %7517 = vmatmul.mubr.bf16.gmra.mrb[4].mxu1 %v8565_v29  ;;  %v9490_v29 = vld [vmem:[%s8748_s20 + $0xd8] ss:$0 sps:$4 sm:$0x11]  }
 0x158   : > { %7797 = vmatmul.mubr.bf16.gmra.mrb[28].mxu0 %v4206_v30  ;;  %7520 = vmatprep.mubr.bf16.mxu1 %v8568_v44  ;;  %v4257_v44 = vor.u32 %v4255_v1, %v4253_v23  ;;  %v8631_v30 = vld [vmem:[%s11469_s1 + $0x138] sm:$0xff]   ;;  %v4267_v52 = vshll.u32 %v9490_v29, 16  ;;  %v4658_v23 = vrot.slane %v9367_v2, 1 }
 0x159   : > { %7800 = vmatprep.mubr.bf16.mxu0 %v4214_v31  ;;  %7890 = vmatpush3.bf16.msra.mxu1 %v8626_v32  ;;  %v4616_v32 = vld [vmem:[%s8748_s20 + $0x18] sm:$0xe]  ;;  %v8582_v31 = vld [vmem:[%s8748_s20 + $0x5c] sm:$0xff]  }
 0x15a   : > { %7883 = vmatprep.subr.bf16.mxu1 %v8627_v45  ;;  %v4262_v13 = vsel %vm474_vm0, %v4257_v44, %v4261_v41  ;;  %v6845_v37 = vcombine.low %v4616_v32, %v9255_v21  ;;  %v4640_v21 = vrot.slane %v9283_v33, 1  ;;  %v8591_v33 = vld [vmem:[%s8748_s20 + $0x8c] sm:$0xff]  }
 0x15b   : > { %v8632_v44 = vld [vmem:[%s8748_s20 + $0x6c] sm:$0xff]  }
 0x15c   : > { %v4643_v56 = vsel %vm1286_vm1, %v4640_v21, %v4642_v55  ;;  %v2500_v41 = vshrl.u32 %v8632_v44, 16  ;;  %v8636_v55 = vld [vmem:[%s8748_s20 + $0x8c] sm:$0xff]  }
 0x15d   : > { %7891 = vmatpush3.bf16.msra.mxu1 %v8627_v45  ;;  %v4269_v45 = vrot.slane %v4267_v52, 1  ;;  %v8634_v52 = vld [vmem:[%s8748_s20 + $0x7c] sm:$0xff]   ;;  %v8640_v44 = vld [vmem:[%s8748_s20 + $0xac] sm:$0xff]  }
 0x15e   : > { %7884 = vmatprep.subr.bf16.mxu1 %v8628_v42  ;;  %v2502_v2 = vor.u32 %v2500_v41, %v8931_v12  ;;  %v2560_v41 = vshll.u32 %v8640_v44, 16 }
 0x15f   : > { %7521 = vmatmul.mubr.bf16.gmra.mrb[8].mxu1 %v8570_v48  ;;  %v4637_v48 = vrot.slane %v6845_v37, 1  ;;  %v4270_v51 = vsel %vm474_vm0, %v4265_v19, %v4269_v45 }
 0x160   : > { %7801 = vmatmul.mubr.bf16.gmra.mrb[32].mxu0 %v4222_v3  ;;  %7524 = vmatprep.mubr.bf16.mxu1 %v8572_v50  ;;  %v4638_v50 = vrot.slane %v9268_v46, 1  ;;  %v8586_v3 = vld [vmem:[%s8748_s20 + $0x6c] sm:$0xff]  }
 0x161   : > { %7804 = vmatprep.mubr.bf16.mxu0 %v4230_v49  ;;  %7892 = vmatpush3.bf16.msra.mxu1 %v8628_v42  ;;  %v8589_v42 = vld [vmem:[%s8748_s20 + $0x7c] sm:$0xff]  }
 0x162   : > { %7885 = vmatprep.subr.bf16.mxu1 %v8629_v63  ;;  %v4639_v49 = vsel %vm1286_vm1, %v4637_v48, %v4638_v50  ;;  %v4641_v46 = vsel %vm1286_vm1, %v4638_v50, %v4640_v21  ;;  %v2516_v48 = vshrl.u32 %v8634_v52, 16  ;;  %v8635_v50 = vld [vmem:[%s8748_s20 + $0x84] sm:$0xff]   ;;  %v4666_v21 = vrot.slane %v9404_v0, 1 }
 0x165   : > { %7893 = vmatpush3.bf16.msra.mxu1 %v8629_v63  ;;  %v4647_v63 = vsel %vm1286_vm1, %v4644_v14, %v4646_v54 }
 0x166   : > { %7886 = vmatprep.subr.bf16.mxu1 %v8630_v18 }
 0x167   : > { %7525 = vmatmul.mubr.bf16.gmra.mrb[12].mxu1 %v8574_v57  ;;  %v4648_v57 = vrot.slane %v9318_v11, 1  ;;  %v8594_v11 = vld [vmem:[%s8748_s20 + $0xa4] sm:$0xff]  }
 0x168   : > { %7805 = vmatmul.mubr.bf16.gmra.mrb[36].mxu0 %v4238_v7  ;;  %7528 = vmatprep.mubr.bf16.mxu1 %v8577_v4  ;;  %v4650_v4 = vrot.slane %v9323_v25, 1  ;;  %v8595_v25 = vld [vmem:[%s8748_s20 + $0xac] sm:$0xff]  }
 0x169   : > { %7808 = vmatprep.mubr.bf16.mxu0 %v4246_v10  ;;  %7894 = vmatpush3.bf16.msra.mxu1 %v8630_v18  ;;  %v4649_v5 = vsel %vm1286_vm1, %v4646_v54, %v4648_v57  ;;  %v4654_v10 = vrot.slane %v9345_v59, 1  ;;  %v4656_v18 = vrot.slane %v9363_v60, 1  ;;  %v4660_v60 = vrot.slane %v9385_v24, 1 }
 0x16a   : > { %7887 = vmatprep.subr.bf16.mxu1 %v8631_v30  ;;  %v4651_v7 = vsel %vm1286_vm1, %v4648_v57, %v4650_v4  ;;  %v4653_v1 = vsel %vm1286_vm1, %v4650_v4, %v4652_v8  ;;  %v2532_v54 = vshrl.u32 %v8636_v55, 16 }
 0x16b   : > { %v4655_v17 = vsel %vm1286_vm1, %v4652_v8, %v4654_v10  ;;  %v4657_v59 = vsel %vm1286_vm1, %v4654_v10, %v4656_v18  ;;  %v4659_v32 = vsel %vm1286_vm1, %v4656_v18, %v4658_v23  ;;  %v4661_v19 = vsel %vm1286_vm1, %v4658_v23, %v4660_v60 }
 0x16c   : > { %v4672_v23 = vrot.slane %v9430_v15, 1  ;;  %v2562_v15 = vrot.slane %v2560_v41, 1 }
 0x16d   : > { %7895 = vmatpush3.bf16.msra.mxu1 %v8631_v30  ;;  %v8633_v30 = vld [vmem:[%s8748_s20 + $0x74] sm:$0xff]  }
 0x16e   : > { %v2508_v37 = vshrl.u32 %v8633_v30, 16 }
 0x16f   : > { %7529 = vmatmul.mubr.bf16.gmra.mrb[16].mxu1 %v8579_v16  ;;  %v2504_v16 = vshll.u32 %v8633_v30, 16 }
 0x170   : > { %7809 = vmatmul.mubr.bf16.gmra.mrb[40].mxu0 %v4254_v43  ;;  %7532 = vmatprep.mubr.bf16.mxu1 %v8582_v31  ;;  %v4662_v43 = vrot.slane %v9389_v22, 1  ;;  %v4664_v22 = vrot.slane %v9401_v40, 1 }
 0x171   : > { %7812 = vmatprep.mubr.bf16.mxu0 %v4262_v13  ;;  %v2506_v31 = vrot.slane %v2504_v16, 1  ;;  %v2512_v13 = vshll.u32 %v8634_v52, 16  ;;  %v4676_v52 = vrot.slane %v9450_v9, 1 }
 0x173   : > { %v2507_v45 = vsel %vm474_vm0, %v2502_v2, %v2506_v31  ;;  %v2514_v24 = vrot.slane %v2512_v13, 1  ;;  %v2510_v12 = vor.u32 %v2508_v37, %v2506_v31  ;;  %v2564_v2 = vshrl.u32 %v8640_v44, 16  ;;  %v8641_v31 = vld [vmem:[%s8748_s20 + $0xb4] sm:$0xff]  }
 0x175   : > { %v2566_v13 = vor.u32 %v2564_v2, %v2562_v15 }
 0x177   : > { %7533 = vmatmul.mubr.bf16.gmra.mrb[20].mxu1 %v8584_v20  ;;  %v2520_v20 = vshll.u32 %v8635_v50, 16 }
 0x178   : > { %7813 = vmatmul.mubr.bf16.gmra.mrb[44].mxu0 %v4270_v51  ;;  %7536 = vmatprep.mubr.bf16.mxu1 %v8586_v3  ;;  %v4663_v3 = vsel %vm1286_vm1, %v4660_v60, %v4662_v43  ;;  %v2518_v51 = vor.u32 %v2516_v48, %v2514_v24 }
 0x179   : > { %7832 = vmatprep.mubr.bf16.mxu0 %v4639_v49  ;;  %v2522_v49 = vrot.slane %v2520_v20, 1  ;;  %v2572_v20 = vshrl.u32 %v8641_v31, 16 }
 0x17b   : > { %v2523_v14 = vsel %vm474_vm0, %v2518_v51, %v2522_v49 }
 0x17f   : > { %7537 = vmatmul.mubr.bf16.gmra.mrb[24].mxu1 %v8588_v26  ;;  %v2528_v26 = vshll.u32 %v8636_v55, 16 }
 0x180   : > { %7833 = vmatmul.mubr.bf16.vlgmr.msra.gmra.mrb[0].mxu0 %v4641_v46  ;;  %7540 = vmatprep.mubr.bf16.mxu1 %v8589_v42  ;;  %v2515_v42 = vsel %vm474_vm0, %v2510_v12, %v2514_v24  ;;  %v2524_v46 = vshrl.u32 %v8635_v50, 16 }
 0x181   : > { %7836 = vmatprep.mubr.bf16.mxu0 %v4643_v56  ;;  %v4665_v56 = vsel %vm1286_vm1, %v4662_v43, %v4664_v22  ;;  %v2530_v40 = vrot.slane %v2528_v26, 1  ;;  %v2568_v43 = vshll.u32 %v8641_v31, 16 }
 0x182   : > { %v2526_v0 = vor.u32 %v2524_v46, %v2522_v49 }
 0x183   : > { %v2534_v57 = vor.u32 %v2532_v54, %v2530_v40  ;;  %v2570_v37 = vrot.slane %v2568_v43, 1 }
 0x185   : > { %v2571_v24 = vsel %vm474_vm0, %v2566_v13, %v2570_v37 }
 0x187   : > { %7541 = vmatmul.mubr.bf16.gmra.mrb[28].mxu1 %v8590_v61  ;;  %v8637_v61 = vld [vmem:[%s8748_s20 + $0x94] sm:$0xff]  }
 0x188   : > { %7837 = vmatmul.mubr.bf16.gmra.mrb[4].mxu0 %v4645_v47  ;;  %7544 = vmatprep.mubr.bf16.mxu1 %v8591_v33  ;;  %v2536_v33 = vshll.u32 %v8637_v61, 16  ;;  %v4667_v47 = vsel %vm1286_vm1, %v4664_v22, %v4666_v21  ;;  %v2540_v8 = vshrl.u32 %v8637_v61, 16  ;;  %v8643_v22 = vld [vmem:[%s8748_s20 + $0xc4] sm:$0xff]  }
 0x189   : > { %7840 = vmatprep.mubr.bf16.mxu0 %v4647_v63  ;;  %v4668_v63 = vrot.slane %v9415_v34, 1  ;;  %v2584_v51 = vshll.u32 %v8643_v22, 16 }
 0x18a   : > { %v2538_v4 = vrot.slane %v2536_v33, 1 }
 0x18b   : > { %v4669_v10 = vsel %vm1286_vm1, %v4666_v21, %v4668_v63  ;;  %v4680_v21 = vrot.slane %v9470_v38, 1  ;;  %v2586_v26 = vrot.slane %v2584_v51, 1 }
 0x18f   : > { %7545 = vmatmul.mubr.bf16.gmra.mrb[32].mxu1 %v8592_v6  ;;  %v4670_v6 = vrot.slane %v9418_v62, 1  ;;  %v2542_v62 = vor.u32 %v2540_v8, %v2538_v4 }
 0x190   : > { %7841 = vmatmul.mubr.bf16.gmra.mrb[8].mxu0 %v4649_v5  ;;  %7548 = vmatprep.mubr.bf16.mxu1 %v8593_v58  ;;  %v8638_v58 = vld [vmem:[%s8748_s20 + $0x9c] sm:$0xff]  }
 0x191   : > { %7844 = vmatprep.mubr.bf16.mxu0 %v4651_v7  ;;  %v2544_v5 = vshll.u32 %v8638_v58, 16  ;;  %v2531_v7 = vsel %vm474_vm0, %v2526_v0, %v2530_v40  ;;  %v4671_v18 = vsel %vm1286_vm1, %v4668_v63, %v4670_v6  ;;  %v4684_v0 = vrot.slane %v9490_v29, 1 }
 0x193   : > { %v2546_v34 = vrot.slane %v2544_v5, 1 }
 0x195   : > { %v2547_v30 = vsel %vm474_vm0, %v2542_v62, %v2546_v34 }
 0x197   : > { %7549 = vmatmul.mubr.bf16.gmra.mrb[36].mxu1 %v8594_v11  ;;  %v2539_v11 = vsel %vm474_vm0, %v2534_v57, %v2538_v4  ;;  %v5031_v57 = vlaneseq }
 0x198   : > { %7845 = vmatmul.mubr.bf16.gmra.mrb[12].mxu0 %v4653_v1  ;;  %7552 = vmatprep.mubr.bf16.mxu1 %v8595_v25  ;;  %v2548_v25 = vshrl.u32 %v8638_v58, 16  ;;  %v8639_v1 = vld [vmem:[%s8748_s20 + $0xa4] sm:$0xff]  }
 0x199   : > { %7848 = vmatprep.mubr.bf16.mxu0 %v4655_v17  ;;  %v2552_v17 = vshll.u32 %v8639_v1, 16  ;;  %v2556_v16 = vshrl.u32 %v8639_v1, 16  ;;  %v9591_v4 = vshrl.u32 %v5031_v57, 7 }
 0x19b   : > { %v5036_v62 = vadd.s32 32, %v9591_v4 }
 0x19f   : > { %7553 = vmatmul.mubr.bf16.gmra.mrb[40].mxu1 %v8596_v36  ;;  %v2550_v36 = vor.u32 %v2548_v25, %v2546_v34  ;;  %v5033_v25 = vadd.s32 8, %v9591_v4 }
 0x1a0   : > { %7849 = vmatmul.mubr.bf16.gmra.mrb[16].mxu0 %v4657_v59  ;;  %7556 = vmatprep.mubr.bf16.mxu1 %v8597_v28  ;;  %v2554_v28 = vrot.slane %v2552_v17, 1  ;;  %v4674_v59 = vrot.slane %v9436_v27, 1  ;;  %v5038_v17 = vadd.s32 48, %v9591_v4 }
 0x1a1   : > { %7852 = vmatprep.mubr.bf16.mxu0 %v4659_v32  ;;  %v4673_v32 = vsel %vm1286_vm1, %v4670_v6, %v4672_v23  ;;  %v5034_v6 = vadd.s32 16, %v9591_v4 }
 0x1a2   : > { %v2555_v60 = vsel %vm474_vm0, %v2550_v36, %v2554_v28  ;;  %v2558_v27 = vor.u32 %v2556_v16, %v2554_v28  ;;  %v5039_v28 = vadd.s32 56, %v9591_v4 }
 0x1a3   : > { %v9594_v58 = vmul.u32.u64.low 2863311531, %v5034_v6  ;;  %v9595_v5 = vmul.u32.u64.high 2863311531, %v5034_v6, %v9594_v58  ;;  %v9615_v44 = vmul.u32.u64.low 2863311531, %v5038_v17  ;;  %v9616_v41 = vmul.u32.u64.high 2863311531, %v5038_v17, %v9615_v44 }
 0x1a4   : > { %v2563_v50 = vsel %vm474_vm0, %v2558_v27, %v2562_v15  ;;  %v9626_v31 = vmul.u32.u64.low 2863311531, %v5039_v28  ;;  %v9627_v43 = vmul.u32.u64.high 2863311531, %v5039_v28, %v9626_v31  ;;  %v9630_v15 = vadd.s32 80, %v9591_v4 }
 0x1a5   : > { %v5108_v1 = vshrl.u32 %v9595_v5, 4  ;;  %v11632_v58 = vmov 0 }
 0x1a6   : > { %v5163_v51 = vshrl.u32 %v9627_v43, 4 }
 0x1a7   : > { %7557 = vmatmul.mubr.bf16.gmra.mrb[44].mxu1 %v8598_v35  ;;  %v4675_v35 = vsel %vm1286_vm1, %v4672_v23, %v4674_v59  ;;  %v5109_v23 = vmul.u32 24, %v5108_v1 }
 0x1a8   : > { %7853 = vmatmul.mubr.bf16.gmra.mrb[20].mxu0 %v4661_v19  ;;  %7600 = vmatprep.mubr.bf16.mxu1 %v2507_v45  ;;  %v4678_v19 = vrot.slane %v9453_v39, 1  ;;  %v8642_v45 = vld [vmem:[%s8748_s20 + $0xbc] sm:$0xff]   ;;  %v2574_v39 = vor.u32 %v2572_v20, %v2570_v37 }
 0x1a9   : > { %7856 = vmatprep.mubr.bf16.mxu0 %v4663_v3  ;;  %v2576_v48 = vshll.u32 %v8642_v45, 16  ;;  %v4677_v3 = vsel %vm1286_vm1, %v4674_v59, %v4676_v52  ;;  %v2580_v12 = vshrl.u32 %v8642_v45, 16  ;;  %v5152_v45 = vshrl.u32 %v9616_v41, 4 }
 0x1aa   : > { %v4679_v49 = vsel %vm1286_vm1, %v4676_v52, %v4678_v19  ;;  %v4681_v61 = vsel %vm1286_vm1, %v4678_v19, %v4680_v21 }
 0x1ab   : > { %v2578_v9 = vrot.slane %v2576_v48, 1 }
 0x1ad   : > { %v2582_v55 = vor.u32 %v2580_v12, %v2578_v9  ;;  %v2579_v46 = vsel %vm474_vm0, %v2574_v39, %v2578_v9  ;;  %v5153_v9 = vmul.u32 24, %v5152_v45  ;;  %v9669_v39 = vadd.s32 72, %v9591_v4 }
 0x1ae   : > { %v11744_v12 = vmov 0 }
 0x1af   : > { %7601 = vmatmul.mubr.bf16.vlgmr.msra.gmra.mrb[24].mxu1 %v2515_v42  ;;  %v4682_v42 = vrot.slane %v9473_v53, 1  ;;  %v2587_v33 = vsel %vm474_vm0, %v2582_v55, %v2586_v26 }
 0x1b0   : > { %7857 = vmatmul.mubr.bf16.gmra.mrb[24].mxu0 %v4665_v56  ;;  %7604 = vmatprep.mubr.bf16.mxu1 %v2523_v14  ;;  %v2588_v56 = vshrl.u32 %v8643_v22, 16  ;;  %v8644_v14 = vld [vmem:[%s8748_s20 + $0xcc] ss:$0 sps:$4 sm:$0x11]   ;;  %v9658_v22 = vadd.s32 64, %v9591_v4  ;;  %s6888_s20 = sshll.u32 %s12043_s15, 7 }
 0x1b1   : > { %7860 = vmatprep.mubr.bf16.mxu0 %v4667_v47  ;;  %v2592_v54 = vshll.u32 %v8644_v14, 16  ;;  %v4683_v47 = vsel %vm1286_vm1, %v4680_v21, %v4682_v42  ;;  %v4685_v63 = vsel %vm1286_vm1, %v4682_v42, %v4684_v0  ;;  %v9701_v0 = vadd.s32 112, %v9591_v4  ;;  %s10665_s11 = scalar_lea.vmem %s11470_s2, %s6888_s20 }
 0x1b2   : > { %v2590_v40 = vor.u32 %v2588_v56, %v2586_v26 }
 0x1b3   : > { %v2594_v38 = vrot.slane %v2592_v54, 1 }
 0x1b5   : > { %v2595_v53 = vsel %vm474_vm0, %v2590_v40, %v2594_v38 }
 0x1b7   : > { %7605 = vmatmul.mubr.bf16.gmra.mrb[28].mxu1 %v2531_v7  ;;  %v5035_v7 = vadd.s32 24, %v9591_v4 }
 0x1b8   : > { %7861 = vmatmul.mubr.bf16.gmra.mrb[28].mxu0 %v4669_v10  ;;  %7608 = vmatprep.mubr.bf16.mxu1 %v2539_v11  ;;  %v9599_v8 = vmul.u32.u64.low 2863311531, %v9591_v4  ;;  %v9600_v10 = vmul.u32.u64.high 2863311531, %v9591_v4, %v9599_v8 }
 0x1b9   : > { %7864 = vmatprep.mubr.bf16.mxu0 %v4671_v18  ;;  %v9602_v29 = vmul.u32.u64.low 2863311531, %v5035_v7  ;;  %v9603_v11 = vmul.u32.u64.high 2863311531, %v5035_v7, %v9602_v29  ;;  %v9608_v18 = vmul.u32.u64.low 2863311531, %v5033_v25  ;;  %v9609_v34 = vmul.u32.u64.high 2863311531, %v5033_v25, %v9608_v18 }
 0x1ba   : > { %v5086_v36 = vshrl.u32 %v9600_v10, 4  ;;  %v9726_v29 = vadd.s32 120, %v9591_v4 }
 0x1bb   : > { %v5119_v59 = vshrl.u32 %v9603_v11, 4  ;;  %v5097_v27 = vshrl.u32 %v9609_v34, 4  ;;  %v9740_v34 = vadd.s32 104, %v9591_v4 }
 0x1bc   : > { %v5087_v2 = vmul.u32 24, %v5086_v36  ;;  %v9748_v36 = vadd.s32 144, %v9591_v4  ;;  %v9755_v44 = vmul.u32.u64.low 2863311531, %v9726_v29  ;;  %v9756_v41 = vmul.u32.u64.high 2863311531, %v9726_v29, %v9755_v44 }
 0x1bd   : > { %v9775_v31 = vmul.u32.u64.low 2863311531, %v9740_v34  ;;  %v9776_v43 = vmul.u32.u64.high 2863311531, %v9740_v34, %v9775_v31 }
 0x1be   : > { %v9640_v37 = vsub.s32 %v9591_v4, %v5087_v2 }
 0x1bf   : > { %7609 = vmatmul.mubr.bf16.gmra.mrb[32].mxu1 %v2547_v30  ;;  %v9618_v30 = vmul.u32.u64.low 2863311531, %v5036_v62  ;;  %v9619_v16 = vmul.u32.u64.high 2863311531, %v5036_v62, %v9618_v30 }
 0x1c0   : > { %7865 = vmatmul.mubr.bf16.gmra.mrb[32].mxu0 %v4673_v32  ;;  %7612 = vmatprep.mubr.bf16.mxu1 %v2555_v60  ;;  %v9622_v32 = vadd.s32 40, %v9591_v4  ;;  %v9624_v60 = vsub.s32 %v5034_v6, %v5109_v23  ;;  %vm5608_vm5 = vcmp.ne.s32.totalorder %v9640_v37, 0  ;;  %vm5656_vm6 = vcmp.lt.s32.totalorder %v9640_v37, 0 }
 0x1c1   : > { %7868 = vmatprep.mubr.bf16.mxu0 %v4675_v35  ;;  %v5120_v35 = vmul.u32 24, %v5119_v59  ;;  %v9676_v55 = vadd.s32 24, %v9640_v37  ;;  %vm9680_vm9 = vmand %vm5656_vm6, %vm5608_vm5  ;;  %v9707_v57 = vmul.u32.u64.low 2863311531, %v9669_v39  ;;  %v9708_v6 = vmul.u32.u64.high 2863311531, %v9669_v39, %v9707_v57 }
 0x1c2   : > { %v9634_v52 = vmul.u32.u64.low 2863311531, %v9622_v32  ;;  %v9635_v13 = vmul.u32.u64.high 2863311531, %v9622_v32, %v9634_v52  ;;  %vm5610_vm2 = vcmp.ne.s32.totalorder %v9624_v60, 0  ;;  %vm5658_vm3 = vcmp.lt.s32.totalorder %v9624_v60, 0 }
 0x1c3   : > { %v9642_v19 = vsub.s32 %v5035_v7, %v5120_v35  ;;  %v9650_v20 = vadd.s32 24, %v9624_v60  ;;  %vm9653_vm4 = vmand %vm5658_vm3, %vm5610_vm2  ;;  %v9718_v7 = vadd.s32 96, %v9591_v4  ;;  %v11582_v30 = vmov 0 }
 0x1c4   : > { %v5141_v14 = vshrl.u32 %v9635_v13, 4  ;;  %v5185_v2 = vshrl.u32 %v9708_v6, 4  ;;  %v11585_v35 = vmov 0  ;;  %v11593_v57 = vmov 0 }
 0x1c5   : > { %vm5611_vm7 = vcmp.ne.s32.totalorder %v9642_v19, 0  ;;  %vm5659_vm8 = vcmp.lt.s32.totalorder %v9642_v19, 0  ;;  %v9685_v56 = vadd.s32 24, %v9642_v19 }
 0x1c6   : > { %vm9692_vm10 = vmand %vm5659_vm8, %vm5611_vm7  ;;  %v5142_v10 = vmul.u32 24, %v5141_v14  ;;  %v9793_v52 = vmul.u32.u64.low 2863311531, %v9748_v36  ;;  %v9794_v13 = vmul.u32.u64.high 2863311531, %v9748_v36, %v9793_v52 }
 0x1c7   : > { %7613 = vmatmul.mubr.bf16.gmra.mrb[36].mxu1 %v2563_v50  ;;  %v9646_v48 = vmul.u32.u64.low 2863311531, %v9630_v15  ;;  %v9647_v50 = vmul.u32.u64.high 2863311531, %v9630_v15, %v9646_v48  ;;  %v5186_v14 = vmul.u32 24, %v5185_v2  ;;  %v9886_v52 = vadd.s32 136, %v9591_v4 }
 0x1c8   : > { %7869 = vmatmul.mubr.bf16.gmra.mrb[36].mxu0 %v4677_v3  ;;  %7616 = vmatprep.mubr.bf16.mxu1 %v2571_v24  ;;  %v5098_v3 = vmul.u32 24, %v5097_v27  ;;  %v5130_v24 = vshrl.u32 %v9619_v16, 4  ;;  %v11587_v48 = vmov 0  ;;  %v5284_v31 = vshrl.u32 %v9794_v13, 4 }
 0x1c9   : > { %7872 = vmatprep.mubr.bf16.mxu0 %v4679_v49  ;;  %v9664_v49 = vadd.s32 88, %v9591_v4  ;;  %v9873_v44 = vsub.s32 %v9669_v39, %v5186_v14 }
 0x1ca   : > { %v9678_v26 = vsub.s32 %v5033_v25, %v5098_v3  ;;  %v5131_v42 = vmul.u32 24, %v5130_v24  ;;  %v11590_v24 = vmov 0 }
 0x1cb   : > { %v9697_v40 = vmul.u32.u64.low 2863311531, %v9664_v49  ;;  %v9698_v38 = vmul.u32.u64.high 2863311531, %v9664_v49, %v9697_v40  ;;  %11601 = vst [vmem:[#allocation11_spill] sm:$0xff] %v9873_v44 }
 0x1cc   : > { %vm5609_vm11 = vcmp.ne.s32.totalorder %v9678_v26, 0  ;;  %v9715_v5 = vsub.s32 %v5036_v62, %v5131_v42  ;;  %vm5657_vm12 = vcmp.lt.s32.totalorder %v9678_v26, 0  ;;  %v9729_v11 = vadd.s32 24, %v9678_v26 }
 0x1cd   : > { %v9744_v62 = vmul.u32.u64.low 2863311531, %v9718_v7  ;;  %v9745_v23 = vmul.u32.u64.high 2863311531, %v9718_v7, %v9744_v62  ;;  %vm9762_vm0 = vmand %vm5657_vm12, %vm5609_vm11  ;;  %v5207_v16 = vshrl.u32 %v9698_v38, 4  ;;  %v9821_v42 = vadd.s32 128, %v9591_v4 }
 0x1ce   : > { %vm5612_vm15 = vcmp.ne.s32.totalorder %v9715_v5, 0  ;;  %v11583_v30 = vsel %vm9762_vm0, 4294967295, %v11582_v30  ;;  %vm5660_vm1 = vcmp.lt.s32.totalorder %v9715_v5, 0 }
 0x1cf   : > { %7617 = vmatmul.mubr.bf16.gmra.mrb[40].mxu1 %v2579_v46  ;;  %vm9802_vm6 = vmand %vm5660_vm1, %vm5612_vm15  ;;  %v5218_v38 = vshrl.u32 %v9745_v23, 4 }
 0x1d0   : > { %7873 = vmatmul.mubr.bf16.gmra.mrb[40].mxu0 %v4681_v61  ;;  %7620 = vmatprep.mubr.bf16.mxu1 %v2587_v33  ;;  %v9689_v54 = vmul.u32.u64.low 2863311531, %v9658_v22  ;;  %v9690_v61 = vmul.u32.u64.high 2863311531, %v9658_v22, %v9689_v54  ;;  %v11578_v33 = vmov 0  ;;  %v11588_v48 = vsel %vm9802_vm6, 4294967295, %v11587_v48 }
 0x1d1   : > { %7876 = vmatprep.mubr.bf16.mxu0 %v4683_v47  ;;  %v11579_v33 = vsel %vm9692_vm10, 4294967295, %v11578_v33  ;;  %v5164_v47 = vmul.u32 24, %v5163_v51  ;;  %v5208_v51 = vmul.u32 24, %v5207_v16  ;;  %v9826_v54 = vadd.s32 152, %v9591_v4 }
 0x1d2   : > { %v5174_v59 = vshrl.u32 %v9690_v61, 4  ;;  %v5219_v2 = vmul.u32 24, %v5218_v38 }
 0x1d3   : > { %v9731_v25 = vsub.s32 %v5039_v28, %v5164_v47  ;;  %v9751_v28 = vsub.s32 %v9622_v32, %v5142_v10 }
 0x1d4   : > { %v5175_v3 = vmul.u32 24, %v5174_v59  ;;  %v9869_v23 = vmul.u32.u64.low 2863311531, %v9821_v42  ;;  %v9870_v59 = vmul.u32.u64.high 2863311531, %v9821_v42, %v9869_v23  ;;  %v9910_v38 = vsub.s32 %v9718_v7, %v5219_v2 }
 0x1d5   : > { %11580 = vst [vmem:[#allocation2_spill] sm:$0xff] %v9731_v25  ;;  %11581 = vst [vmem:[#allocation3_spill] sm:$0xff] %v9751_v28  ;;  %vm5615_vm2 = vcmp.ne.s32.totalorder %v9731_v25, 0  ;;  %vm5663_vm3 = vcmp.lt.s32.totalorder %v9731_v25, 0  ;;  %vm5613_vm7 = vcmp.ne.s32.totalorder %v9751_v28, 0  ;;  %vm5661_vm11 = vcmp.lt.s32.totalorder %v9751_v28, 0 }
 0x1d6   : > { %vm9814_vm8 = vmand %vm5663_vm3, %vm5615_vm2  ;;  %v9837_v40 = vadd.s32 24, %v9751_v28  ;;  %v9856_v10 = vsub.s32 %v9658_v22, %v5175_v3  ;;  %v5229_v22 = vshrl.u32 %v9776_v43, 4  ;;  %v9894_v3 = vadd.s32 176, %v9591_v4  ;;  %11604 = vst [vmem:[#allocation14_spill] sm:$0xff] %v9910_v38 }
 0x1d7   : > { %7621 = vmatmul.mubr.bf16.gmra.mrb[44].mxu1 %v2595_v53  ;;  %v9703_v53 = vsub.s32 %v5038_v17, %v5153_v9  ;;  %v9734_v1 = vmul.u32.u64.low 2863311531, %v9701_v0  ;;  %v9735_v17 = vmul.u32.u64.high 2863311531, %v9701_v0, %v9734_v1  ;;  %v11591_v24 = vsel %vm9814_vm8, 4294967295, %v11590_v24 }
 0x1d8   : > { %7877 = vmatmul.mubr.bf16.gmra.mrb[44].mxu0 %v4685_v63  ;;  %v5196_v63 = vshrl.u32 %v9647_v50, 4  ;;  %v9807_v50 = vadd.s32 24, %v9731_v25  ;;  %11592 = vst [vmem:[#allocation6_spill] sm:$0xff] %v11591_v24  ;;  %11596 = vst [vmem:[#allocation8_spill] sm:$0xff] %v9856_v10  ;;  %v5251_v1 = vshrl.u32 %v9756_v41, 4  ;;  %vm5616_vm1 = vcmp.ne.s32.totalorder %v9856_v10, 0 }
 0x1d9   : > { %vm5614_vm13 = vcmp.ne.s32.totalorder %v9703_v53, 0  ;;  %vm5662_vm14 = vcmp.lt.s32.totalorder %v9703_v53, 0  ;;  %v9787_v27 = vadd.s32 24, %v9703_v53  ;;  %v5240_v9 = vshrl.u32 %v9735_v17, 4 }
 0x1da   : > { %v5197_v18 = vmul.u32 24, %v5196_v63  ;;  %vm9782_vm5 = vmand %vm5662_vm14, %vm5614_vm13  ;;  %11589 = vst [vmem:[#allocation5_spill] sm:$0xff] %v9807_v50  ;;  %v11597_v17 = vmov 0  ;;  %v9877_v41 = vmul.u32.u64.low 2863311531, %v9826_v54  ;;  %v9878_v16 = vmul.u32.u64.high 2863311531, %v9826_v54, %v9877_v41 }
 0x1db   : > { %v11586_v35 = vsel %vm9782_vm5, 4294967295, %v11585_v35  ;;  %vm9848_vm14 = vmand %vm5661_vm11, %vm5613_vm7  ;;  %v5241_v62 = vmul.u32 24, %v5240_v9  ;;  %v5252_v43 = vmul.u32 24, %v5251_v1  ;;  %vm5664_vm2 = vcmp.lt.s32.totalorder %v9856_v10, 0 }
 0x1dc   : > { %v9771_v32 = vsub.s32 %v9630_v15, %v5197_v18  ;;  %v9790_v15 = vadd.s32 24, %v9715_v5  ;;  %v11594_v57 = vsel %vm9848_vm14, 4294967295, %v11593_v57  ;;  %v9866_v18 = vsub.s32 %v9664_v49, %v5208_v51 }
 0x1dd   : > { %v9898_v51 = vadd.s32 24, %v9856_v10  ;;  %v9901_v13 = vsub.s32 %v9701_v0, %v5241_v62  ;;  %v9904_v9 = vadd.s32 160, %v9591_v4  ;;  %v5230_v14 = vmul.u32 24, %v5229_v22 }
 0x1de   : > { %11584 = vst [vmem:[#allocation4_spill] sm:$0xff] %v9771_v32  ;;  %vm5618_vm12 = vcmp.ne.s32.totalorder %v9771_v32, 0  ;;  %vm5666_vm13 = vcmp.lt.s32.totalorder %v9771_v32, 0  ;;  %v9853_v6 = vadd.s32 24, %v9771_v32  ;;  %11600 = vst [vmem:[#allocation10_spill] sm:$0xff] %v9866_v18  ;;  %vm5619_vm3 = vcmp.ne.s32.totalorder %v9866_v18, 0 }
 0x1df   : > { %vm9861_vm15 = vmand %vm5666_vm13, %vm5618_vm12  ;;  %11602 = vst [vmem:[#allocation12_spill] sm:$0xff] %v9898_v51  ;;  %vm5667_vm7 = vcmp.lt.s32.totalorder %v9866_v18, 0  ;;  %v5285_v1 = vmul.u32 24, %v5284_v31  ;;  %v9913_v23 = vmul.u32.u64.low 2863311531, %v9886_v52  ;;  %v9914_v41 = vmul.u32.u64.high 2863311531, %v9886_v52, %v9913_v23 }
 0x1e0   : > { %11595 = vst [vmem:[#allocation7_spill] sm:$0xff] %v9853_v6  ;;  %v11598_v17 = vsel %vm9861_vm15, 4294967295, %v11597_v17  ;;  %11603 = vst [vmem:[#allocation13_spill] sm:$0xff] %v9901_v13  ;;  %v9918_v0 = vsub.s32 %v9726_v29, %v5252_v43  ;;  %v9921_v62 = vmul.u32.u64.low 2863311531, %v9894_v3  ;;  %v9922_v39 = vmul.u32.u64.high 2863311531, %v9894_v3, %v9921_v62 }
 0x1e1   : > { %11599 = vst [vmem:[#allocation9_spill] sm:$0xff] %v11598_v17  ;;  %v9928_v7 = vmul.u32.u64.low 2863311531, %v9904_v9  ;;  %v9929_v22 = vmul.u32.u64.high 2863311531, %v9904_v9, %v9928_v7  ;;  %v9932_v2 = vadd.s32 184, %v9591_v4  ;;  %vm9940_vm12 = vmand %vm5664_vm2, %vm5616_vm1  ;;  %v11606_v29 = vmov 0 }
 0x1e2   : > { %11605 = vst [vmem:[#allocation15_spill] sm:$0xff] %v9918_v0  ;;  %v11607_v29 = vsel %vm9940_vm12, 4294967295, %v11606_v29  ;;  %v9946_v43 = vsub.s32 %v9740_v34, %v5230_v14  ;;  %v5262_v23 = vshrl.u32 %v9870_v59, 4  ;;  %v5295_v62 = vshrl.u32 %v9878_v16, 4  ;;  %vm9956_vm13 = vmand %vm5667_vm7, %vm5619_vm3 }
 0x1e3   : > { %11608 = vst [vmem:[#allocation16_spill] sm:$0xff] %v11607_v29  ;;  %v11610_v49 = vmov 0  ;;  %v9961_v61 = vadd.s32 24, %v9866_v18  ;;  %v9966_v34 = vsub.s32 %v9748_v36, %v5285_v1  ;;  %vm11616_vm11 = vcmp.ne.s32.totalorder %v9873_v44, 0 }
 0x1e4   : > { %11609 = vst [vmem:[#allocation17_spill] sm:$0xff] %v9946_v43  ;;  %v11611_v49 = vsel %vm9956_vm13, 4294967295, %v11610_v49  ;;  %vm11617_vm15 = vcmp.lt.s32.totalorder %v9873_v44, 0  ;;  %v11618_v16 = vmov 0  ;;  %v9979_v14 = vadd.s32 24, %v9873_v44 }
 0x1e5   : > { %11612 = vst [vmem:[#allocation18_spill] sm:$0xff] %v11611_v49  ;;  %11613 = vst [vmem:[#allocation19_spill] sm:$0xff] %v9961_v61  ;;  %v9982_v47 = vadd.s32 24, %v9901_v13  ;;  %vm5623_vm7 = vcmp.ne.s32.totalorder %v9918_v0, 0  ;;  %vm5671_vm2 = vcmp.lt.s32.totalorder %v9918_v0, 0  ;;  %vm11623_vm1 = vcmp.ne.s32.totalorder %v9901_v13, 0 }
 0x1e6   : > { %11614 = vst [vmem:[#allocation20_spill] sm:$0xff] %v9966_v34  ;;  %vm9974_vm3 = vmand %vm11617_vm15, %vm11616_vm11  ;;  %vm11624_vm8 = vcmp.lt.s32.totalorder %v9901_v13, 0  ;;  %v11625_v36 = vmov 0  ;;  %v9995_v1 = vadd.s32 24, %v9910_v38  ;;  %v9998_v8 = vadd.s32 24, %v9918_v0 }
 0x1e7   : > { %v11619_v16 = vsel %vm9974_vm3, 4294967295, %v11618_v16  ;;  %11621 = vst [vmem:[#allocation23_spill] sm:$0xff] %v9979_v14  ;;  %11622 = vst [vmem:[#allocation24_spill] sm:$0xff] %v9982_v47  ;;  %v10001_v45 = vmul.u32.u64.low 2863311531, %v9932_v2  ;;  %v10002_v21 = vmul.u32.u64.high 2863311531, %v9932_v2, %v10001_v45  ;;  %vm11630_vm15 = vcmp.ne.s32.totalorder %v9910_v38, 0 }
 0x1e8   : > { %11620 = vst [vmem:[#allocation22_spill] sm:$0xff] %v11619_v16  ;;  %vm9990_vm14 = vmand %vm11624_vm8, %vm11623_vm1  ;;  %vm11631_vm11 = vcmp.lt.s32.totalorder %v9910_v38, 0  ;;  %vm5621_vm8 = vcmp.ne.s32.totalorder %v9946_v43, 0  ;;  %vm5669_vm1 = vcmp.lt.s32.totalorder %v9946_v43, 0  ;;  %v5263_v32 = vmul.u32 24, %v5262_v23 }
 0x1e9   : > { %v11626_v36 = vsel %vm9990_vm14, 4294967295, %v11625_v36  ;;  %11628 = vst [vmem:[#allocation26_spill] sm:$0xff] %v9995_v1  ;;  %11629 = vst [vmem:[#allocation27_spill] sm:$0xff] %v9998_v8  ;;  %v5296_v6 = vmul.u32 24, %v5295_v62  ;;  %v11635_v17 = vmov 0  ;;  %vm5626_vm10 = vcmp.ne.s32.totalorder %v9966_v34, 0 }
 0x1ea   : > { %11627 = vst [vmem:[#allocation25_spill] sm:$0xff] %v11626_v36  ;;  %vm10008_vm5 = vmand %vm11631_vm11, %vm11630_vm15  ;;  %vm5674_vm0 = vcmp.lt.s32.totalorder %v9966_v34, 0  ;;  %v5273_v45 = vshrl.u32 %v9914_v41, 4  ;;  %v10022_v25 = vadd.s32 168, %v9591_v4  ;;  %v5328_v62 = vshrl.u32 %v9922_v39, 4 }
 0x1eb   : > { %v11633_v58 = vsel %vm10008_vm5, 4294967295, %v11632_v58  ;;  %vm10014_vm6 = vmand %vm5671_vm2, %vm5623_vm7  ;;  %v10034_v24 = vadd.s32 208, %v9591_v4  ;;  %v11639_v50 = vmov 0  ;;  %v10049_v23 = vadd.s32 24, %v9946_v43 }
 0x1ec   : > { %11634 = vst [vmem:[#allocation28_spill] sm:$0xff] %v11633_v58  ;;  %v11636_v17 = vsel %vm10014_vm6, 4294967295, %v11635_v17  ;;  %vm10044_vm2 = vmand %vm5669_vm1, %vm5621_vm8  ;;  %v10052_v39 = vadd.s32 24, %v9966_v34  ;;  %v5306_v18 = vshrl.u32 %v9929_v22, 4  ;;  %v11645_v22 = vmov 0 }
 0x1ed   : > { %11637 = vst [vmem:[#allocation29_spill] sm:$0xff] %v11636_v17  ;;  %v11640_v50 = vsel %vm10044_vm2, 4294967295, %v11639_v50  ;;  %11642 = vst [vmem:[#allocation32_spill] sm:$0xff] %v10049_v23  ;;  %v10078_v41 = vsub.s32 %v9821_v42, %v5263_v32  ;;  %v10083_v49 = vsub.s32 %v9826_v54, %v5296_v6  ;;  %v5274_v47 = vmul.u32 24, %v5273_v45 }
 0x1ee   : > { %11641 = vst [vmem:[#allocation31_spill] sm:$0xff] %v11640_v50  ;;  %11643 = vst [vmem:[#allocation33_spill] sm:$0xff] %v10052_v39  ;;  %v10086_v17 = vmul.u32.u64.low 2863311531, %v10022_v25  ;;  %v10087_v44 = vmul.u32.u64.high 2863311531, %v10022_v25, %v10086_v17  ;;  %v5329_v8 = vmul.u32 24, %v5328_v62  ;;  %v10096_v32 = vadd.s32 192, %v9591_v4 }
 0x1ef   : > { %vm10073_vm7 = vmand %vm5674_vm0, %vm5626_vm10  ;;  %11648 = vst [vmem:[#allocation36_spill] sm:$0xff] %v10078_v41  ;;  %v10092_v36 = vmul.u32.u64.low 2863311531, %v10034_v24  ;;  %v10093_v38 = vmul.u32.u64.high 2863311531, %v10034_v24, %v10092_v36  ;;  %v5307_v6 = vmul.u32 24, %v5306_v18  ;;  %v5339_v17 = vshrl.u32 %v10002_v21, 4 }
 0x1f0   : > { %v11646_v22 = vsel %vm10073_vm7, 4294967295, %v11645_v22  ;;  %11650 = vst [vmem:[#allocation38_spill] sm:$0xff] %v10083_v49  ;;  %vm5624_vm10 = vcmp.ne.s32.totalorder %v10078_v41, 0  ;;  %vm5672_vm0 = vcmp.lt.s32.totalorder %v10078_v41, 0  ;;  %v10110_v36 = vadd.s32 216, %v9591_v4 }
 0x1f1   : > { %11647 = vst [vmem:[#allocation35_spill] sm:$0xff] %v11646_v22  ;;  %v10113_v45 = vadd.s32 200, %v9591_v4  ;;  %v10116_v62 = vadd.s32 24, %v10078_v41  ;;  %v10121_v18 = vsub.s32 %v9886_v52, %v5274_v47  ;;  %v10124_v21 = vadd.s32 24, %v10083_v49  ;;  %vm10190_vm15 = vmand %vm5672_vm0, %vm5624_vm10 }
 0x1f2   : > { %v10127_v54 = vsub.s32 %v9894_v3, %v5329_v8  ;;  %v10130_v42 = vmul.u32.u64.low 2863311531, %v10096_v32  ;;  %v10131_v34 = vmul.u32.u64.high 2863311531, %v10096_v32, %v10130_v42  ;;  %v10136_v22 = vsub.s32 %v9904_v9, %v5307_v6 }
 0x1f3   : > { %11652 = vst [vmem:[#allocation40_spill] sm:$0xff] %v10116_v62  ;;  %11653 = vst [vmem:[#allocation41_spill] sm:$0xff] %v10124_v21  ;;  %v5340_v43 = vmul.u32 24, %v5339_v17  ;;  %v10139_v23 = vadd.s32 240, %v9591_v4  ;;  %v10142_v47 = vadd.s32 224, %v9591_v4  ;;  %v5317_v9 = vshrl.u32 %v10087_v44, 4 }
 0x1f4   : > { %11654 = vst [vmem:[#allocation42_spill] sm:$0xff] %v10127_v54  ;;  %11656 = vst [vmem:[#allocation44_spill] sm:$0xff] %v10136_v22  ;;  %v10147_v8 = vmul.u32.u64.low 2863311531, %v10110_v36  ;;  %v10148_v3 = vmul.u32.u64.high 2863311531, %v10110_v36, %v10147_v8  ;;  %v10151_v42 = vmul.u32.u64.low 2863311531, %v10113_v45  ;;  %v10152_v50 = vmul.u32.u64.high 2863311531, %v10113_v45, %v10151_v42 }
 0x1f5   : > { %v10160_v6 = vadd.s32 248, %v9591_v4  ;;  %v5372_v8 = vshrl.u32 %v10093_v38, 4  ;;  %v10170_v42 = vadd.s32 272, %v9591_v4  ;;  %v10184_v38 = vsub.s32 %v9932_v2, %v5340_v43 }
 0x1f6   : > { %v10199_v14 = vadd.s32 256, %v9591_v4  ;;  %vm11663_vm8 = vcmp.ne.s32.totalorder %v10083_v49, 0  ;;  %vm11664_vm11 = vcmp.lt.s32.totalorder %v10083_v49, 0  ;;  %v11665_v2 = vmov 0 }
 0x1f7   : > { %11660 = vst [vmem:[#allocation48_spill] sm:$0xff] %v10184_v38  ;;  %vm10205_vm1 = vmand %vm11664_vm11, %vm11663_vm8  ;;  %v5373_v43 = vmul.u32 24, %v5372_v8  ;;  %v5350_v16 = vshrl.u32 %v10131_v34, 4  ;;  %vm11669_vm10 = vcmp.ne.s32.totalorder %v10121_v18, 0  ;;  %vm11670_vm0 = vcmp.lt.s32.totalorder %v10121_v18, 0 }
 0x1f8   : > { %v11666_v2 = vsel %vm10205_vm1, 4294967295, %v11665_v2  ;;  %vm10220_vm7 = vmand %vm11670_vm0, %vm11669_vm10  ;;  %v10225_v10 = vadd.s32 24, %v10121_v18  ;;  %v10228_v8 = vadd.s32 24, %v10127_v54  ;;  %vm11675_vm11 = vcmp.ne.s32.totalorder %v10127_v54, 0 }
 0x1f9   : > { %11667 = vst [vmem:[#allocation49_spill] sm:$0xff] %v11666_v2  ;;  %v10231_v34 = vmul.u32.u64.low 2863311531, %v10170_v42  ;;  %v10232_v51 = vmul.u32.u64.high 2863311531, %v10170_v42, %v10231_v34  ;;  %vm11676_vm8 = vcmp.lt.s32.totalorder %v10127_v54, 0  ;;  %v11677_v29 = vmov 0 }
 0x1fa   : > { %11673 = vst [vmem:[#allocation51_spill] sm:$0xff] %v10228_v8  ;;  %vm10244_vm10 = vmand %vm11676_vm8, %vm11675_vm11  ;;  %v5383_v34 = vshrl.u32 %v10148_v3, 4  ;;  %vm11681_vm0 = vcmp.ne.s32.totalorder %v10136_v22, 0  ;;  %vm11682_vm11 = vcmp.lt.s32.totalorder %v10136_v22, 0  ;;  %v11683_v41 = vmov 0 }
 0x1fb   : > { %v11678_v29 = vsel %vm10244_vm10, 4294967295, %v11677_v29  ;;  %vm10263_vm8 = vmand %vm11682_vm11, %vm11681_vm0  ;;  %vm5679_vm1 = vcmp.lt.s32.totalorder %v10184_v38, 0  ;;  %v5351_v49 = vmul.u32 24, %v5350_v16  ;;  %v10296_v16 = vadd.s32 24, %v10184_v38 }
 0x1fc   : > { %11679 = vst [vmem:[#allocation53_spill] sm:$0xff] %v11678_v29  ;;  %v11684_v41 = vsel %vm10263_vm8, 4294967295, %v11683_v41  ;;  %vm11733_vm14 = vnez %v11583_v30 }
 0x1fd   : > { %11687 = vst [vmem:[#allocation57_spill] sm:$0xff] %v10296_v16 }
 0x222   : > { %v9924_v63 = vpop.f32.mrb[0].mxu1 }
 0x223   : > { %v9934_v31 = vpop.f32.mrb[1].mxu1 }
 0x224   : > { %v9950_v7 = vpop.f32.mrb[2].mxu1 }
 0x225   : > { %v9968_v59 = vpop.f32.mrb[3].mxu1 }
 0x226   : > { %11615 = vst [vmem:[#allocation21_spill] sm:$0xff] %v9968_v59 }
 0x22a   : > { %v10036_v59 = vpop.f32.mrb[4].mxu1 }
 0x22b   : > { %11638 = vst [vmem:[#allocation30_spill] sm:$0xff] %v10036_v59  ;;  %v10055_v61 = vpop.f32.mrb[5].mxu1  ;;  %v10249_v59 = vadd.s32 24, %v10136_v22 }
 0x22c   : > { %11644 = vst [vmem:[#allocation34_spill] sm:$0xff] %v10055_v61  ;;  %v10080_v13 = vpop.f32.mrb[6].mxu1 }
 0x22d   : > { %11649 = vst [vmem:[#allocation37_spill] sm:$0xff] %v10080_v13  ;;  %v10089_v0 = vpop.f32.mrb[7].mxu1 }
 0x22e   : > { %11651 = vst [vmem:[#allocation39_spill] sm:$0xff] %v10089_v0 }
 0x232   : > { %v10133_v39 = vpop.f32.mrb[8].mxu1 }
 0x233   : > { %11655 = vst [vmem:[#allocation43_spill] sm:$0xff] %v10133_v39  ;;  %v10144_v52 = vpop.f32.mrb[9].mxu1  ;;  %v10177_v44 = vmul.u32.u64.low 2863311531, %v10142_v47  ;;  %v10178_v39 = vmul.u32.u64.high 2863311531, %v10142_v47, %v10177_v44 }
 0x234   : > { %11657 = vst [vmem:[#allocation45_spill] sm:$0xff] %v10144_v52  ;;  %v10154_v1 = vpop.f32.mrb[10].mxu1  ;;  %v10167_v52 = vadd.s32 232, %v9591_v4  ;;  %v10195_v44 = vmul.u32.u64.low 2863311531, %v10160_v6  ;;  %v10196_v0 = vmul.u32.u64.high 2863311531, %v10160_v6, %v10195_v44 }
 0x235   : > { %11658 = vst [vmem:[#allocation46_spill] sm:$0xff] %v10154_v1  ;;  %v10162_v17 = vpop.f32.mrb[11].mxu1  ;;  %v10173_v1 = vmul.u32.u64.low 2863311531, %v10139_v23  ;;  %v10174_v58 = vmul.u32.u64.high 2863311531, %v10139_v23, %v10173_v1  ;;  %v11671_v44 = vmov 0  ;;  %v5394_v21 = vshrl.u32 %v10178_v39, 4 }
 0x236   : > { %11659 = vst [vmem:[#allocation47_spill] sm:$0xff] %v10162_v17  ;;  %v11661_v17 = vmov 0  ;;  %v5318_v1 = vmul.u32 24, %v5317_v9  ;;  %v10211_v9 = vmul.u32.u64.low 2863311531, %v10167_v52  ;;  %v10212_v13 = vmul.u32.u64.high 2863311531, %v10167_v52, %v10211_v9 }
 0x237   : > { %v11662_v17 = vsel %vm10190_vm15, 4294967295, %v11661_v17  ;;  %v11672_v44 = vsel %vm10220_vm7, 4294967295, %v11671_v44  ;;  %vm5631_vm15 = vcmp.ne.s32.totalorder %v10184_v38, 0  ;;  %v10306_v39 = vadd.s32 280, %v9591_v4 }
 0x238   : > { %v10268_v62 = vsub.s32 %v10022_v25, %v5318_v1  ;;  %vm10298_vm0 = vmand %vm5679_vm1, %vm5631_vm15  ;;  %v11688_v25 = vmov 0  ;;  %v5395_v8 = vmul.u32 24, %v5394_v21 }
 0x239   : > { %v11689_v25 = vsel %vm10298_vm0, 4294967295, %v11688_v25 }
 0x23a   : > { %v10214_v61 = vpop.f32.mrb[12].mxu1  ;;  %11685 = vst [vmem:[#allocation55_spill] sm:$0xff] %v10268_v62  ;;  %11690 = vst [vmem:[#allocation58_spill] sm:$0xff] %v11689_v25  ;;  %vm5629_vm11 = vcmp.ne.s32.totalorder %v10268_v62, 0  ;;  %vm5677_vm10 = vcmp.lt.s32.totalorder %v10268_v62, 0 }
 0x23b   : > { %11668 = vst [vmem:[#allocation50_spill] sm:$0xff] %v10214_v61  ;;  %v10234_v9 = vpop.f32.mrb[13].mxu1  ;;  %v10279_v61 = vsub.s32 %v10034_v24, %v5373_v43  ;;  %v5384_v43 = vmul.u32 24, %v5383_v34  ;;  %v10311_v34 = vsub.s32 %v10096_v32, %v5351_v49  ;;  %v10317_v24 = vadd.s32 24, %v10268_v62  ;;  %vm10330_vm15 = vmand %vm5677_vm10, %vm5629_vm11 }
 0x23c   : > { %11674 = vst [vmem:[#allocation52_spill] sm:$0xff] %v10234_v9  ;;  %v5361_v9 = vshrl.u32 %v10152_v50, 4  ;;  %v10253_v28 = vpop.f32.mrb[14].mxu1  ;;  %v10271_v50 = vmul.u32.u64.low 2863311531, %v10199_v14  ;;  %v10272_v3 = vmul.u32.u64.high 2863311531, %v10199_v14, %v10271_v50  ;;  %v11691_v49 = vmov 0 }
 0x23d   : > { %11680 = vst [vmem:[#allocation54_spill] sm:$0xff] %v10253_v28  ;;  %v10274_v28 = vpop.f32.mrb[15].mxu1  ;;  %11686 = vst [vmem:[#allocation56_spill] sm:$0xff] %v10279_v61  ;;  %v5416_v50 = vshrl.u32 %v10174_v58, 4  ;;  %v5427_v58 = vshrl.u32 %v10196_v0, 4  ;;  %vm5634_vm8 = vcmp.ne.s32.totalorder %v10279_v61, 0 }
 0x23e   : > { %v5362_v2 = vmul.u32 24, %v5361_v9  ;;  %vm5682_vm7 = vcmp.lt.s32.totalorder %v10279_v61, 0  ;;  %v5405_v9 = vshrl.u32 %v10212_v13, 4  ;;  %v5460_v0 = vshrl.u32 %v10232_v51, 4 }
 0x23f   : > { %v5417_v54 = vmul.u32 24, %v5416_v50  ;;  %v11692_v49 = vsel %vm10330_vm15, 4294967295, %v11691_v49  ;;  %v10335_v13 = vadd.s32 24, %v10279_v61  ;;  %v10338_v51 = vsub.s32 %v10110_v36, %v5384_v43  ;;  %vm10349_vm1 = vmand %vm5682_vm7, %vm5634_vm8 }
 0x240   : > { %11693 = vst [vmem:[#allocation59_spill] sm:$0xff] %v11692_v49  ;;  %v10341_v32 = vsub.s32 %v10113_v45, %v5362_v2  ;;  %v11696_v50 = vmov 0  ;;  %v5428_v22 = vmul.u32 24, %v5427_v58  ;;  %v5438_v38 = vshrl.u32 %v10272_v3, 4 }
 0x241   : > { %11694 = vst [vmem:[#allocation60_spill] sm:$0xff] %v10335_v13  ;;  %11695 = vst [vmem:[#allocation61_spill] sm:$0xff] %v10338_v51  ;;  %v11697_v50 = vsel %vm10349_vm1, 4294967295, %v11696_v50  ;;  %v10355_v16 = vmul.u32.u64.low 2863311531, %v10306_v39  ;;  %v10356_v36 = vmul.u32.u64.high 2863311531, %v10306_v39, %v10355_v16  ;;  %v5406_v45 = vmul.u32 24, %v5405_v9 }
 0x242   : > { %v10314_v1 = vpop.f32.mrb[16].mxu1  ;;  %11698 = vst [vmem:[#allocation62_spill] sm:$0xff] %v11697_v50  ;;  %v10363_v2 = vadd.s32 264, %v9591_v4  ;;  %v10370_v3 = vsub.s32 %v10139_v23, %v5417_v54  ;;  %v10373_v16 = vsub.s32 %v10142_v47, %v5395_v8  ;;  %v5461_v25 = vmul.u32 24, %v5460_v0 }
 0x243   : > { %v10320_v29 = vpop.f32.mrb[17].mxu1  ;;  %v10384_v49 = vadd.s32 304, %v9591_v4  ;;  %v10389_v23 = vsub.s32 %v10160_v6, %v5428_v22  ;;  %v5439_v54 = vmul.u32 24, %v5438_v38  ;;  %v10393_v47 = vsub.s32 %v10167_v52, %v5406_v45 }
 0x244   : > { %v10343_v21 = vpop.f32.mrb[18].mxu1  ;;  %11700 = vst [vmem:[#allocation64_spill] sm:$0xff] %v10370_v3  ;;  %11701 = vst [vmem:[#allocation65_spill] sm:$0xff] %v10373_v16  ;;  %v10396_v8 = vmul.u32.u64.low 2863311531, %v10363_v2  ;;  %v10397_v0 = vmul.u32.u64.high 2863311531, %v10363_v2, %v10396_v8  ;;  %vm11705_vm7 = vcmp.ne.s32.totalorder %v10311_v34, 0  ;;  %v10413_v22 = vsub.s32 %v10170_v42, %v5461_v25 }
 0x245   : > { %v10358_v43 = vpop.f32.mrb[19].mxu1  ;;  %11702 = vst [vmem:[#allocation66_spill] sm:$0xff] %v10389_v23  ;;  %11703 = vst [vmem:[#allocation67_spill] sm:$0xff] %v10393_v47  ;;  %vm11706_vm8 = vcmp.lt.s32.totalorder %v10311_v34, 0  ;;  %vm5638_vm1 = vcmp.ne.s32.totalorder %v10370_v3, 0  ;;  %vm11711_vm15 = vcmp.ne.s32.totalorder %v10338_v51, 0  ;;  %v11716_v25 = vsel %vm9680_vm9, %v9676_v55, %v9640_v37 }
 0x246   : > { %11699 = vst [vmem:[#allocation63_spill] sm:$0xff] %v10358_v43  ;;  %v10380_v43 = vadd.s32 24, %v10311_v34  ;;  %vm10405_vm11 = vmand %vm11706_vm8, %vm11705_vm7  ;;  %vm11712_vm6 = vcmp.lt.s32.totalorder %v10338_v51, 0  ;;  %v10427_v38 = vmul.u32.u64.low 2863311531, %v10384_v49  ;;  %v10428_v45 = vmul.u32.u64.high 2863311531, %v10384_v49, %v10427_v38 }
 0x247   : > { %11709 = vst [vmem:[#allocation69_spill] sm:$0xff] %v10413_v22  ;;  %vm10421_vm2 = vmand %vm11712_vm6, %vm11711_vm15  ;;  %v10431_v8 = vadd.s32 288, %v9591_v4  ;;  %vm10440_vm6 = vcmp.lt.s32.totalorder %v11716_v25, 16  ;;  %vm11719_vm15 = vcmp.ne.s32.totalorder %v10341_v32, 0  ;;  %vm11720_vm8 = vcmp.lt.s32.totalorder %v10341_v32, 0 }
 0x248   : > { %vm10448_vm7 = vmand %vm11720_vm8, %vm11719_vm15  ;;  %v10455_v46 = vsub.s32 %v10199_v14, %v5439_v54  ;;  %v5471_v37 = vshrl.u32 %v10356_v36, 4  ;;  %v10461_v25 = vadd.s32 24, %v10338_v51  ;;  %v10464_v13 = vadd.s32 24, %v10341_v32 }
 0x249   : > { %vm11726_vm9 = vcmp.lt.s32.totalorder %v10370_v3, 0  ;;  %v11727_v50 = vmov 0  ;;  %v11730_v14 = vsel %vm9653_vm4, %v9650_v20, %v9624_v60  ;;  %v11734_v54 = vsel %vm11733_vm14, %v9729_v11, %v9678_v26 }
 0x24a   : > { %v10399_v9 = vpop.f32.mrb[20].mxu1  ;;  %11723 = vst [vmem:[#allocation72_spill] sm:$0xff] %v10455_v46  ;;  %11725 = vst [vmem:[#allocation74_spill] sm:$0xff] %v10461_v25  ;;  %vm10481_vm0 = vcmp.lt.s32.totalorder %v11730_v14, 16  ;;  %vm11739_vm4 = vcmp.lt.s32.totalorder %v10373_v16, 0  ;;  %v10506_v20 = vadd.s32 24, %v10373_v16 }
 0x24b   : > { %11704 = vst [vmem:[#allocation68_spill] sm:$0xff] %v10399_v9  ;;  %v10415_v52 = vpop.f32.mrb[21].mxu1  ;;  %vm10470_vm15 = vmand %vm11726_vm9, %vm5638_vm1  ;;  %vm10490_vm1 = vcmp.lt.s32.totalorder %v11734_v54, 16  ;;  %vm11738_vm9 = vcmp.ne.s32.totalorder %v10373_v16, 0  ;;  %vm11742_vm5 = vcmp.ne.s32.totalorder %v10389_v23, 0  ;;  %vm11743_vm13 = vcmp.lt.s32.totalorder %v10389_v23, 0 }
 0x24c   : > { %11710 = vst [vmem:[#allocation70_spill] sm:$0xff] %v10415_v52  ;;  %v10433_v42 = vpop.f32.mrb[22].mxu1  ;;  %v11728_v50 = vsel %vm10470_vm15, 4294967295, %v11727_v50  ;;  %vm10501_vm10 = vmand %vm11739_vm4, %vm11738_vm9  ;;  %v10519_v26 = vadd.s32 24, %v10389_v23  ;;  %v10522_v11 = vadd.s32 24, %v10393_v47  ;;  %vm11749_vm9 = vnez %v11579_v33  ;;  %v11795_v52 = vld [vmem:[#allocation8_spill] sm:$0xff] }
 0x24d   : > { %11715 = vst [vmem:[#allocation71_spill] sm:$0xff] %v10433_v42  ;;  %v10458_v55 = vpop.f32.mrb[23].mxu1  ;;  %11729 = vst [vmem:[#allocation75_spill] sm:$0xff] %v11728_v50  ;;  %v10495_v42 = vadd.s32 24, %v10370_v3  ;;  %v10525_v30 = vmul.u32.u64.low 2863311531, %v10431_v8  ;;  %v10526_v14 = vmul.u32.u64.high 2863311531, %v10431_v8, %v10525_v30  ;;  %v11750_v54 = vsel %vm11749_vm9, %v9685_v56, %v9642_v19 }
 0x24e   : > { %11724 = vst [vmem:[#allocation73_spill] sm:$0xff] %v10458_v55  ;;  %vm10514_vm3 = vmand %vm11743_vm13, %vm11742_vm5  ;;  %vm10533_vm4 = vcmp.lt.s32.totalorder %v11750_v54, 16  ;;  %vm11753_vm5 = vcmp.ne.s32.totalorder %v10393_v47, 0  ;;  %vm11754_vm13 = vcmp.lt.s32.totalorder %v10393_v47, 0  ;;  %v11755_v9 = vmov 0  ;;  %v11804_v47 = vld [vmem:[#allocation4_spill] sm:$0xff] }
 0x24f   : > { %11737 = vst [vmem:[#allocation76_spill] sm:$0xff] %v10495_v42  ;;  %v11745_v12 = vsel %vm10514_vm3, 4294967295, %v11744_v12  ;;  %11747 = vst [vmem:[#allocation78_spill] sm:$0xff] %v10519_v26  ;;  %v10546_v62 = vadd.s32 24, %v10413_v22  ;;  %vm5640_vm14 = vcmp.ne.s32.totalorder %v10455_v46, 0  ;;  %vm5688_vm12 = vcmp.lt.s32.totalorder %v10455_v46, 0 }
 0x250   : > { %11746 = vst [vmem:[#allocation77_spill] sm:$0xff] %v11745_v12  ;;  %11748 = vst [vmem:[#allocation79_spill] sm:$0xff] %v10522_v11  ;;  %v5472_v19 = vmul.u32 24, %v5471_v37  ;;  %vm11759_vm9 = vcmp.ne.s32.totalorder %v10413_v22, 0  ;;  %v11761_v37 = vmov 0  ;;  %v5449_v54 = vshrl.u32 %v10397_v0, 4 }
 0x251   : > { %vm10541_vm8 = vmand %vm11754_vm13, %vm11753_vm5  ;;  %11758 = vst [vmem:[#allocation81_spill] sm:$0xff] %v10546_v62  ;;  %vm11760_vm5 = vcmp.lt.s32.totalorder %v10413_v22, 0  ;;  %v10580_v56 = vadd.s32 24, %v10455_v46  ;;  %v10583_v51 = vadd.s32 312, %v9591_v4  ;;  %v11765_v30 = vmov 0  ;;  %v11808_v11 = vld [vmem:[#allocation22_spill] sm:$0xff] }
 0x252   : > { %v11756_v9 = vsel %vm10541_vm8, 4294967295, %v11755_v9  ;;  %vm10566_vm13 = vmand %vm11760_vm5, %vm11759_vm9  ;;  %v5504_v3 = vshrl.u32 %v10428_v45, 4  ;;  %v10601_v42 = vadd.s32 296, %v9591_v4  ;;  %vm11768_vm5 = vnez %v11588_v48  ;;  %v11822_v33 = vld [vmem:[#allocation19_spill] sm:$0xff] }
 0x253   : > { %11757 = vst [vmem:[#allocation80_spill] sm:$0xff] %v11756_v9  ;;  %v11762_v37 = vsel %vm10566_vm13, 4294967295, %v11761_v37  ;;  %11764 = vst [vmem:[#allocation83_spill] sm:$0xff] %v10580_v56  ;;  %v7834_v25 = vpop.f32.mrb[0].mxu0  ;;  %v11769_v0 = vsel %vm11768_vm5, %v9790_v15, %v9715_v5  ;;  %v10618_v23 = vsub.s32 %v10306_v39, %v5472_v19  ;;  %v5450_v5 = vmul.u32 24, %v5449_v54  ;;  %v11792_v56 = vld [vmem:[#allocation16_spill] sm:$0xff] }
 0x254   : > { %11763 = vst [vmem:[#allocation82_spill] sm:$0xff] %v11762_v37  ;;  %vm10595_vm9 = vmand %vm5688_vm12, %vm5640_vm14  ;;  %v7896_v50 = vadd.f32 %v7834_v25, %v9924_v63  ;;  %v4792_v12 = vpop.f32.mrb[1].mxu0  ;;  %vm10609_vm3 = vcmp.lt.s32.totalorder %v11769_v0, 16  ;;  %v10621_v63 = vadd.s32 336, %v9591_v4  ;;  %v10626_v15 = vadd.s32 320, %v9591_v4  ;;  %v11810_v9 = vld [vmem:[#allocation23_spill] sm:$0xff] }
 0x255   : > { %v11766_v30 = vsel %vm10595_vm9, 4294967295, %v11765_v30  ;;  %11772 = vst [vmem:[#allocation85_spill] sm:$0xff] %v10618_v23  ;;  %v7897_v48 = vadd.f32 %v4792_v12, %v9934_v31  ;;  %v7835_v25 = vpop.f32.mrb[2].mxu0  ;;  %v10629_v0 = vadd.s32 344, %v9591_v4  ;;  %vm11773_vm12 = vnez %v11586_v35  ;;  %v11778_v31 = vld [vmem:[#allocation3_spill] sm:$0xff]  ;;  %v11786_v35 = vld [vmem:[#allocation2_spill] sm:$0xff] }
 0x256   : > { %11767 = vst [vmem:[#allocation84_spill] sm:$0xff] %v11766_v30  ;;  %v7898_v37 = vadd.f32 %v7835_v25, %v9950_v7  ;;  %v4795_v45 = vpop.f32.mrb[3].mxu0  ;;  %v11774_v39 = vsel %vm11773_vm12, %v9787_v27, %v9703_v53  ;;  %vm11777_vm5 = vnez %v11594_v57  ;;  %v11782_v57 = vld [vmem:[#allocation21_spill] sm:$0xff]  ;;  %v10690_v62 = vadd.s32 24, %v10618_v23  ;;  %v11794_v30 = vld [vmem:[#allocation12_spill] sm:$0xff]  ;;  %v11932_v58 = vld [vmem:[#allocation71_spill] sm:$0xff] }
 0x257   : > { %vm10637_vm14 = vcmp.lt.s32.totalorder %v11774_v39, 16  ;;  %v11779_v12 = vsel %vm11777_vm5, %v9837_v40, %v11778_v31  ;;  %v10655_v53 = vmul.u32.u64.low 2863311531, %v10583_v51  ;;  %v10656_v27 = vmul.u32.u64.high 2863311531, %v10583_v51, %v10655_v53  ;;  %v11783_v31 = vld [vmem:[#allocation6_spill] sm:$0xff] }
 0x258   : > { %vm10646_vm13 = vcmp.lt.s32.totalorder %v11779_v12, 16  ;;  %v5992_v7 = vsel %vm10440_vm6, %v7897_v48, 0.0  ;;  %v7899_v25 = vadd.f32 %v4795_v45, %v11782_v57  ;;  %v5505_v39 = vmul.u32 24, %v5504_v3  ;;  %v11785_v12 = vld [vmem:[#allocation5_spill] sm:$0xff]  ;;  %11790 = vst [vmem:[#allocation3_spill] sm:$0xff] %v10690_v62  ;;  %v11849_v62 = vld [vmem:[#allocation32_spill] sm:$0xff] }
 0x259   : > { %v5482_v40 = vshrl.u32 %v10526_v14, 4  ;;  %vm11784_vm12 = vnez %v11783_v31  ;;  %vm5643_vm6 = vcmp.ne.s32.totalorder %v10618_v23, 0  ;;  %v5994_v14 = vsel %vm10481_vm0, %v7896_v50, 0.0 }
 0x25a   : > { %v11787_v22 = vsel %vm11784_vm12, %v11785_v12, %v11786_v35  ;;  %v10679_v61 = vmul.u32.u64.low 2863311531, %v10601_v42  ;;  %v10680_v3 = vmul.u32.u64.high 2863311531, %v10601_v42, %v10679_v61  ;;  %v5993_v45 = vsel %vm10490_vm1, %v7899_v25, 0.0 }
 0x25b   : > { %vm10672_vm5 = vcmp.lt.s32.totalorder %v11787_v22, 16  ;;  %v6924_v35 = vpack.c.bf16 %v7899_v25, %v7897_v48  ;;  %v10687_v22 = vsub.s32 %v10363_v2, %v5450_v5  ;;  %v6094_v57 = vmul.f32 %v5992_v7, %v5992_v7  ;;  %v7838_v61 = vpop.f32.mrb[4].mxu0 }
 0x25c   : > { %v6040_v31 = vadd.f32 %v5993_v45, %v5992_v7  ;;  %v6095_v12 = vmul.f32 %v5993_v45, %v5993_v45  ;;  %v5995_v46 = vsel %vm10533_vm4, %v7898_v37, 0.0  ;;  %v10696_v50 = vsub.s32 %v10384_v49, %v5505_v39  ;;  %v11791_v7 = vld [vmem:[#allocation30_spill] sm:$0xff]  ;;  %v4808_v45 = vpop.f32.mrb[5].mxu0 }
 0x25d   : > { %6925 = vst [vmem:[%s10665_s11] sm:$0xff] %v6924_v35   ;;  %v5483_v55 = vmul.u32 24, %v5482_v40  ;;  %v10699_v36 = vadd.s32 328, %v9591_v4  ;;  %v6096_v2 = vmul.f32 %v5994_v14, %v5994_v14  ;;  %v7900_v25 = vadd.f32 %v7838_v61, %v11791_v7  ;;  %v11799_v49 = vld [vmem:[#allocation34_spill] sm:$0xff]  ;;  %v7839_v40 = vpop.f32.mrb[6].mxu0  ;;  %v11800_v61 = vld [vmem:[#allocation37_spill] sm:$0xff] }
 0x25e   : > { %v6041_v48 = vadd.f32 %v6040_v31, %v5994_v14  ;;  %v6142_v5 = vadd.f32 %v6095_v12, %v6094_v57  ;;  %vm11793_vm0 = vnez %v11792_v56  ;;  %v7901_v39 = vadd.f32 %v4808_v45, %v11799_v49  ;;  %v11801_v7 = vld [vmem:[#allocation9_spill] sm:$0xff] }
 0x25f   : > { %v11796_v26 = vsel %vm11793_vm0, %v11794_v30, %v11795_v52  ;;  %v10714_v14 = vmul.u32.u64.low 2863311531, %v10621_v63  ;;  %v10715_v57 = vmul.u32.u64.high 2863311531, %v10621_v63, %v10714_v14  ;;  %v6097_v31 = vmul.f32 %v5995_v46, %v5995_v46  ;;  %v11803_v52 = vld [vmem:[#allocation7_spill] sm:$0xff] }
 0x260   : > { %vm10707_vm1 = vcmp.lt.s32.totalorder %v11796_v26, 16  ;;  %v6143_v12 = vadd.f32 %v6142_v5, %v6096_v2  ;;  %v6042_v56 = vadd.f32 %v6041_v48, %v5995_v46  ;;  %v7902_v30 = vadd.f32 %v7839_v40, %v11800_v61  ;;  %v4811_v26 = vpop.f32.mrb[7].mxu0  ;;  %v11811_v14 = vld [vmem:[#allocation11_spill] sm:$0xff]  ;;  %v11820_v61 = vld [vmem:[#allocation18_spill] sm:$0xff] }
 0x261   : > { %vm11802_vm12 = vnez %v11801_v7  ;;  %vm11809_vm4 = vnez %v11808_v11  ;;  %v5996_v2 = vsel %vm10609_vm3, %v7901_v39, 0.0  ;;  %v6929_v48 = vpack.c.bf16 %v7901_v39, %v7898_v37  ;;  %v11815_v5 = vld [vmem:[#allocation39_spill] sm:$0xff]  ;;  %v11823_v37 = vld [vmem:[#allocation10_spill] sm:$0xff] }
 0x262   : > { %v11805_v45 = vsel %vm11802_vm12, %v11803_v52, %v11804_v47  ;;  %v11812_v16 = vsel %vm11809_vm4, %v11810_v9, %v11811_v14  ;;  %v7903_v40 = vadd.f32 %v4811_v26, %v11815_v5  ;;  %vm11816_vm12 = vcmp.lt.s32.totalorder %v10618_v23, 0 }
 0x263   : > { %vm10724_vm0 = vcmp.lt.s32.totalorder %v11805_v45, 16  ;;  %vm10733_vm9 = vcmp.lt.s32.totalorder %v11812_v16, 16  ;;  %vm10744_vm8 = vmand %vm11816_vm12, %vm5643_vm6  ;;  %v11817_v47 = vmov 0  ;;  %vm5689_vm4 = vcmp.lt.s32.totalorder %v10687_v22, 0  ;;  %7001 = vst [vmem:[%s10665_s11 + $0x8] sm:$0xff] %v6929_v48  }
 0x264   : > { %v11818_v47 = vsel %vm10744_vm8, 4294967295, %v11817_v47  ;;  %v6043_v16 = vadd.f32 %v6042_v56, %v5996_v2  ;;  %v6098_v9 = vmul.f32 %v5996_v2, %v5996_v2  ;;  %v6144_v11 = vadd.f32 %v6143_v12, %v6097_v31 }
 0x265   : > { %11819 = vst [vmem:[#allocation21_spill] sm:$0xff] %v11818_v47  ;;  %vm11821_vm15 = vnez %v11820_v61  ;;  %v5515_v7 = vshrl.u32 %v10656_v27, 4  ;;  %v5998_v52 = vsel %vm10637_vm14, %v7900_v25, 0.0  ;;  %v6934_v45 = vpack.c.bf16 %v7902_v30, %v7900_v25  ;;  %v7842_v27 = vpop.f32.mrb[8].mxu0  ;;  %v11858_v47 = vld [vmem:[#allocation15_spill] sm:$0xff] }
 0x266   : > { %v11824_v39 = vsel %vm11821_vm15, %v11822_v33, %v11823_v37  ;;  %v5997_v56 = vsel %vm10646_vm13, %v7903_v40, 0.0  ;;  %v10765_v31 = vadd.s32 24, %v10687_v22  ;;  %v6145_v12 = vadd.f32 %v6144_v11, %v6098_v9  ;;  %v11830_v9 = vld [vmem:[#allocation43_spill] sm:$0xff]  ;;  %v4824_v61 = vpop.f32.mrb[9].mxu0  ;;  %v11831_v33 = vld [vmem:[#allocation28_spill] sm:$0xff]  ;;  %v11833_v37 = vld [vmem:[#allocation26_spill] sm:$0xff] }
 0x267   : > { %vm10754_vm3 = vcmp.lt.s32.totalorder %v11824_v39, 16  ;;  %v6044_v14 = vadd.f32 %v6043_v16, %v5997_v56  ;;  %v6099_v2 = vmul.f32 %v5997_v56, %v5997_v56  ;;  %vm11827_vm15 = vcmp.ne.s32.totalorder %v10687_v22, 0  ;;  %7002 = vst [vmem:[%s10665_s11 + $0x10] sm:$0xff] %v6934_v45   ;;  %v11834_v39 = vld [vmem:[#allocation14_spill] sm:$0xff]  ;;  %v11838_v45 = vld [vmem:[#allocation45_spill] sm:$0xff]  ;;  %v7843_v5 = vpop.f32.mrb[10].mxu0 }
 0x268   : > { %vm10775_vm14 = vmand %vm5689_vm4, %vm11827_vm15  ;;  %v11828_v19 = vmov 0  ;;  %v5999_v54 = vsel %vm10672_vm5, %v7902_v30, 0.0  ;;  %vm5646_vm13 = vcmp.ne.s32.totalorder %v10696_v50, 0  ;;  %v5493_v25 = vshrl.u32 %v10680_v3, 4  ;;  %v11847_v3 = vld [vmem:[#allocation31_spill] sm:$0xff] }
 0x269   : > { %v11829_v19 = vsel %vm10775_vm14, 4294967295, %v11828_v19  ;;  %v6100_v48 = vmul.f32 %v5998_v52, %v5998_v52  ;;  %v6045_v40 = vadd.f32 %v6044_v14, %v5998_v52  ;;  %v6146_v16 = vadd.f32 %v6145_v12, %v6099_v2 }
 0x26a   : > { %v7904_v11 = vadd.f32 %v7842_v27, %v11830_v9  ;;  %vm11832_vm12 = vnez %v11831_v33  ;;  %v7905_v56 = vadd.f32 %v4824_v61, %v11838_v45  ;;  %v10801_v52 = vadd.s32 24, %v10696_v50  ;;  %v11839_v9 = vld [vmem:[#allocation46_spill] sm:$0xff]  ;;  %v11842_v61 = vld [vmem:[#allocation24_spill] sm:$0xff] }
 0x26b   : > { %v11835_v53 = vsel %vm11832_vm12, %v11833_v37, %v11834_v39  ;;  %v10804_v12 = vsub.s32 %v10431_v8, %v5483_v55  ;;  %v6101_v14 = vmul.f32 %v5999_v54, %v5999_v54  ;;  %v6147_v2 = vadd.f32 %v6146_v16, %v6100_v48  ;;  %v4827_v37 = vpop.f32.mrb[11].mxu0  ;;  %v11840_v39 = vld [vmem:[#allocation25_spill] sm:$0xff] }
 0x26c   : > { %vm10791_vm5 = vcmp.lt.s32.totalorder %v11835_v53, 16  ;;  %v6046_v27 = vadd.f32 %v6045_v40, %v5999_v54  ;;  %v7906_v33 = vadd.f32 %v7843_v5, %v11839_v9  ;;  %vm11841_vm4 = vnez %v11840_v39  ;;  %v11843_v53 = vld [vmem:[#allocation13_spill] sm:$0xff]  ;;  %v11854_v54 = vld [vmem:[#allocation47_spill] sm:$0xff] }
 0x26d   : > { %v11844_v45 = vsel %vm11841_vm4, %v11842_v61, %v11843_v53  ;;  %vm11848_vm12 = vnez %v11847_v3  ;;  %v11850_v8 = vld [vmem:[#allocation17_spill] sm:$0xff]  ;;  %v6000_v5 = vsel %vm10707_vm1, %v7905_v56, 0.0  ;;  %v7907_v40 = vadd.f32 %v4827_v37, %v11854_v54  ;;  %v11857_v3 = vld [vmem:[#allocation27_spill] sm:$0xff] }
 0x26e   : > { %vm10812_vm15 = vcmp.lt.s32.totalorder %v11844_v45, 16  ;;  %v11851_v55 = vsel %vm11848_vm12, %v11849_v62, %v11850_v8  ;;  %v5516_v16 = vmul.u32 24, %v5515_v7  ;;  %v5494_v9 = vmul.u32 24, %v5493_v25  ;;  %v11855_v45 = vld [vmem:[#allocation29_spill] sm:$0xff]  ;;  %v11895_v8 = vld [vmem:[#allocation44_spill] sm:$0xff] }
 0x26f   : > { %vm10821_vm6 = vcmp.lt.s32.totalorder %v11851_v55, 16  ;;  %v6047_v39 = vadd.f32 %v6046_v27, %v6000_v5  ;;  %v6102_v61 = vmul.f32 %v6000_v5, %v6000_v5  ;;  %v6148_v53 = vadd.f32 %v6147_v2, %v6101_v14  ;;  %v7846_v55 = vpop.f32.mrb[12].mxu0 }
 0x270   : > { %vm11856_vm4 = vnez %v11855_v45  ;;  %vm11862_vm1 = vcmp.lt.s32.totalorder %v10696_v50, 0  ;;  %v11863_v35 = vmov 0  ;;  %v10846_v7 = vadd.s32 368, %v9591_v4  ;;  %v4840_v26 = vpop.f32.mrb[13].mxu0 }
 0x271   : > { %v11859_v62 = vsel %vm11856_vm4, %v11857_v3, %v11858_v47  ;;  %vm10841_vm8 = vmand %vm11862_vm1, %vm5646_vm13  ;;  %v6002_v25 = vsel %vm10724_vm0, %v7904_v11, 0.0  ;;  %v6001_v47 = vsel %vm10733_vm9, %v7907_v40, 0.0  ;;  %v6939_v56 = vpack.c.bf16 %v7904_v11, %v7907_v40  ;;  %v11922_v3 = vld [vmem:[#allocation57_spill] sm:$0xff] }
 0x272   : > { %vm10833_vm12 = vcmp.lt.s32.totalorder %v11859_v62, 16  ;;  %v11864_v35 = vsel %vm10841_vm8, 4294967295, %v11863_v35  ;;  %vm5644_vm4 = vcmp.ne.s32.totalorder %v10804_v12, 0  ;;  %v6149_v14 = vadd.f32 %v6148_v53, %v6102_v61  ;;  %v11868_v53 = vld [vmem:[#allocation36_spill] sm:$0xff] }
 0x273   : > { %v6048_v2 = vadd.f32 %v6047_v39, %v6001_v47  ;;  %v6103_v27 = vmul.f32 %v6001_v47, %v6001_v47  ;;  %vm5692_vm13 = vcmp.lt.s32.totalorder %v10804_v12, 0  ;;  %v6003_v37 = vsel %vm10754_vm3, %v7906_v33, 0.0  ;;  %7003 = vst [vmem:[%s10665_s11 + $0x18] sm:$0xff] %v6939_v56   ;;  %v11865_v39 = vld [vmem:[#allocation50_spill] sm:$0xff]  ;;  %v11867_v33 = vld [vmem:[#allocation40_spill] sm:$0xff]  ;;  %v7847_v56 = vpop.f32.mrb[14].mxu0 }
 0x274   : > { %v10862_v46 = vadd.s32 24, %v10804_v12  ;;  %v10865_v11 = vsub.s32 %v10583_v51, %v5516_v16  ;;  %v6104_v5 = vmul.f32 %v6002_v25, %v6002_v25  ;;  %v7908_v61 = vadd.f32 %v7846_v55, %v11865_v39  ;;  %v11872_v62 = vld [vmem:[#allocation52_spill] sm:$0xff]  ;;  %vm10882_vm3 = vmand %vm5692_vm13, %vm5644_vm4  ;;  %v11875_v55 = vld [vmem:[#allocation54_spill] sm:$0xff] }
 0x275   : > { %v6049_v54 = vadd.f32 %v6048_v2, %v6002_v25  ;;  %v6150_v40 = vadd.f32 %v6149_v14, %v6103_v27  ;;  %vm11866_vm9 = vnez %v11662_v17  ;;  %v7909_v47 = vadd.f32 %v4840_v26, %v11872_v62  ;;  %v4843_v26 = vpop.f32.mrb[15].mxu0 }
 0x276   : > { %v11869_v45 = vsel %vm11866_vm9, %v11867_v33, %v11868_v53  ;;  %v10887_v17 = vsub.s32 %v10601_v42, %v5494_v9  ;;  %v10890_v16 = vmul.u32.u64.low 2863311531, %v10626_v15  ;;  %v10891_v25 = vmul.u32.u64.high 2863311531, %v10626_v15, %v10890_v16  ;;  %v11876_v33 = vld [vmem:[#allocation35_spill] sm:$0xff]  ;;  %v11878_v53 = vld [vmem:[#allocation33_spill] sm:$0xff] }
 0x277   : > { %vm10873_vm0 = vcmp.lt.s32.totalorder %v11869_v45, 16  ;;  %v6105_v14 = vmul.f32 %v6003_v37, %v6003_v37  ;;  %v6151_v2 = vadd.f32 %v6150_v40, %v6104_v5  ;;  %v6050_v27 = vadd.f32 %v6049_v54, %v6003_v37  ;;  %v11879_v45 = vld [vmem:[#allocation20_spill] sm:$0xff] }
 0x278   : > { %v7910_v39 = vadd.f32 %v7847_v56, %v11875_v55  ;;  %vm11877_vm1 = vnez %v11876_v33  ;;  %vm11883_vm13 = vnez %v11672_v44  ;;  %v6004_v37 = vsel %vm10791_vm5, %v7909_v47, 0.0  ;;  %v11887_v55 = vld [vmem:[#allocation49_spill] sm:$0xff] }
 0x279   : > { %v11880_v62 = vsel %vm11877_vm1, %v11878_v53, %v11879_v45  ;;  %v11884_v42 = vsel %vm11883_vm13, %v10225_v10, %v10121_v18  ;;  %v7911_v5 = vadd.f32 %v4843_v26, %v10274_v28  ;;  %v5548_v54 = vshrl.u32 %v10715_v57, 4  ;;  %v11889_v10 = vld [vmem:[#allocation41_spill] sm:$0xff]  ;;  %v11890_v18 = vld [vmem:[#allocation38_spill] sm:$0xff] }
 0x27a   : > { %vm10899_vm4 = vcmp.lt.s32.totalorder %v11880_v62, 16  ;;  %vm10908_vm9 = vcmp.lt.s32.totalorder %v11884_v42, 16  ;;  %v10917_v40 = vadd.s32 352, %v9591_v4  ;;  %v6051_v56 = vadd.f32 %v6050_v27, %v6004_v37  ;;  %v7850_v62 = vpop.f32.mrb[16].mxu0 }
 0x27b   : > { %v6106_v44 = vmul.f32 %v6004_v37, %v6004_v37  ;;  %v6152_v16 = vadd.f32 %v6151_v2, %v6105_v14  ;;  %vm11888_vm1 = vnez %v11887_v55  ;;  %v5836_v28 = vsel %vm10882_vm3, %v10862_v46, %v10804_v12  ;;  %v4856_v37 = vpop.f32.mrb[17].mxu0 }
 0x27c   : > { %v11891_v33 = vsel %vm11888_vm1, %v11889_v10, %v11890_v18  ;;  %v6006_v57 = vsel %vm10812_vm15, %v7908_v61, 0.0  ;;  %v6005_v30 = vsel %vm10821_vm6, %v7911_v5, 0.0  ;;  %v6944_v14 = vpack.c.bf16 %v7911_v5, %v7909_v47 }
 0x27d   : > { %vm10924_vm13 = vcmp.lt.s32.totalorder %v11891_v33, 16  ;;  %vm5647_vm5 = vcmp.ne.s32.totalorder %v10865_v11, 0  ;;  %v6153_v2 = vadd.f32 %v6152_v16, %v6106_v44  ;;  %v6052_v27 = vadd.f32 %v6051_v56, %v6005_v30  ;;  %v7851_v16 = vpop.f32.mrb[18].mxu0 }
 0x27e   : > { %v6107_v26 = vmul.f32 %v6005_v30, %v6005_v30  ;;  %v6007_v45 = vsel %vm10833_vm12, %v7910_v39, 0.0  ;;  %7004 = vst [vmem:[%s10665_s11 + $0x20] sm:$0xff] %v6944_v14   ;;  %v10942_v42 = vadd.s32 24, %v10865_v11  ;;  %v6108_v23 = vmul.f32 %v6006_v57, %v6006_v57  ;;  %v11902_v30 = vld [vmem:[#allocation53_spill] sm:$0xff]  ;;  %v11904_v14 = vld [vmem:[#allocation51_spill] sm:$0xff] }
 0x27f   : > { %v6053_v48 = vadd.f32 %v6052_v27, %v6006_v57  ;;  %v7912_v47 = vadd.f32 %v7850_v62, %v10314_v1  ;;  %vm11894_vm1 = vnez %v11684_v41  ;;  %v7913_v44 = vadd.f32 %v4856_v37, %v10320_v29  ;;  %v4859_v57 = vpop.f32.mrb[19].mxu0  ;;  %v11909_v62 = vld [vmem:[#allocation59_spill] sm:$0xff] }
 0x280   : > { %v6154_v61 = vadd.f32 %v6153_v2, %v6107_v26  ;;  %v11896_v5 = vsel %vm11894_vm1, %v10249_v59, %v11895_v8  ;;  %vm11899_vm6 = vcmp.lt.s32.totalorder %v10865_v11, 0  ;;  %v10966_v41 = vadd.s32 24, %v10887_v17  ;;  %v11905_v2 = vld [vmem:[#allocation42_spill] sm:$0xff]  ;;  %v11911_v37 = vld [vmem:[#allocation55_spill] sm:$0xff]  ;;  %v7854_v49 = vpop.f32.mrb[20].mxu0 }
 0x281   : > { %vm10952_vm12 = vcmp.lt.s32.totalorder %v11896_v5, 16  ;;  %vm10961_vm15 = vmand %vm11899_vm6, %vm5647_vm5  ;;  %v10969_v59 = vmul.u32.u64.low 2863311531, %v10629_v0  ;;  %v10970_v1 = vmul.u32.u64.high 2863311531, %v10629_v0, %v10969_v59  ;;  %v6109_v10 = vmul.f32 %v6007_v45, %v6007_v45 }
 0x282   : > { %v6155_v18 = vadd.f32 %v6154_v61, %v6108_v23  ;;  %v6054_v33 = vadd.f32 %v6053_v48, %v6007_v45  ;;  %v7914_v29 = vadd.f32 %v7851_v16, %v10343_v21  ;;  %vm11903_vm1 = vnez %v11902_v30  ;;  %v11915_v48 = vld [vmem:[#allocation63_spill] sm:$0xff] }
 0x283   : > { %v11906_v27 = vsel %vm11903_vm1, %v11904_v14, %v11905_v2  ;;  %vm11910_vm6 = vnez %v11909_v62  ;;  %v6008_v21 = vsel %vm10873_vm0, %v7913_v44, 0.0  ;;  %v6949_v23 = vpack.c.bf16 %v7913_v44, %v7910_v39  ;;  %v11920_v14 = vld [vmem:[#allocation58_spill] sm:$0xff]  ;;  %v11923_v2 = vld [vmem:[#allocation48_spill] sm:$0xff]  ;;  %v11951_v44 = vld [vmem:[#allocation65_spill] sm:$0xff] }
 0x284   : > { %vm10978_vm5 = vcmp.lt.s32.totalorder %v11906_v27, 16  ;;  %v11912_v8 = vsel %vm11910_vm6, %v10317_v24, %v11911_v37  ;;  %v7915_v61 = vadd.f32 %v4859_v57, %v11915_v48  ;;  %vm11916_vm1 = vcmp.ne.s32.totalorder %v10887_v17, 0 }
 0x285   : > { %vm10987_vm8 = vcmp.lt.s32.totalorder %v11912_v8, 16  ;;  %vm11917_vm3 = vcmp.lt.s32.totalorder %v10887_v17, 0  ;;  %v5549_v16 = vmul.u32 24, %v5548_v54  ;;  %v6055_v24 = vadd.f32 %v6054_v33, %v6008_v21  ;;  %7005 = vst [vmem:[%s10665_s11 + $0x28] sm:$0xff] %v6949_v23  }
 0x286   : > { %vm10998_vm14 = vmand %vm11917_vm3, %vm11916_vm1  ;;  %v6110_v59 = vmul.f32 %v6008_v21, %v6008_v21  ;;  %v6156_v30 = vadd.f32 %v6155_v18, %v6109_v10  ;;  %vm11921_vm6 = vnez %v11920_v14  ;;  %v5839_v57 = vsel %vm10961_vm15, %v10942_v42, %v10865_v11 }
 0x287   : > { %v11924_v39 = vsel %vm11921_vm6, %v11922_v3, %v11923_v2  ;;  %v6010_v54 = vsel %vm10899_vm4, %v7912_v47, 0.0  ;;  %v6954_v33 = vpack.c.bf16 %v7914_v29, %v7912_v47  ;;  %v6009_v10 = vsel %vm10908_vm9, %v7915_v61, 0.0 }
 0x288   : > { %vm11007_vm0 = vcmp.lt.s32.totalorder %v11924_v39, 16  ;;  %v5526_v18 = vshrl.u32 %v10891_v25, 4  ;;  %v6157_v27 = vadd.f32 %v6156_v30, %v6110_v59  ;;  %v6056_v62 = vadd.f32 %v6055_v24, %v6009_v10  ;;  %v11927_v24 = vld [vmem:[#allocation68_spill] sm:$0xff]  ;;  %v4872_v30 = vpop.f32.mrb[21].mxu0 }
 0x289   : > { %v6111_v37 = vmul.f32 %v6009_v10, %v6009_v10  ;;  %v5837_v8 = vsel %vm10998_vm14, %v10966_v41, %v10887_v17  ;;  %v6011_v21 = vsel %vm10924_vm13, %v7914_v29, 0.0  ;;  %7006 = vst [vmem:[%s10665_s11 + $0x30] sm:$0xff] %v6954_v33   ;;  %v11029_v47 = vsub.s32 %v10621_v63, %v5549_v16  ;;  %v11931_v63 = vld [vmem:[#allocation70_spill] sm:$0xff]  ;;  %v7855_v14 = vpop.f32.mrb[22].mxu0 }
 0x28a   : > { %v11032_v9 = vmul.u32.u64.low 2863311531, %v10699_v36  ;;  %v11033_v23 = vmul.u32.u64.high 2863311531, %v10699_v36, %v11032_v9  ;;  %v6112_v25 = vmul.f32 %v6010_v54, %v6010_v54  ;;  %v6057_v48 = vadd.f32 %v6056_v62, %v6010_v54  ;;  %v4875_v62 = vpop.f32.mrb[23].mxu0 }
 0x28b   : > { %v6158_v61 = vadd.f32 %v6157_v27, %v6111_v37  ;;  %v7916_v59 = vadd.f32 %v7854_v49, %v11927_v24  ;;  %v11928_v53 = vsel %vm10405_vm11, %v10380_v43, %v10311_v34  ;;  %v7917_v16 = vadd.f32 %v4872_v30, %v11931_v63  ;;  %v11933_v34 = vld [vmem:[#allocation62_spill] sm:$0xff]  ;;  %v11935_v43 = vld [vmem:[#allocation60_spill] sm:$0xff]  ;;  %v7858_v45 = vpop.f32.mrb[24].mxu0 }
 0x28c   : > { %vm11041_vm3 = vcmp.lt.s32.totalorder %v11928_v53, 16  ;;  %v5527_v3 = vmul.u32 24, %v5526_v18  ;;  %v11047_v2 = vmul.u32.u64.low 2863311531, %v10846_v7  ;;  %v11048_v39 = vmul.u32.u64.high 2863311531, %v10846_v7, %v11047_v2  ;;  %v11936_v37 = vld [vmem:[#allocation56_spill] sm:$0xff] }
 0x28d   : > { %v6113_v54 = vmul.f32 %v6011_v21, %v6011_v21  ;;  %v6159_v33 = vadd.f32 %v6158_v61, %v6112_v25  ;;  %v6058_v10 = vadd.f32 %v6057_v48, %v6011_v21  ;;  %v7918_v27 = vadd.f32 %v7855_v14, %v11932_v58  ;;  %v11943_v48 = vld [vmem:[#allocation73_spill] sm:$0xff]  ;;  %v7602_v58 = vpop.f32.mrb[24].mxu1  ;;  %v11979_v63 = vld [vmem:[#allocation72_spill] sm:$0xff] }
 0x28e   : > { %vm11934_vm11 = vnez %v11933_v34  ;;  %v11940_v18 = vsel %vm10448_vm7, %v10464_v13, %v10341_v32  ;;  %v6012_v21 = vsel %vm10952_vm12, %v7917_v16, 0.0  ;;  %v7919_v61 = vadd.f32 %v4875_v62, %v11943_v48  ;;  %v11944_v13 = vld [vmem:[#allocation74_spill] sm:$0xff]  ;;  %v11945_v32 = vld [vmem:[#allocation61_spill] sm:$0xff] }
 0x28f   : > { %v11937_v49 = vsel %vm11934_vm11, %v11935_v43, %v11936_v37  ;;  %vm11066_vm9 = vcmp.lt.s32.totalorder %v11940_v18, 16  ;;  %vm5650_vm13 = vcmp.ne.s32.totalorder %v11029_v47, 0  ;;  %vm5698_vm1 = vcmp.lt.s32.totalorder %v11029_v47, 0 }
 0x290   : > { %vm11057_vm4 = vcmp.lt.s32.totalorder %v11937_v49, 16  ;;  %v6059_v24 = vadd.f32 %v6058_v10, %v6012_v21  ;;  %v6114_v30 = vmul.f32 %v6012_v21, %v6012_v21  ;;  %v6160_v38 = vadd.f32 %v6159_v33, %v6113_v54 }
 0x291   : > { %v11946_v53 = vsel %vm10421_vm2, %v11944_v13, %v11945_v32  ;;  %v11085_v56 = vadd.s32 24, %v11029_v47  ;;  %v6014_v16 = vsel %vm10978_vm5, %v7916_v59, 0.0  ;;  %v6013_v14 = vsel %vm10987_vm8, %v7919_v61, 0.0  ;;  %vm11094_vm2 = vmand %vm5698_vm1, %vm5650_vm13 }
 0x292   : > { %vm11080_vm7 = vcmp.lt.s32.totalorder %v11946_v53, 16  ;;  %v6959_v2 = vpack.c.bf16 %v7916_v59, %v7919_v61  ;;  %v5559_v54 = vshrl.u32 %v10970_v1, 4  ;;  %v6161_v6 = vadd.f32 %v6160_v38, %v6114_v30  ;;  %v2798_v59 = vpop.f32.mrb[25].mxu1  ;;  %v4888_v61 = vpop.f32.mrb[25].mxu0 }
 0x293   : > { %v6060_v33 = vadd.f32 %v6059_v24, %v6013_v14  ;;  %v6115_v10 = vmul.f32 %v6013_v14, %v6013_v14  ;;  %v11099_v34 = vadd.s32 376, %v9591_v4  ;;  %v6015_v26 = vsel %vm11007_vm0, %v7918_v27, 0.0  ;;  %v7603_v24 = vpop.f32.mrb[26].mxu1 }
 0x294   : > { %7007 = vst [vmem:[%s10665_s11 + $0x38] sm:$0xff] %v6959_v2   ;;  %v11105_v1 = vsub.s32 %v10626_v15, %v5527_v3  ;;  %v11108_v43 = vmul.u32.u64.low 2863311531, %v10917_v40  ;;  %v11109_v37 = vmul.u32.u64.high 2863311531, %v10917_v40, %v11108_v43  ;;  %v6116_v49 = vmul.f32 %v6014_v16, %v6014_v16  ;;  %v7859_v3 = vpop.f32.mrb[26].mxu0  ;;  %v2801_v38 = vpop.f32.mrb[27].mxu1 }
 0x295   : > { %v6061_v18 = vadd.f32 %v6060_v33, %v6014_v16  ;;  %v6162_v21 = vadd.f32 %v6161_v6, %v6115_v10  ;;  %v7920_v48 = vadd.f32 %v7858_v45, %v7602_v58  ;;  %v11952_v27 = vsel %vm10501_vm10, %v10506_v20, %v11951_v44  ;;  %v4891_v2 = vpop.f32.mrb[27].mxu0  ;;  %v11955_v6 = vld [vmem:[#allocation75_spill] sm:$0xff]  ;;  %v11957_v33 = vld [vmem:[#allocation76_spill] sm:$0xff] }
 0x296   : > { %vm11116_vm8 = vcmp.lt.s32.totalorder %v11952_v27, 16  ;;  %v7921_v15 = vadd.f32 %v4888_v61, %v2798_v59  ;;  %v5842_v13 = vsel %vm11094_vm2, %v11085_v56, %v11029_v47  ;;  %v5560_v32 = vmul.u32 24, %v5559_v54  ;;  %v11958_v10 = vld [vmem:[#allocation64_spill] sm:$0xff]  ;;  %v11964_v54 = vld [vmem:[#allocation79_spill] sm:$0xff]  ;;  %v11969_v27 = vld [vmem:[#allocation77_spill] sm:$0xff]  ;;  %v7862_v9 = vpop.f32.mrb[28].mxu0 }
 0x297   : > { %v11125_v53 = vadd.s32 360, %v9591_v4  ;;  %v6117_v60 = vmul.f32 %v6015_v26, %v6015_v26  ;;  %v6163_v16 = vadd.f32 %v6162_v21, %v6116_v49  ;;  %v6062_v14 = vadd.f32 %v6061_v18, %v6015_v26  ;;  %v11962_v59 = vld [vmem:[#allocation80_spill] sm:$0xff]  ;;  %v11965_v43 = vld [vmem:[#allocation67_spill] sm:$0xff] }
 0x298   : > { %v7922_v20 = vadd.f32 %v7859_v3, %v7603_v24  ;;  %vm11956_vm10 = vnez %v11955_v6  ;;  %vm11963_vm5 = vnez %v11962_v59  ;;  %v6016_v26 = vsel %vm11041_vm3, %v7921_v15, 0.0  ;;  %v11971_v3 = vld [vmem:[#allocation78_spill] sm:$0xff] }
 0x299   : > { %v11959_v58 = vsel %vm11956_vm10, %v11957_v33, %v11958_v10  ;;  %v11966_v4 = vsel %vm11963_vm5, %v11964_v54, %v11965_v43  ;;  %v7923_v49 = vadd.f32 %v4891_v2, %v2801_v38  ;;  %vm5648_vm0 = vcmp.ne.s32.totalorder %v11105_v1, 0  ;;  %v11972_v6 = vld [vmem:[#allocation66_spill] sm:$0xff] }
 0x29a   : > { %vm11132_vm12 = vcmp.lt.s32.totalorder %v11959_v58, 16  ;;  %vm11141_vm6 = vcmp.lt.s32.totalorder %v11966_v4, 16  ;;  %v5537_v18 = vshrl.u32 %v11033_v23, 4  ;;  %v6063_v21 = vadd.f32 %v6062_v14, %v6016_v26  ;;  %v7606_v58 = vpop.f32.mrb[28].mxu1 }
 0x29b   : > { %v6118_v24 = vmul.f32 %v6016_v26, %v6016_v26  ;;  %v6164_v44 = vadd.f32 %v6163_v16, %v6117_v60  ;;  %vm11970_vm11 = vnez %v11969_v27  ;;  %vm5696_vm3 = vcmp.lt.s32.totalorder %v11105_v1, 0 }
 0x29c   : > { %v11973_v33 = vsel %vm11970_vm11, %v11971_v3, %v11972_v6  ;;  %v6018_v29 = vsel %vm11057_vm4, %v7920_v48, 0.0  ;;  %v6017_v23 = vsel %vm11066_vm9, %v7923_v49, 0.0  ;;  %v6964_v38 = vpack.c.bf16 %v7923_v49, %v7921_v15  ;;  %v2814_v48 = vpop.f32.mrb[29].mxu1  ;;  %vm11190_vm1 = vmand %vm5696_vm3, %vm5648_vm0 }
 0x29d   : > { %vm11154_vm13 = vcmp.lt.s32.totalorder %v11973_v33, 16  ;;  %v11164_v60 = vadd.s32 24, %v11105_v1  ;;  %v6165_v16 = vadd.f32 %v6164_v44, %v6118_v24  ;;  %v6064_v14 = vadd.f32 %v6063_v21, %v6017_v23  ;;  %v4904_v24 = vpop.f32.mrb[29].mxu0  ;;  %v7607_v44 = vpop.f32.mrb[30].mxu1 }
 0x29e   : > { %v6119_v2 = vmul.f32 %v6017_v23, %v6017_v23  ;;  %v11167_v59 = vsub.s32 %v10629_v0, %v5560_v32  ;;  %v6019_v54 = vsel %vm11080_vm7, %v7922_v20, 0.0  ;;  %7008 = vst [vmem:[%s10665_s11 + $0x40] sm:$0xff] %v6964_v38   ;;  %v5538_v43 = vmul.u32 24, %v5537_v18  ;;  %v11976_v0 = vld [vmem:[#allocation84_spill] sm:$0xff]  ;;  %v11978_v32 = vld [vmem:[#allocation83_spill] sm:$0xff]  ;;  %v7863_v33 = vpop.f32.mrb[30].mxu0 }
 0x29f   : > { %v11173_v25 = vmul.u32.u64.low 2863311531, %v11099_v34  ;;  %v11174_v15 = vmul.u32.u64.high 2863311531, %v11099_v34, %v11173_v25  ;;  %v6120_v4 = vmul.f32 %v6018_v29, %v6018_v29  ;;  %v6065_v26 = vadd.f32 %v6064_v14, %v6018_v29  ;;  %v2817_v29 = vpop.f32.mrb[31].mxu1 }
 0x2a0   : > { %v6166_v49 = vadd.f32 %v6165_v16, %v6119_v2  ;;  %v7924_v21 = vadd.f32 %v7862_v9, %v7606_v58  ;;  %vm11977_vm4 = vnez %v11976_v0  ;;  %v7925_v6 = vadd.f32 %v4904_v24, %v2814_v48  ;;  %v4907_v25 = vpop.f32.mrb[31].mxu0  ;;  %v11985_v0 = vld [vmem:[#allocation82_spill] sm:$0xff] }
 0x2a1   : > { %v11980_v27 = vsel %vm11977_vm4, %v11978_v32, %v11979_v63  ;;  %v5592_v23 = vshrl.u32 %v11048_v39, 4  ;;  %v11196_v38 = vmul.u32.u64.low 2863311531, %v11125_v53  ;;  %v11197_v16 = vmul.u32.u64.high 2863311531, %v11125_v53, %v11196_v38  ;;  %v11987_v32 = vld [vmem:[#allocation81_spill] sm:$0xff]  ;;  %v7866_v45 = vpop.f32.mrb[32].mxu0 }
 0x2a2   : > { %vm11182_vm9 = vcmp.lt.s32.totalorder %v11980_v27, 16  ;;  %v6121_v14 = vmul.f32 %v6019_v54, %v6019_v54  ;;  %v6167_v2 = vadd.f32 %v6166_v49, %v6120_v4  ;;  %v6066_v58 = vadd.f32 %v6065_v26, %v6019_v54  ;;  %v11988_v63 = vld [vmem:[#allocation69_spill] sm:$0xff] }
 0x2a3   : > { %v7926_v9 = vadd.f32 %v7863_v33, %v7607_v44  ;;  %vm11986_vm7 = vnez %v11985_v0  ;;  %vm11992_vm5 = vnez %v11829_v19  ;;  %v6020_v54 = vsel %vm11116_vm8, %v7925_v6, 0.0  ;;  %v11996_v38 = vld [vmem:[#allocation21_spill] sm:$0xff] }
 0x2a4   : > { %v11989_v27 = vsel %vm11986_vm7, %v11987_v32, %v11988_v63  ;;  %v11993_v39 = vsel %vm11992_vm5, %v10765_v31, %v10687_v22  ;;  %v6969_v26 = vpack.c.bf16 %v7925_v6, %v7922_v20  ;;  %v7927_v49 = vadd.f32 %v4907_v25, %v2817_v29  ;;  %v11998_v22 = vld [vmem:[#allocation3_spill] sm:$0xff]  ;;  %v11999_v31 = vld [vmem:[#allocation85_spill] sm:$0xff]  ;;  %v7610_v63 = vpop.f32.mrb[32].mxu1 }
 0x2a5   : > { %vm11204_vm10 = vcmp.lt.s32.totalorder %v11989_v27, 16  ;;  %vm11213_vm0 = vcmp.lt.s32.totalorder %v11993_v39, 16  ;;  %v5840_v24 = vsel %vm11190_vm1, %v11164_v60, %v11105_v1  ;;  %v6067_v44 = vadd.f32 %v6066_v58, %v6020_v54  ;;  %v2830_v27 = vpop.f32.mrb[33].mxu1 }
 0x2a6   : > { %v6122_v19 = vmul.f32 %v6020_v54, %v6020_v54  ;;  %v6168_v33 = vadd.f32 %v6167_v2, %v6121_v14  ;;  %vm11997_vm11 = vnez %v11996_v38  ;;  %v5570_v30 = vshrl.u32 %v11109_v37, 4  ;;  %7009 = vst [vmem:[%s10665_s11 + $0x48] sm:$0xff] %v6969_v26   ;;  %v4920_v26 = vpop.f32.mrb[33].mxu0 }
 0x2a7   : > { %v12000_v0 = vsel %vm11997_vm11, %v11998_v22, %v11999_v31  ;;  %v6022_v20 = vsel %vm11132_vm12, %v7924_v21, 0.0  ;;  %v6974_v6 = vpack.c.bf16 %v7926_v9, %v7924_v21  ;;  %v6021_v29 = vsel %vm11141_vm6, %v7927_v49, 0.0  ;;  %v7611_v49 = vpop.f32.mrb[34].mxu1 }
 0x2a8   : > { %vm11228_vm3 = vcmp.lt.s32.totalorder %v12000_v0, 16  ;;  %v11239_v14 = vsub.s32 %v10699_v36, %v5538_v43  ;;  %v6169_v2 = vadd.f32 %v6168_v33, %v6122_v19  ;;  %v6068_v58 = vadd.f32 %v6067_v44, %v6021_v29  ;;  %v7867_v44 = vpop.f32.mrb[34].mxu0  ;;  %v2833_v19 = vpop.f32.mrb[35].mxu1 }
 0x2a9   : > { %v6123_v25 = vmul.f32 %v6021_v29, %v6021_v29  ;;  %vm5651_vm8 = vcmp.ne.s32.totalorder %v11167_v59, 0  ;;  %v6023_v37 = vsel %vm11154_vm13, %v7926_v9, 0.0  ;;  %7010 = vst [vmem:[%s10665_s11 + $0x50] sm:$0xff] %v6974_v6   ;;  %vm5699_vm12 = vcmp.lt.s32.totalorder %v11167_v59, 0  ;;  %v4923_v51 = vpop.f32.mrb[35].mxu0 }
 0x2aa   : > { %v11247_v61 = vadd.s32 24, %v11167_v59  ;;  %v5593_v21 = vmul.u32 24, %v5592_v23  ;;  %v6124_v36 = vmul.f32 %v6022_v20, %v6022_v20  ;;  %v6069_v43 = vadd.f32 %v6068_v58, %v6022_v20  ;;  %v7870_v48 = vpop.f32.mrb[36].mxu0 }
 0x2ab   : > { %v6170_v39 = vadd.f32 %v6169_v2, %v6123_v25  ;;  %v7928_v54 = vadd.f32 %v7866_v45, %v7610_v63  ;;  %vm11254_vm13 = vcmp.lt.s32.totalorder %v5836_v28, 16  ;;  %v7929_v9 = vadd.f32 %v4920_v26, %v2830_v27  ;;  %v7614_v2 = vpop.f32.mrb[36].mxu1 }
 0x2ac   : > { %vm5649_vm4 = vcmp.ne.s32.totalorder %v11239_v14, 0  ;;  %vm5697_vm7 = vcmp.lt.s32.totalorder %v11239_v14, 0  ;;  %v5571_v23 = vmul.u32 24, %v5570_v30  ;;  %v6125_v33 = vmul.f32 %v6023_v37, %v6023_v37  ;;  %v2846_v25 = vpop.f32.mrb[37].mxu1 }
 0x2ad   : > { %v6171_v38 = vadd.f32 %v6170_v39, %v6124_v36  ;;  %v6070_v22 = vadd.f32 %v6069_v43, %v6023_v37  ;;  %v7930_v31 = vadd.f32 %v7867_v44, %v7611_v49  ;;  %vm12006_vm5 = vnez %v11864_v35  ;;  %v4936_v36 = vpop.f32.mrb[37].mxu0 }
 0x2ae   : > { %v12007_v12 = vsel %vm12006_vm5, %v10801_v52, %v10696_v50  ;;  %vm11274_vm6 = vcmp.lt.s32.totalorder %v5837_v8, 16  ;;  %v6024_v0 = vsel %vm11182_vm9, %v7929_v9, 0.0  ;;  %v7931_v35 = vadd.f32 %v4923_v51, %v2833_v19  ;;  %vm11284_vm5 = vmand %vm5699_vm12, %vm5651_vm8 }
 0x2af   : > { %vm11265_vm11 = vcmp.lt.s32.totalorder %v12007_v12, 16  ;;  %v5793_v52 = vadd.s32 24, %v11239_v14  ;;  %v5581_v17 = vshrl.u32 %v11197_v16, 4  ;;  %v6071_v41 = vadd.f32 %v6070_v22, %v6024_v0  ;;  %vm11303_vm9 = vmand %vm5697_vm7, %vm5649_vm4 }
 0x2b0   : > { %v6126_v5 = vmul.f32 %v6024_v0, %v6024_v0  ;;  %v6172_v8 = vadd.f32 %v6171_v38, %v6125_v33  ;;  %vm11295_vm14 = vcmp.lt.s32.totalorder %v5839_v57, 16  ;;  %v11308_v16 = vsub.s32 %v10846_v7, %v5593_v21 }
 0x2b1   : > { %v6026_v55 = vsel %vm11204_vm10, %v7928_v54, 0.0  ;;  %v6025_v11 = vsel %vm11213_vm0, %v7931_v35, 0.0  ;;  %v6979_v42 = vpack.c.bf16 %v7928_v54, %v7931_v35  ;;  %v5603_v57 = vshrl.u32 %v11174_v15, 4 }
 0x2b2   : > { %v6173_v20 = vadd.f32 %v6172_v8, %v6126_v5  ;;  %v6072_v6 = vadd.f32 %v6071_v41, %v6025_v11  ;;  %v6127_v29 = vmul.f32 %v6025_v11, %v6025_v11  ;;  %v5843_v58 = vsel %vm11284_vm5, %v11247_v61, %v11167_v59  ;;  %v7615_v59 = vpop.f32.mrb[38].mxu1  ;;  %v7871_v61 = vpop.f32.mrb[38].mxu0 }
 0x2b3   : > { %v6027_v7 = vsel %vm11228_vm3, %v7930_v31, 0.0  ;;  %7011 = vst [vmem:[%s10665_s11 + $0x58] sm:$0xff] %v6979_v42   ;;  %v5841_v4 = vsel %vm11303_vm9, %v5793_v52, %v11239_v14  ;;  %v11326_v15 = vsub.s32 %v10917_v40, %v5571_v23  ;;  %v5582_v63 = vmul.u32 24, %v5581_v17  ;;  %v2849_v40 = vpop.f32.mrb[39].mxu1  ;;  %v4939_v18 = vpop.f32.mrb[39].mxu0 }
 0x2b4   : > { %v6128_v37 = vmul.f32 %v6026_v55, %v6026_v55  ;;  %v6073_v45 = vadd.f32 %v6072_v6, %v6026_v55  ;;  %v6174_v27 = vadd.f32 %v6173_v20, %v6127_v29  ;;  %v7932_v21 = vadd.f32 %v7870_v48, %v7614_v2  ;;  %v7618_v51 = vpop.f32.mrb[40].mxu1 }
 0x2b5   : > { %vm11333_vm15 = vcmp.lt.s32.totalorder %v5840_v24, 16  ;;  %v7933_v14 = vadd.f32 %v4936_v36, %v2846_v25  ;;  %vm5654_vm10 = vcmp.ne.s32.totalorder %v11308_v16, 0  ;;  %vm5702_vm0 = vcmp.lt.s32.totalorder %v11308_v16, 0  ;;  %v2862_v28 = vpop.f32.mrb[41].mxu1 }
 0x2b6   : > { %v5604_v43 = vmul.u32 24, %v5603_v57  ;;  %v6129_v39 = vmul.f32 %v6027_v7, %v6027_v7  ;;  %v6175_v54 = vadd.f32 %v6174_v27, %v6128_v37  ;;  %v6074_v26 = vadd.f32 %v6073_v45, %v6027_v7  ;;  %vm11376_vm12 = vmand %vm5702_vm0, %vm5654_vm10  ;;  %v7619_v5 = vpop.f32.mrb[42].mxu1 }
 0x2b7   : > { %v7934_v49 = vadd.f32 %v7871_v61, %v7615_v59  ;;  %vm11344_vm1 = vcmp.lt.s32.totalorder %v5842_v13, 16  ;;  %vm11348_vm3 = vcmp.lt.s32.totalorder %v5841_v4, 16  ;;  %v6028_v24 = vsel %vm11254_vm13, %v7933_v14, 0.0  ;;  %v2865_v55 = vpop.f32.mrb[43].mxu1 }
 0x2b8   : > { %v7935_v9 = vadd.f32 %v4939_v18, %v2849_v40  ;;  %v11355_v44 = vadd.s32 24, %v11308_v16  ;;  %v11358_v62 = vsub.s32 %v11125_v53, %v5582_v63  ;;  %v6075_v19 = vadd.f32 %v6074_v26, %v6028_v24  ;;  %v7622_v61 = vpop.f32.mrb[44].mxu1 }
 0x2b9   : > { %v6130_v47 = vmul.f32 %v6028_v24, %v6028_v24  ;;  %v6176_v56 = vadd.f32 %v6175_v54, %v6129_v39  ;;  %vm11360_vm2 = vcmp.lt.s32.totalorder %v5843_v58, 16  ;;  %vm5652_vm8 = vcmp.ne.s32.totalorder %v11326_v15, 0  ;;  %v2878_v54 = vpop.f32.mrb[45].mxu1 }
 0x2ba   : > { %v6030_v10 = vsel %vm11265_vm11, %v7932_v21, 0.0  ;;  %v6029_v23 = vsel %vm11274_vm6, %v7935_v9, 0.0  ;;  %v6984_v33 = vpack.c.bf16 %v7935_v9, %v7933_v14  ;;  %v11370_v53 = vsub.s32 %v11099_v34, %v5604_v43  ;;  %v7874_v34 = vpop.f32.mrb[40].mxu0  ;;  %v7623_v9 = vpop.f32.mrb[46].mxu1 }
 0x2bb   : > { %v6177_v38 = vadd.f32 %v6176_v56, %v6130_v47  ;;  %v6076_v22 = vadd.f32 %v6075_v19, %v6029_v23  ;;  %v6131_v31 = vmul.f32 %v6029_v23, %v6029_v23  ;;  %vm5700_vm13 = vcmp.lt.s32.totalorder %v11326_v15, 0  ;;  %v4952_v41 = vpop.f32.mrb[41].mxu0  ;;  %v2881_v56 = vpop.f32.mrb[47].mxu1 }
 0x2bc   : > { %v6031_v46 = vsel %vm11295_vm14, %v7934_v49, 0.0  ;;  %7012 = vst [vmem:[%s10665_s11 + $0x60] sm:$0xff] %v6984_v33   ;;  %v5796_v0 = vadd.s32 24, %v11326_v15  ;;  %vm5653_vm4 = vcmp.ne.s32.totalorder %v11358_v62, 0  ;;  %vm5701_vm7 = vcmp.lt.s32.totalorder %v11358_v62, 0  ;;  %v7875_v30 = vpop.f32.mrb[42].mxu0  ;;  %vm11395_vm11 = vmand %vm5700_vm13, %vm5652_vm8 }
 0x2bd   : > { %v6132_v35 = vmul.f32 %v6030_v10, %v6030_v10  ;;  %v6077_v50 = vadd.f32 %v6076_v22, %v6030_v10  ;;  %v6178_v52 = vadd.f32 %v6177_v38, %v6131_v31  ;;  %v7936_v17 = vadd.f32 %v7874_v34, %v7618_v51  ;;  %v4955_v2 = vpop.f32.mrb[43].mxu0  ;;  %vm11408_vm14 = vmand %vm5701_vm7, %vm5653_vm4 }
 0x2be   : > { %v7937_v8 = vadd.f32 %v4952_v41, %v2862_v28  ;;  %v5846_v3 = vsel %vm11376_vm12, %v11355_v44, %v11308_v16  ;;  %vm5655_vm6 = vcmp.ne.s32.totalorder %v11370_v53, 0  ;;  %v5797_v42 = vadd.s32 24, %v11358_v62  ;;  %v7878_v39 = vpop.f32.mrb[44].mxu0 }
 0x2bf   : > { %v6133_v57 = vmul.f32 %v6031_v46, %v6031_v46  ;;  %v6179_v20 = vadd.f32 %v6178_v52, %v6132_v35  ;;  %v6078_v6 = vadd.f32 %v6077_v50, %v6031_v46  ;;  %v7938_v29 = vadd.f32 %v7875_v30, %v7619_v5  ;;  %v4968_v24 = vpop.f32.mrb[45].mxu0 }
 0x2c0   : > { %v6032_v16 = vsel %vm11333_vm15, %v7937_v8, 0.0  ;;  %v6989_v58 = vpack.c.bf16 %v7937_v8, %v7934_v49  ;;  %v7939_v7 = vadd.f32 %v4955_v2, %v2865_v55  ;;  %vm5703_vm5 = vcmp.lt.s32.totalorder %v11370_v53, 0  ;;  %v7879_v19 = vpop.f32.mrb[46].mxu0 }
 0x2c1   : > { %v6079_v25 = vadd.f32 %v6078_v6, %v6032_v16  ;;  %v6134_v4 = vmul.f32 %v6032_v16, %v6032_v16  ;;  %v6180_v63 = vadd.f32 %v6179_v20, %v6133_v57  ;;  %v5844_v37 = vsel %vm11395_vm11, %v5796_v0, %v11326_v15  ;;  %vm11425_vm9 = vmand %vm5703_vm5, %vm5655_vm6  ;;  %v4971_v38 = vpop.f32.mrb[47].mxu0 }
 0x2c2   : > { %v6034_v45 = vsel %vm11344_vm1, %v7936_v17, 0.0  ;;  %7013 = vst [vmem:[%s10665_s11 + $0x68] sm:$0xff] %v6989_v58   ;;  %v6994_v27 = vpack.c.bf16 %v7938_v29, %v7936_v17  ;;  %v6033_v21 = vsel %vm11348_vm3, %v7939_v7, 0.0  ;;  %v5799_v36 = vadd.s32 24, %v11370_v53 }
 0x2c3   : > { %v6181_v59 = vadd.f32 %v6180_v63, %v6134_v4  ;;  %v6080_v32 = vadd.f32 %v6079_v25, %v6033_v21  ;;  %v6135_v14 = vmul.f32 %v6033_v21, %v6033_v21  ;;  %v5845_v40 = vsel %vm11408_vm14, %v5797_v42, %v11358_v62 }
 0x2c4   : > { %v6035_v43 = vsel %vm11360_vm2, %v7938_v29, 0.0  ;;  %7014 = vst [vmem:[%s10665_s11 + $0x70] sm:$0xff] %v6994_v27   ;;  %vm11435_vm15 = vcmp.lt.s32.totalorder %v5844_v37, 16  ;;  %v6136_v49 = vmul.f32 %v6034_v45, %v6034_v45  ;;  %v7940_v60 = vadd.f32 %v7878_v39, %v7622_v61 }
 0x2c5   : > { %v6081_v18 = vadd.f32 %v6080_v32, %v6034_v45  ;;  %v6182_v1 = vadd.f32 %v6181_v59, %v6135_v14  ;;  %vm11439_vm10 = vcmp.lt.s32.totalorder %v5846_v3, 16  ;;  %v7941_v62 = vadd.f32 %v4968_v24, %v2878_v54 }
 0x2c6   : > { %v5847_v47 = vsel %vm11425_vm9, %v5799_v36, %v11370_v53  ;;  %vm5893_vm0 = vcmp.lt.s32.totalorder %v5845_v40, 16  ;;  %v6137_v13 = vmul.f32 %v6035_v43, %v6035_v43  ;;  %v7942_v33 = vadd.f32 %v7879_v19, %v7623_v9 }
 0x2c7   : > { %v6183_v10 = vadd.f32 %v6182_v1, %v6136_v49  ;;  %v6082_v23 = vadd.f32 %v6081_v18, %v6035_v43  ;;  %v6036_v22 = vsel %vm11435_vm15, %v7941_v62, 0.0  ;;  %v7943_v31 = vadd.f32 %v4971_v38, %v2881_v56 }
 0x2c8   : > { %v6138_v12 = vmul.f32 %v6036_v22, %v6036_v22  ;;  %vm5895_vm1 = vcmp.lt.s32.totalorder %v5847_v47, 16  ;;  %v6038_v34 = vsel %vm11439_vm10, %v7940_v60, 0.0 }
 0x2c9   : > { %v6083_v51 = vadd.f32 %v6082_v23, %v6036_v22  ;;  %v6184_v46 = vadd.f32 %v6183_v10, %v6137_v13  ;;  %v6037_v53 = vsel %vm5893_vm0, %v7943_v31, 0.0  ;;  %v6999_v28 = vpack.c.bf16 %v7940_v60, %v7943_v31 }
 0x2ca   : > { %v6139_v50 = vmul.f32 %v6037_v53, %v6037_v53  ;;  %v6039_v52 = vsel %vm5895_vm1, %v7942_v33, 0.0  ;;  %v6140_v17 = vmul.f32 %v6038_v34, %v6038_v34 }
 0x2cb   : > { %v6185_v0 = vadd.f32 %v6184_v46, %v6138_v12  ;;  %v6084_v35 = vadd.f32 %v6083_v51, %v6037_v53  ;;  %7015 = vst [vmem:[%s10665_s11 + $0x78] sm:$0xff] %v6999_v28   ;;  %v6141_v8 = vmul.f32 %v6039_v52, %v6039_v52 }
 0x2cd   : > { %v6085_v41 = vadd.f32 %v6084_v35, %v6038_v34  ;;  %v6186_v5 = vadd.f32 %v6185_v0, %v6139_v50 }
 0x2cf   : > { %v6086_v30 = vadd.f32 %v6085_v41, %v6039_v52  ;;  %v6187_v55 = vadd.f32 %v6186_v5, %v6140_v17 }
 0x2d1   : > { %v6087_v3 = vrot.slane %v6086_v30, 4  ;;  %v6188_v11 = vadd.f32 %v6187_v55, %v6141_v8 }
 0x2d3   : > { %v6088_v42 = vadd.f32 %v6087_v3, %v6086_v30  ;;  %v6189_v57 = vrot.slane %v6188_v11, 4 }
 0x2d5   : > { %v6089_v20 = vrot.slane %v6088_v42, 2  ;;  %v6190_v6 = vadd.f32 %v6189_v57, %v6188_v11 }
 0x2d7   : > { %v6090_v29 = vadd.f32 %v6089_v20, %v6088_v42  ;;  %v6191_v2 = vrot.slane %v6190_v6, 2 }
 0x2d9   : > { %v6091_v16 = vrot.slane %v6090_v29, 1  ;;  %v6192_v58 = vadd.f32 %v6191_v2, %v6190_v6 }
 0x2db   : > { %v6092_v7 = vadd.f32 %v6091_v16, %v6090_v29  ;;  %v6193_v48 = vrot.slane %v6192_v58, 1 }
 0x2dd   : > { %6093 = vst [vmem:[%s261_s14] sm:$0x1] %v6092_v7  ;;  %v6194_v25 = vadd.f32 %v6193_v48, %v6192_v58 }
 0x2df   : > { %6195 = vst [vmem:[%s267_s22] sm:$0x1] %v6194_v25 }
 0x2e0 PF: > { %s15_s17 = sadd.s32 1, %s8667_s17   ;;  %s12038_s15 = smov %s8663_s16 }
 0x2e1   : > { %p12_p5 = scmp.ge.s32.totalorder %s15_s17, 4   ;;  %s12039_s16 = smov %s12041_s18 }
 0x2e3   :  { %14 = sbr.rel (!%p12_p5) target bundleno = 2 (0x2), region = 93 }

</bundles_post_ra>
